<compile_context>
chip_gen: v7x
topology: tpu7x:2x2x1
jax: 0.10.0
libtpu: 0.0.40
codegen_flags: <defaults>
</compile_context>

<pallas_src>
import jax
import jax.numpy as jnp
from jax import lax
from jax.experimental import pallas as pl
from jax.experimental.pallas import tpu as pltpu


def _resblock_kernel(xpad_ref, x_ref, w1_ref, b1_ref, w2_ref, b2_ref, o_ref):
    B, Hp, Wp, C = xpad_ref.shape
    H, W = Hp - 2, Wp - 2
    M = B * H * W
    R = w1_ref.shape[-1]

    # 3x3 "same" conv of relu(x) as 9 shifted matmuls with f32 accumulation.
    # relu commutes with zero padding (relu(0) == 0), so we ReLU the padded
    # patches directly (this is the block's leading ReLU).
    acc = jnp.zeros((M, R), dtype=jnp.float32)
    for k in range(9):                      # static unroll over the 3x3 taps
        ky, kx = divmod(k, 3)
        patch = xpad_ref[:, ky:ky + H, kx:kx + W, :]          # (B, H, W, C)
        a = jnp.maximum(patch, 0.0).reshape(M, C)
        acc = acc + jnp.dot(a, w1_ref[k],
                            preferred_element_type=jnp.float32)

    # BN1 is folded into w1/b1 -> bias add + ReLU.
    h = jnp.maximum(acc + b1_ref[...], 0.0)

    # 1x1 conv (+ folded BN2) + ReLU.
    g = jnp.dot(h, w2_ref[...], preferred_element_type=jnp.float32) + b2_ref[...]
    g = jnp.maximum(g, 0.0)

    # Residual add.
    o_ref[...] = (x_ref[...] + g).astype(o_ref.dtype)


def resblock_forward(x, w1f, b1f, w2f, b2f):
    """x: (B, H, W, C) NHWC.
    w1f: (3, 3, C, R) conv3x3 weights (HWIO) with BN1 folded, b1f: (R,),
    w2f: (R, C) conv1x1 weights with BN2 folded,             b2f: (C,)."""
    B, H, W, C = x.shape
    R = w1f.shape[-1]
    M = B * H * W

    # Host-side layout plumbing (all free metadata / cheap XLA ops).
    xpad = jnp.pad(x, ((0, 0), (1, 1), (1, 1), (0, 0)))        # (B, H+2, W+2, C)
    x_flat = x.reshape(M, C)
    w1k = w1f.reshape(9, C, R)
    b1 = b1f.reshape(1, R)
    b2 = b2f.reshape(1, C)

    inputs = (xpad, x_flat, w1k, b1, w2f, b2)

    def full_spec(a):
        nd = a.ndim
        return pl.BlockSpec(a.shape, lambda i, _nd=nd: (0,) * _nd)

    grid_spec = pl.GridSpec(
        grid=(1,),
        in_specs=[full_spec(a) for a in inputs],
        out_specs=pl.BlockSpec((M, C), lambda i: (0, 0)),
    )

    y = pl.pallas_call(
        _resblock_kernel,
        out_shape=jax.ShapeDtypeStruct((M, C), jnp.float32),
        grid_spec=grid_spec,
        compiler_params=pltpu.CompilerParams(
            dimension_semantics=("arbitrary",)),
    )(*inputs)
    return y.reshape(B, H, W, C)


def fold_batchnorm(conv_w, conv_b, gamma, beta, mean, var, eps=1e-5):
    """Fold eval-mode BatchNorm into conv weights/bias.
    conv_w: (..., out_ch); conv_b/gamma/beta/mean/var: (out_ch,)."""
    s = gamma / jnp.sqrt(var + eps)
    return conv_w * s, s * (conv_b - mean) + beta


def _reference(x, p, eps=1e-5):
    """Pure-JAX reference: ReLU -> conv3x3 -> BN -> ReLU -> conv1x1 -> BN -> ReLU, + x."""
    (w1, cb1, g1, be1, m1, v1, w2, cb2, g2, be2, m2, v2) = p
    dn = ("NHWC", "HWIO", "NHWC")
    a = jax.nn.relu(x)
    h = lax.conv_general_dilated(a, w1, (1, 1), "SAME", dimension_numbers=dn) + cb1
    h = g1 * (h - m1) / jnp.sqrt(v1 + eps) + be1
    h = jax.nn.relu(h)
    g = lax.conv_general_dilated(h, w2, (1, 1), "SAME", dimension_numbers=dn) + cb2
    g = g2 * (g - m2) / jnp.sqrt(v2 + eps) + be2
    g = jax.nn.relu(g)
    return x + g


if __name__ == "__main__":
    # ResBlock(dim=16, dim_res=32), NHWC input (2, 16, 16, 16).
    B, H, W = 2, 16, 16
    dim, dim_res = 16, 32
    eps = 1e-5

    key = jax.random.PRNGKey(0)
    ks = jax.random.split(key, 13)

    # Conv2d(dim, dim_res, 3, 1, 1) + BatchNorm2d(dim_res)   (weights in HWIO)
    w1 = jax.random.normal(ks[0], (3, 3, dim, dim_res), jnp.float32) / jnp.sqrt(9.0 * dim)
    cb1 = 0.1 * jax.random.normal(ks[1], (dim_res,), jnp.float32)
    g1 = 1.0 + 0.1 * jax.random.normal(ks[2], (dim_res,), jnp.float32)
    be1 = 0.1 * jax.random.normal(ks[3], (dim_res,), jnp.float32)
    m1 = 0.1 * jax.random.normal(ks[4], (dim_res,), jnp.float32)
    v1 = jax.random.uniform(ks[5], (dim_res,), jnp.float32, 0.5, 1.5)

    # Conv2d(dim_res, dim, 1) + BatchNorm2d(dim)
    w2 = jax.random.normal(ks[6], (1, 1, dim_res, dim), jnp.float32) / jnp.sqrt(float(dim_res))
    cb2 = 0.1 * jax.random.normal(ks[7], (dim,), jnp.float32)
    g2 = 1.0 + 0.1 * jax.random.normal(ks[8], (dim,), jnp.float32)
    be2 = 0.1 * jax.random.normal(ks[9], (dim,), jnp.float32)
    m2 = 0.1 * jax.random.normal(ks[10], (dim,), jnp.float32)
    v2 = jax.random.uniform(ks[11], (dim,), jnp.float32, 0.5, 1.5)

    x = jax.random.normal(ks[12], (B, H, W, dim), jnp.float32)

    # Host-side BN folding (inference mode).
    w1f, b1f = fold_batchnorm(w1, cb1, g1, be1, m1, v1, eps)
    w2f, b2f = fold_batchnorm(w2[0, 0], cb2, g2, be2, m2, v2, eps)

    y = resblock_forward(x, w1f, b1f, w2f, b2f)
    y = jax.block_until_ready(y)

    y_ref = _reference(x, (w1, cb1, g1, be1, m1, v1, w2, cb2, g2, be2, m2, v2), eps)
    assert y.shape == (B, H, W, dim)
    err = float(jnp.max(jnp.abs(y - y_ref)))
    assert jnp.allclose(y, y_ref, atol=1e-4, rtol=1e-4), err

    print("KERNEL_OK")
</pallas_src>

<mosaic_0001>
module attributes {stable_mosaic.version = 11 : i64} {
  func.func @_resblock_kernel(%arg0: i32, %arg1: memref<2x18x18x16xf32, #tpu.memory_space<vmem>>, %arg2: memref<512x16xf32, #tpu.memory_space<vmem>>, %arg3: memref<9x16x32xf32, #tpu.memory_space<vmem>>, %arg4: memref<1x32xf32, #tpu.memory_space<vmem>>, %arg5: memref<32x16xf32, #tpu.memory_space<vmem>>, %arg6: memref<1x16xf32, #tpu.memory_space<vmem>>, %arg7: memref<512x16xf32, #tpu.memory_space<vmem>>) attributes {dimension_semantics = [#tpu.dimension_semantics<arbitrary>], iteration_bounds = array<i64: 1>, scalar_prefetch = 0 : i64, scratch_operands = 0 : i64, tpu.core_type = #tpu.core_type<tc>, window_params = [{pipeline_mode = #tpu.pipeline_mode<synchronous>, transform_indices = @transform_0, window_bounds = array<i64: 2, 18, 18, 16>}, {pipeline_mode = #tpu.pipeline_mode<synchronous>, transform_indices = @transform_1, window_bounds = array<i64: 512, 16>}, {pipeline_mode = #tpu.pipeline_mode<synchronous>, transform_indices = @transform_2, window_bounds = array<i64: 9, 16, 32>}, {pipeline_mode = #tpu.pipeline_mode<synchronous>, transform_indices = @transform_3, window_bounds = array<i64: 1, 32>}, {pipeline_mode = #tpu.pipeline_mode<synchronous>, transform_indices = @transform_4, window_bounds = array<i64: 32, 16>}, {pipeline_mode = #tpu.pipeline_mode<synchronous>, transform_indices = @transform_5, window_bounds = array<i64: 1, 16>}, {pipeline_mode = #tpu.pipeline_mode<synchronous>, transform_indices = @transform_6, window_bounds = array<i64: 512, 16>}]} {
    %cst = arith.constant 0.000000e+00 : f32
    %0 = vector.broadcast %cst : f32 to vector<512x32xf32>
    %c0 = arith.constant 0 : index
    %c0_0 = arith.constant 0 : index
    %c0_1 = arith.constant 0 : index
    %c0_2 = arith.constant 0 : index
    %1 = vector.load %arg1[%c0, %c0_0, %c0_1, %c0_2] : memref<2x18x18x16xf32, #tpu.memory_space<vmem>>, vector<2x16x16x16xf32>
    %cst_3 = arith.constant 0.000000e+00 : f32
    %2 = vector.broadcast %cst_3 : f32 to vector<2x16x16x16xf32>
    %3 = arith.maximumf %1, %2 : vector<2x16x16x16xf32>
    %4 = vector.shape_cast %3 : vector<2x16x16x16xf32> to vector<512x16xf32>
    %c0_4 = arith.constant 0 : index
    %c0_5 = arith.constant 0 : index
    %c0_6 = arith.constant 0 : index
    %5 = vector.load %arg3[%c0_4, %c0_5, %c0_6] : memref<9x16x32xf32, #tpu.memory_space<vmem>>, vector<1x16x32xf32>
    %6 = vector.shape_cast %5 : vector<1x16x32xf32> to vector<16x32xf32>
    %cst_7 = arith.constant dense<0.000000e+00> : vector<512x32xf32>
    %7 = tpu.matmul %4, %6, %cst_7 {dimension_numbers = #tpu.dot_dimension_numbers<[1], [0], [0], [1], [0, 0, 1, 1], [], []>} : vector<512x16xf32>, vector<16x32xf32>, vector<512x32xf32> -> vector<512x32xf32>
    %8 = arith.addf %0, %7 : vector<512x32xf32>
    %c0_8 = arith.constant 0 : index
    %c0_9 = arith.constant 0 : index
    %c1 = arith.constant 1 : index
    %c0_10 = arith.constant 0 : index
    %9 = vector.load %arg1[%c0_8, %c0_9, %c1, %c0_10] : memref<2x18x18x16xf32, #tpu.memory_space<vmem>>, vector<2x16x16x16xf32>
    %cst_11 = arith.constant 0.000000e+00 : f32
    %10 = vector.broadcast %cst_11 : f32 to vector<2x16x16x16xf32>
    %11 = arith.maximumf %9, %10 : vector<2x16x16x16xf32>
    %12 = vector.shape_cast %11 : vector<2x16x16x16xf32> to vector<512x16xf32>
    %c1_12 = arith.constant 1 : index
    %c0_13 = arith.constant 0 : index
    %c0_14 = arith.constant 0 : index
    %13 = vector.load %arg3[%c1_12, %c0_13, %c0_14] : memref<9x16x32xf32, #tpu.memory_space<vmem>>, vector<1x16x32xf32>
    %14 = vector.shape_cast %13 : vector<1x16x32xf32> to vector<16x32xf32>
    %cst_15 = arith.constant dense<0.000000e+00> : vector<512x32xf32>
    %15 = tpu.matmul %12, %14, %cst_15 {dimension_numbers = #tpu.dot_dimension_numbers<[1], [0], [0], [1], [0, 0, 1, 1], [], []>} : vector<512x16xf32>, vector<16x32xf32>, vector<512x32xf32> -> vector<512x32xf32>
    %16 = arith.addf %8, %15 : vector<512x32xf32>
    %c0_16 = arith.constant 0 : index
    %c0_17 = arith.constant 0 : index
    %c2 = arith.constant 2 : index
    %c0_18 = arith.constant 0 : index
    %17 = vector.load %arg1[%c0_16, %c0_17, %c2, %c0_18] : memref<2x18x18x16xf32, #tpu.memory_space<vmem>>, vector<2x16x16x16xf32>
    %cst_19 = arith.constant 0.000000e+00 : f32
    %18 = vector.broadcast %cst_19 : f32 to vector<2x16x16x16xf32>
    %19 = arith.maximumf %17, %18 : vector<2x16x16x16xf32>
    %20 = vector.shape_cast %19 : vector<2x16x16x16xf32> to vector<512x16xf32>
    %c2_20 = arith.constant 2 : index
    %c0_21 = arith.constant 0 : index
    %c0_22 = arith.constant 0 : index
    %21 = vector.load %arg3[%c2_20, %c0_21, %c0_22] : memref<9x16x32xf32, #tpu.memory_space<vmem>>, vector<1x16x32xf32>
    %22 = vector.shape_cast %21 : vector<1x16x32xf32> to vector<16x32xf32>
    %cst_23 = arith.constant dense<0.000000e+00> : vector<512x32xf32>
    %23 = tpu.matmul %20, %22, %cst_23 {dimension_numbers = #tpu.dot_dimension_numbers<[1], [0], [0], [1], [0, 0, 1, 1], [], []>} : vector<512x16xf32>, vector<16x32xf32>, vector<512x32xf32> -> vector<512x32xf32>
    %24 = arith.addf %16, %23 : vector<512x32xf32>
    %c0_24 = arith.constant 0 : index
    %c1_25 = arith.constant 1 : index
    %c0_26 = arith.constant 0 : index
    %c0_27 = arith.constant 0 : index
    %25 = vector.load %arg1[%c0_24, %c1_25, %c0_26, %c0_27] : memref<2x18x18x16xf32, #tpu.memory_space<vmem>>, vector<2x16x16x16xf32>
    %cst_28 = arith.constant 0.000000e+00 : f32
    %26 = vector.broadcast %cst_28 : f32 to vector<2x16x16x16xf32>
    %27 = arith.maximumf %25, %26 : vector<2x16x16x16xf32>
    %28 = vector.shape_cast %27 : vector<2x16x16x16xf32> to vector<512x16xf32>
    %c3 = arith.constant 3 : index
    %c0_29 = arith.constant 0 : index
    %c0_30 = arith.constant 0 : index
    %29 = vector.load %arg3[%c3, %c0_29, %c0_30] : memref<9x16x32xf32, #tpu.memory_space<vmem>>, vector<1x16x32xf32>
    %30 = vector.shape_cast %29 : vector<1x16x32xf32> to vector<16x32xf32>
    %cst_31 = arith.constant dense<0.000000e+00> : vector<512x32xf32>
    %31 = tpu.matmul %28, %30, %cst_31 {dimension_numbers = #tpu.dot_dimension_numbers<[1], [0], [0], [1], [0, 0, 1, 1], [], []>} : vector<512x16xf32>, vector<16x32xf32>, vector<512x32xf32> -> vector<512x32xf32>
    %32 = arith.addf %24, %31 : vector<512x32xf32>
    %c0_32 = arith.constant 0 : index
    %c1_33 = arith.constant 1 : index
    %c1_34 = arith.constant 1 : index
    %c0_35 = arith.constant 0 : index
    %33 = vector.load %arg1[%c0_32, %c1_33, %c1_34, %c0_35] : memref<2x18x18x16xf32, #tpu.memory_space<vmem>>, vector<2x16x16x16xf32>
    %cst_36 = arith.constant 0.000000e+00 : f32
    %34 = vector.broadcast %cst_36 : f32 to vector<2x16x16x16xf32>
    %35 = arith.maximumf %33, %34 : vector<2x16x16x16xf32>
    %36 = vector.shape_cast %35 : vector<2x16x16x16xf32> to vector<512x16xf32>
    %c4 = arith.constant 4 : index
    %c0_37 = arith.constant 0 : index
    %c0_38 = arith.constant 0 : index
    %37 = vector.load %arg3[%c4, %c0_37, %c0_38] : memref<9x16x32xf32, #tpu.memory_space<vmem>>, vector<1x16x32xf32>
    %38 = vector.shape_cast %37 : vector<1x16x32xf32> to vector<16x32xf32>
    %cst_39 = arith.constant dense<0.000000e+00> : vector<512x32xf32>
    %39 = tpu.matmul %36, %38, %cst_39 {dimension_numbers = #tpu.dot_dimension_numbers<[1], [0], [0], [1], [0, 0, 1, 1], [], []>} : vector<512x16xf32>, vector<16x32xf32>, vector<512x32xf32> -> vector<512x32xf32>
    %40 = arith.addf %32, %39 : vector<512x32xf32>
    %c0_40 = arith.constant 0 : index
    %c1_41 = arith.constant 1 : index
    %c2_42 = arith.constant 2 : index
    %c0_43 = arith.constant 0 : index
    %41 = vector.load %arg1[%c0_40, %c1_41, %c2_42, %c0_43] : memref<2x18x18x16xf32, #tpu.memory_space<vmem>>, vector<2x16x16x16xf32>
    %cst_44 = arith.constant 0.000000e+00 : f32
    %42 = vector.broadcast %cst_44 : f32 to vector<2x16x16x16xf32>
    %43 = arith.maximumf %41, %42 : vector<2x16x16x16xf32>
    %44 = vector.shape_cast %43 : vector<2x16x16x16xf32> to vector<512x16xf32>
    %c5 = arith.constant 5 : index
    %c0_45 = arith.constant 0 : index
    %c0_46 = arith.constant 0 : index
    %45 = vector.load %arg3[%c5, %c0_45, %c0_46] : memref<9x16x32xf32, #tpu.memory_space<vmem>>, vector<1x16x32xf32>
    %46 = vector.shape_cast %45 : vector<1x16x32xf32> to vector<16x32xf32>
    %cst_47 = arith.constant dense<0.000000e+00> : vector<512x32xf32>
    %47 = tpu.matmul %44, %46, %cst_47 {dimension_numbers = #tpu.dot_dimension_numbers<[1], [0], [0], [1], [0, 0, 1, 1], [], []>} : vector<512x16xf32>, vector<16x32xf32>, vector<512x32xf32> -> vector<512x32xf32>
    %48 = arith.addf %40, %47 : vector<512x32xf32>
    %c0_48 = arith.constant 0 : index
    %c2_49 = arith.constant 2 : index
    %c0_50 = arith.constant 0 : index
    %c0_51 = arith.constant 0 : index
    %49 = vector.load %arg1[%c0_48, %c2_49, %c0_50, %c0_51] : memref<2x18x18x16xf32, #tpu.memory_space<vmem>>, vector<2x16x16x16xf32>
    %cst_52 = arith.constant 0.000000e+00 : f32
    %50 = vector.broadcast %cst_52 : f32 to vector<2x16x16x16xf32>
    %51 = arith.maximumf %49, %50 : vector<2x16x16x16xf32>
    %52 = vector.shape_cast %51 : vector<2x16x16x16xf32> to vector<512x16xf32>
    %c6 = arith.constant 6 : index
    %c0_53 = arith.constant 0 : index
    %c0_54 = arith.constant 0 : index
    %53 = vector.load %arg3[%c6, %c0_53, %c0_54] : memref<9x16x32xf32, #tpu.memory_space<vmem>>, vector<1x16x32xf32>
    %54 = vector.shape_cast %53 : vector<1x16x32xf32> to vector<16x32xf32>
    %cst_55 = arith.constant dense<0.000000e+00> : vector<512x32xf32>
    %55 = tpu.matmul %52, %54, %cst_55 {dimension_numbers = #tpu.dot_dimension_numbers<[1], [0], [0], [1], [0, 0, 1, 1], [], []>} : vector<512x16xf32>, vector<16x32xf32>, vector<512x32xf32> -> vector<512x32xf32>
    %56 = arith.addf %48, %55 : vector<512x32xf32>
    %c0_56 = arith.constant 0 : index
    %c2_57 = arith.constant 2 : index
    %c1_58 = arith.constant 1 : index
    %c0_59 = arith.constant 0 : index
    %57 = vector.load %arg1[%c0_56, %c2_57, %c1_58, %c0_59] : memref<2x18x18x16xf32, #tpu.memory_space<vmem>>, vector<2x16x16x16xf32>
    %cst_60 = arith.constant 0.000000e+00 : f32
    %58 = vector.broadcast %cst_60 : f32 to vector<2x16x16x16xf32>
    %59 = arith.maximumf %57, %58 : vector<2x16x16x16xf32>
    %60 = vector.shape_cast %59 : vector<2x16x16x16xf32> to vector<512x16xf32>
    %c7 = arith.constant 7 : index
    %c0_61 = arith.constant 0 : index
    %c0_62 = arith.constant 0 : index
    %61 = vector.load %arg3[%c7, %c0_61, %c0_62] : memref<9x16x32xf32, #tpu.memory_space<vmem>>, vector<1x16x32xf32>
    %62 = vector.shape_cast %61 : vector<1x16x32xf32> to vector<16x32xf32>
    %cst_63 = arith.constant dense<0.000000e+00> : vector<512x32xf32>
    %63 = tpu.matmul %60, %62, %cst_63 {dimension_numbers = #tpu.dot_dimension_numbers<[1], [0], [0], [1], [0, 0, 1, 1], [], []>} : vector<512x16xf32>, vector<16x32xf32>, vector<512x32xf32> -> vector<512x32xf32>
    %64 = arith.addf %56, %63 : vector<512x32xf32>
    %c0_64 = arith.constant 0 : index
    %c2_65 = arith.constant 2 : index
    %c2_66 = arith.constant 2 : index
    %c0_67 = arith.constant 0 : index
    %65 = vector.load %arg1[%c0_64, %c2_65, %c2_66, %c0_67] : memref<2x18x18x16xf32, #tpu.memory_space<vmem>>, vector<2x16x16x16xf32>
    %cst_68 = arith.constant 0.000000e+00 : f32
    %66 = vector.broadcast %cst_68 : f32 to vector<2x16x16x16xf32>
    %67 = arith.maximumf %65, %66 : vector<2x16x16x16xf32>
    %68 = vector.shape_cast %67 : vector<2x16x16x16xf32> to vector<512x16xf32>
    %c8 = arith.constant 8 : index
    %c0_69 = arith.constant 0 : index
    %c0_70 = arith.constant 0 : index
    %69 = vector.load %arg3[%c8, %c0_69, %c0_70] : memref<9x16x32xf32, #tpu.memory_space<vmem>>, vector<1x16x32xf32>
    %70 = vector.shape_cast %69 : vector<1x16x32xf32> to vector<16x32xf32>
    %cst_71 = arith.constant dense<0.000000e+00> : vector<512x32xf32>
    %71 = tpu.matmul %68, %70, %cst_71 {dimension_numbers = #tpu.dot_dimension_numbers<[1], [0], [0], [1], [0, 0, 1, 1], [], []>} : vector<512x16xf32>, vector<16x32xf32>, vector<512x32xf32> -> vector<512x32xf32>
    %72 = arith.addf %64, %71 : vector<512x32xf32>
    %c0_72 = arith.constant 0 : index
    %c0_73 = arith.constant 0 : index
    %73 = vector.load %arg4[%c0_72, %c0_73] : memref<1x32xf32, #tpu.memory_space<vmem>>, vector<1x32xf32>
    %74 = vector.broadcast %73 : vector<1x32xf32> to vector<512x32xf32>
    %75 = arith.addf %72, %74 : vector<512x32xf32>
    %cst_74 = arith.constant 0.000000e+00 : f32
    %76 = vector.broadcast %cst_74 : f32 to vector<512x32xf32>
    %77 = arith.maximumf %75, %76 : vector<512x32xf32>
    %c0_75 = arith.constant 0 : index
    %c0_76 = arith.constant 0 : index
    %78 = vector.load %arg5[%c0_75, %c0_76] : memref<32x16xf32, #tpu.memory_space<vmem>>, vector<32x16xf32>
    %cst_77 = arith.constant dense<0.000000e+00> : vector<512x16xf32>
    %79 = tpu.matmul %77, %78, %cst_77 {dimension_numbers = #tpu.dot_dimension_numbers<[1], [0], [0], [1], [0, 0, 1, 1], [], []>} : vector<512x32xf32>, vector<32x16xf32>, vector<512x16xf32> -> vector<512x16xf32>
    %c0_78 = arith.constant 0 : index
    %c0_79 = arith.constant 0 : index
    %80 = vector.load %arg6[%c0_78, %c0_79] : memref<1x16xf32, #tpu.memory_space<vmem>>, vector<1x16xf32>
    %81 = vector.broadcast %80 : vector<1x16xf32> to vector<512x16xf32>
    %82 = arith.addf %79, %81 : vector<512x16xf32>
    %cst_80 = arith.constant 0.000000e+00 : f32
    %83 = vector.broadcast %cst_80 : f32 to vector<512x16xf32>
    %84 = arith.maximumf %82, %83 : vector<512x16xf32>
    %c0_81 = arith.constant 0 : index
    %c0_82 = arith.constant 0 : index
    %85 = vector.load %arg2[%c0_81, %c0_82] : memref<512x16xf32, #tpu.memory_space<vmem>>, vector<512x16xf32>
    %86 = arith.addf %85, %84 : vector<512x16xf32>
    %c0_83 = arith.constant 0 : index
    %c0_84 = arith.constant 0 : index
    %87 = vector.load %arg7[%c0_83, %c0_84] : memref<512x16xf32, #tpu.memory_space<vmem>>, vector<512x16xf32>
    tpu.vector_store %arg7[%c0_83, %c0_84], %86 {strides = array<i32>} : memref<512x16xf32, #tpu.memory_space<vmem>>, vector<512x16xf32>,
    return
  }
  func.func @transform_0(%arg0: i32) -> (i32, i32, i32, i32) {
    %c0_i32 = arith.constant 0 : i32
    %c0_i32_0 = arith.constant 0 : i32
    %c0_i32_1 = arith.constant 0 : i32
    %c0_i32_2 = arith.constant 0 : i32
    %c0_i32_3 = arith.constant 0 : i32
    return %c0_i32, %c0_i32_0, %c0_i32_1, %c0_i32_2 : i32, i32, i32, i32
  }
  func.func @transform_1(%arg0: i32) -> (i32, i32) {
    %c0_i32 = arith.constant 0 : i32
    %c0_i32_0 = arith.constant 0 : i32
    %c0_i32_1 = arith.constant 0 : i32
    return %c0_i32, %c0_i32_0 : i32, i32
  }
  func.func @transform_2(%arg0: i32) -> (i32, i32, i32) {
    %c0_i32 = arith.constant 0 : i32
    %c0_i32_0 = arith.constant 0 : i32
    %c0_i32_1 = arith.constant 0 : i32
    %c0_i32_2 = arith.constant 0 : i32
    return %c0_i32, %c0_i32_0, %c0_i32_1 : i32, i32, i32
  }
  func.func @transform_3(%arg0: i32) -> (i32, i32) {
    %c0_i32 = arith.constant 0 : i32
    %c0_i32_0 = arith.constant 0 : i32
    %c0_i32_1 = arith.constant 0 : i32
    return %c0_i32, %c0_i32_0 : i32, i32
  }
  func.func @transform_4(%arg0: i32) -> (i32, i32) {
    %c0_i32 = arith.constant 0 : i32
    %c0_i32_0 = arith.constant 0 : i32
    %c0_i32_1 = arith.constant 0 : i32
    return %c0_i32, %c0_i32_0 : i32, i32
  }
  func.func @transform_5(%arg0: i32) -> (i32, i32) {
    %c0_i32 = arith.constant 0 : i32
    %c0_i32_0 = arith.constant 0 : i32
    %c0_i32_1 = arith.constant 0 : i32
    return %c0_i32, %c0_i32_0 : i32, i32
  }
  func.func @transform_6(%arg0: i32) -> (i32, i32) {
    %c0_i32 = arith.constant 0 : i32
    %c0_i32_0 = arith.constant 0 : i32
    %c0_i32_1 = arith.constant 0 : i32
    return %c0_i32, %c0_i32_0 : i32, i32
  }
}

</mosaic_0001>

<bundles_post_ra>
// kernel: tpu_custom_call.1
= control target key start
LH: loop header
LB: loop body
LE: loop exit
PB: predicated region body
PF: predicated region fallthrough
CT: control target
= control target key end

     0   :  { %vm284_vm0 = vcmask 130048   ;;  %vm6991_vm1 = vcmask 261120   ;;  %s14652_s2 = inlined_call_operand.vmem [shape: f32[9,16,32], index: 2, kind: input, shape index: {}]   ;;  %s14653_s0 = inlined_call_operand.vmem [shape: f32[2,18,18,16], index: 0, kind: input, shape index: {}]   ;;  %s14654_s4 = inlined_call_operand.vmem [shape: f32[32,16], index: 4, kind: input, shape index: {}]   ;;  %s14655_s3 = inlined_call_operand.vmem [shape: f32[1,32], index: 3, kind: input, shape index: {}]   ;;  %s14656_s5 = inlined_call_operand.vmem [shape: f32[1,16], index: 5, kind: input, shape index: {}]   ;;  %s14657_s1 = inlined_call_operand.vmem [shape: f32[512,16], index: 1, kind: input, shape index: {}]   ;;  %s14658_s6 = inlined_call_operand.vmem [shape: f32[512,16], index: 6, kind: output, shape index: {}]  }
   0x1   :  { %v7829_v0 = vld [vmem:[%s14652_s2 + $0x10] sm:$0xff]  ;;  %v7830_v1 = vld [vmem:[%s14652_s2 + $0x18] sm:$0xff]  ;;  %v8219_v2 = vld [vmem:[%s14652_s2 + $0x40] sm:$0xff] }
   0x2   :  { %v10537_v3 = vpack.c.bf16 %v7830_v1, %v7829_v0  ;;  %v8220_v4 = vld [vmem:[%s14652_s2 + $0x48] sm:$0xff]  ;;  %v8155_v6 = vld [vmem:[%s14653_s0 + $0x19] sm:$0xff]  ;;  %v8349_v12 = vld [vmem:[%s14652_s2 + $0x50] sm:$0xff] }
   0x3   :  { %v153_v5 = vld [vmem:[%s14653_s0 + $0x1] sm:$0xff]  ;;  %v10553_v7 = vpack.c.bf16 %v8220_v4, %v8219_v2  ;;  %v3048_v9 = vmax.f32 %v8155_v6, 0.0  ;;  %v154_v10 = vld [vmem:[%s14653_s0 + $0x9] sm:$0xff]  ;;  %v8350_v14 = vld [vmem:[%s14652_s2 + $0x58] sm:$0xff] }
   0x4   :  { %v217_v8 = vmax.f32 %v153_v5, 0.0  ;;  %v8156_v11 = vld [vmem:[%s14653_s0 + $0x21] sm:$0xff]  ;;  %10538 = vmatprep.subr.bf16.mxu1 %v10537_v3  ;;  %v218_v13 = vmax.f32 %v154_v10, 0.0  ;;  %v8157_v15 = vld [vmem:[%s14653_s0 + $0x31] sm:$0xff]  ;;  %v10557_v17 = vpack.c.bf16 %v8350_v14, %v8349_v12  ;;  %v8158_v19 = vld [vmem:[%s14653_s0 + $0x39] sm:$0xff] }
   0x5   :  { %10554 = vmatprep.subr.bf16.mxu0 %v10553_v7  ;;  %10540 = vmatpush3.bf16.msra.mxu1 %v10537_v3  ;;  %v3049_v16 = vmax.f32 %v8156_v11, 0.0  ;;  %v3050_v18 = vmax.f32 %v8157_v15, 0.0  ;;  %v8159_v20 = vld [vmem:[%s14653_s0 + $0x49] sm:$0xff]  ;;  %v3051_v21 = vmax.f32 %v8158_v19, 0.0  ;;  %v8160_v23 = vld [vmem:[%s14653_s0 + $0x51] sm:$0xff]  ;;  %v8161_v24 = vld [vmem:[%s14653_s0 + $0x61] sm:$0xff] }
   0x6   :  { %10556 = vmatpush3.bf16.msra.mxu0 %v10553_v7  ;;  %9537 = vmatprep.mubr.msk.f32.mxu1 %vm284_vm0, %v217_v8  ;;  %v3052_v22 = vmax.f32 %v8159_v20, 0.0  ;;  %v3053_v25 = vmax.f32 %v8160_v23, 0.0  ;;  %v3054_v26 = vmax.f32 %v8161_v24, 0.0  ;;  %v8162_v27 = vld [vmem:[%s14653_s0 + $0x69] sm:$0xff]  ;;  %v8163_v28 = vld [vmem:[%s14653_s0 + $0x79] sm:$0xff]  ;;  %v8164_v31 = vld [vmem:[%s14653_s0 + $0x81] sm:$0xff] }
   0x7   :  { %9937 = vmatprep.mubr.msk.f32.mxu0 %vm284_vm0, %v3048_v9  ;;  %10558 = vmatprep.subr.bf16.mxu0 %v10557_v17  ;;  %v3055_v29 = vmax.f32 %v8162_v27, 0.0  ;;  %v3056_v30 = vmax.f32 %v8163_v28, 0.0  ;;  %v8165_v32 = vld [vmem:[%s14653_s0 + $0x91] sm:$0xff]  ;;  %v3057_v33 = vmax.f32 %v8164_v31, 0.0  ;;  %v8166_v35 = vld [vmem:[%s14653_s0 + $0x99] sm:$0xff]  ;;  %v8167_v36 = vld [vmem:[%s14653_s0 + $0xa9] sm:$0xff] }
   0x8   :  { %9538 = vmatmul.mubr.msk.f32.vlgmr.msra.gmra.mrb[0].mxu1 %vm284_vm0, %v218_v13  ;;  %v3058_v34 = vmax.f32 %v8165_v32, 0.0  ;;  %v3059_v37 = vmax.f32 %v8166_v35, 0.0  ;;  %v151_v38 = vld [vmem:[%s14652_s2] sm:$0xff]  ;;  %v152_v39 = vld [vmem:[%s14652_s2 + $0x8] sm:$0xff]  ;;  %v3060_v40 = vmax.f32 %v8167_v36, 0.0  ;;  %v8168_v41 = vld [vmem:[%s14653_s0 + $0xb1] sm:$0xff] }
   0x9   :  { %9938 = vmatmul.mubr.msk.f32.vlgmr.msra.gmra.mrb[0].mxu0 %vm284_vm0, %v3049_v16  ;;  %9540 = vmatprep.mubr.msk.f32.mxu1 %vm284_vm0, %v3048_v9  ;;  %v10541_v42 = vpack.c.bf16 %v152_v39, %v151_v38  ;;  %v8169_v43 = vld [vmem:[%s14653_s0 + $0xc1] sm:$0xff]  ;;  %v3061_v46 = vmax.f32 %v8168_v41, 0.0  ;;  %v8170_v49 = vld [vmem:[%s14653_s0 + $0xc9] sm:$0xff]  ;;  %v8171_v50 = vld [vmem:[%s14653_s0 + $0xd9] sm:$0xff] }
   0xa   :  { %10560 = vmatpush3.bf16.msra.mxu0 %v10557_v17  ;;  %9940 = vmatprep.mubr.msk.f32.mxu0 %vm284_vm0, %v3050_v18  ;;  %v8479_v44 = vld [vmem:[%s14652_s2 + $0x60] sm:$0xff]  ;;  %v8480_v45 = vld [vmem:[%s14652_s2 + $0x68] sm:$0xff]  ;;  %v3062_v48 = vmax.f32 %v8169_v43, 0.0  ;;  %v3063_v51 = vmax.f32 %v8170_v49, 0.0  ;;  %v3064_v52 = vmax.f32 %v8171_v50, 0.0  ;;  %v8173_v54 = vld [vmem:[%s14653_s0 + $0xf1] sm:$0xff] }
   0xb   :  { %10542 = vmatprep.subr.bf16.mxu1 %v10541_v42  ;;  %v11234_v47 = vpack.c.bf16 %v8480_v45, %v8479_v44  ;;  %v8172_v53 = vld [vmem:[%s14653_s0 + $0xe1] sm:$0xff]  ;;  %v3066_v56 = vmax.f32 %v8173_v54, 0.0  ;;  %v8174_v57 = vld [vmem:[%s14653_s0 + $0xf9] sm:$0xff]  ;;  %v8175_v58 = vld [vmem:[%s14653_s0 + $0x109] sm:$0xff] }
   0xc   :  { %9541 = vmatmul.mubr.msk.f32.gmra.mrb[2].mxu1 %vm284_vm0, %v3049_v16  ;;  %v3065_v55 = vmax.f32 %v8172_v53, 0.0  ;;  %v3067_v59 = vmax.f32 %v8174_v57, 0.0  ;;  %v3068_v60 = vmax.f32 %v8175_v58, 0.0  ;;  %v8176_v61 = vld [vmem:[%s14653_s0 + $0x111] sm:$0xff]  ;;  %v8177_v62 = vld [vmem:[%s14653_s0 + $0x121] sm:$0xff]  ;;  %v8178_v1 = vld [vmem:[%s14653_s0 + $0x129] sm:$0xff] }
   0xd   :  { %9941 = vmatmul.mubr.msk.f32.gmra.mrb[2].mxu0 %vm284_vm0, %v3051_v21  ;;  %9543 = vmatprep.mubr.msk.f32.mxu1 %vm284_vm0, %v3050_v18  ;;  %v3069_v63 = vmax.f32 %v8176_v61, 0.0  ;;  %v3070_v0 = vmax.f32 %v8177_v62, 0.0  ;;  %v8179_v2 = vld [vmem:[%s14653_s0 + $0x139] sm:$0xff]  ;;  %v3071_v3 = vmax.f32 %v8178_v1, 0.0  ;;  %v8180_v5 = vld [vmem:[%s14653_s0 + $0x141] sm:$0xff]  ;;  %v8181_v6 = vld [vmem:[%s14653_s0 + $0x151] sm:$0xff] }
   0xe   :  { %9943 = vmatprep.mubr.msk.f32.mxu0 %vm284_vm0, %v3052_v22  ;;  %10544 = vmatpush3.bf16.msra.mxu1 %v10541_v42  ;;  %v3072_v4 = vmax.f32 %v8179_v2, 0.0  ;;  %v3073_v7 = vmax.f32 %v8180_v5, 0.0  ;;  %v3074_v8 = vmax.f32 %v8181_v6, 0.0  ;;  %v8182_v9 = vld [vmem:[%s14653_s0 + $0x159] sm:$0xff]  ;;  %v8183_v10 = vld [vmem:[%s14653_s0 + $0x169] sm:$0xff]  ;;  %v8184_v13 = vld [vmem:[%s14653_s0 + $0x171] sm:$0xff] }
   0xf   :  { %10562 = vmatprep.subr.bf16.mxu0 %v11234_v47  ;;  %v3075_v11 = vmax.f32 %v8182_v9, 0.0  ;;  %v3076_v12 = vmax.f32 %v8183_v10, 0.0  ;;  %v8185_v14 = vld [vmem:[%s14653_s0 + $0x181] sm:$0xff]  ;;  %v3077_v15 = vmax.f32 %v8184_v13, 0.0  ;;  %v8186_v17 = vld [vmem:[%s14653_s0 + $0x189] sm:$0xff]  ;;  %v185_v18 = vld [vmem:[%s14653_s0 + $0x1b1] sm:$0xff] }
  0x10   :  { %9544 = vmatmul.mubr.msk.f32.gmra.mrb[4].mxu1 %vm284_vm0, %v3051_v21  ;;  %v3078_v16 = vmax.f32 %v8185_v14, 0.0  ;;  %v8187_v19 = vld [vmem:[%s14653_s0 + $0x1c9] sm:$0xff]  ;;  %v3079_v20 = vmax.f32 %v8186_v17, 0.0  ;;  %v249_v21 = vmax.f32 %v185_v18, 0.0  ;;  %v8188_v24 = vld [vmem:[%s14653_s0 + $0x1d1] sm:$0xff]  ;;  %v8197_v42 = vld [vmem:[%s14653_s0 + $0x241] sm:$0xff] }
  0x11   :  { %9944 = vmatmul.mubr.msk.f32.gmra.mrb[4].mxu0 %vm284_vm0, %v3053_v25  ;;  %9546 = vmatprep.mubr.msk.f32.mxu1 %vm284_vm0, %v3052_v22  ;;  %v186_v22 = vld [vmem:[%s14653_s0 + $0x1b9] sm:$0xff]  ;;  %v3080_v23 = vmax.f32 %v8187_v19, 0.0  ;;  %v3081_v27 = vmax.f32 %v8188_v24, 0.0  ;;  %v8195_v38 = vld [vmem:[%s14653_s0 + $0x229] sm:$0xff]  ;;  %v8196_v41 = vld [vmem:[%s14653_s0 + $0x231] sm:$0xff]  ;;  %v3090_v44 = vmax.f32 %v8197_v42, 0.0 }
  0x12   :  { %9946 = vmatprep.mubr.msk.f32.mxu0 %vm284_vm0, %v3054_v26  ;;  %v3089_v43 = vmax.f32 %v8196_v41, 0.0  ;;  %v8198_v45 = vld [vmem:[%s14653_s0 + $0x249] sm:$0xff]  ;;  %v8200_v50 = vld [vmem:[%s14653_s0 + $0x261] sm:$0xff]  ;;  %v8202_v54 = vld [vmem:[%s14653_s0 + $0x279] sm:$0xff] }
  0x13   :  { %v8204_v58 = vld [vmem:[%s14653_s0 + $0x291] sm:$0xff]  ;;  %v8206_v62 = vld [vmem:[%s14653_s0 + $0x2a9] sm:$0xff]  ;;  %v8208_v2 = vld [vmem:[%s14653_s0 + $0x2c1] sm:$0xff] }
  0x14   :  { %9547 = vmatmul.mubr.msk.f32.gmra.mrb[6].mxu1 %vm284_vm0, %v3053_v25  ;;  %v8189_v25 = vld [vmem:[%s14653_s0 + $0x1e1] sm:$0xff]  ;;  %v8210_v6 = vld [vmem:[%s14653_s0 + $0x2d9] sm:$0xff]  ;;  %v8212_v10 = vld [vmem:[%s14653_s0 + $0x2f1] sm:$0xff] }
  0x15   :  { %9947 = vmatmul.mubr.msk.f32.gmra.mrb[6].mxu0 %vm284_vm0, %v3055_v29  ;;  %9549 = vmatprep.mubr.msk.f32.mxu1 %vm284_vm0, %v3054_v26  ;;  %v250_v26 = vmax.f32 %v186_v22, 0.0  ;;  %v3082_v28 = vmax.f32 %v8189_v25, 0.0  ;;  %v8214_v14 = vld [vmem:[%s14653_s0 + $0x309] sm:$0xff]  ;;  %v8216_v18 = vld [vmem:[%s14653_s0 + $0x321] sm:$0xff]  ;;  %v8217_v19 = vld [vmem:[%s14653_s0 + $0x331] sm:$0xff] }
  0x16   :  { %9949 = vmatprep.mubr.msk.f32.mxu0 %vm284_vm0, %v3056_v30  ;;  %v8218_v22 = vld [vmem:[%s14653_s0 + $0x339] sm:$0xff]  ;;  %v11541_v41 = vld [vmem:[%s14653_s0 + $0x30] sm:$0xff] }
  0x17   :  { %v11493_v24 = vld [vmem:[%s14653_s0 + $0x1a] sm:$0xff]  ;;  %v3111_v25 = vmax.f32 %v8218_v22, 0.0  ;;  %v11546_v42 = vld [vmem:[%s14653_s0 + $0x4a] sm:$0xff] }
  0x18   :  { %9550 = vmatmul.mubr.msk.f32.gmra.mrb[8].mxu1 %vm284_vm0, %v3055_v29  ;;  %v8190_v29 = vld [vmem:[%s14653_s0 + $0x1e9] sm:$0xff] }
  0x19   :  { %9950 = vmatmul.mubr.msk.f32.gmra.mrb[8].mxu0 %vm284_vm0, %v3057_v33  ;;  %9552 = vmatprep.mubr.msk.f32.mxu1 %vm284_vm0, %v3056_v30  ;;  %v8191_v30 = vld [vmem:[%s14653_s0 + $0x1f9] sm:$0xff]  ;;  %v3083_v31 = vmax.f32 %v8190_v29, 0.0  ;;  %v14702_v29 = vmax.f32 %v11493_v24, 0.0 }
  0x1a   :  { %9952 = vmatprep.mubr.msk.f32.mxu0 %vm284_vm0, %v3058_v34  ;;  %v3084_v32 = vmax.f32 %v8191_v30, 0.0  ;;  %v25_v30 = vld [vmem:[%s14653_s0 + $0x18] sm:$0xff] }
  0x1c   :  { %9553 = vmatmul.mubr.msk.f32.gmra.mrb[10].mxu1 %vm284_vm0, %v3057_v33  ;;  %v8192_v33 = vld [vmem:[%s14653_s0 + $0x201] sm:$0xff] }
  0x1d   :  { %9953 = vmatmul.mubr.msk.f32.gmra.mrb[10].mxu0 %vm284_vm0, %v3059_v37  ;;  %9555 = vmatprep.mubr.msk.f32.mxu1 %vm284_vm0, %v3058_v34  ;;  %v8193_v34 = vld [vmem:[%s14653_s0 + $0x211] sm:$0xff]  ;;  %v3085_v35 = vmax.f32 %v8192_v33, 0.0 }
  0x1e   :  { %9955 = vmatprep.mubr.msk.f32.mxu0 %vm284_vm0, %v3060_v40  ;;  %v3086_v36 = vmax.f32 %v8193_v34, 0.0  ;;  %v11520_v33 = vld [vmem:[%s14653_s0 + $0x32] sm:$0xff] }
  0x20   :  { %9556 = vmatmul.mubr.msk.f32.gmra.mrb[12].mxu1 %vm284_vm0, %v3059_v37  ;;  %v8194_v37 = vld [vmem:[%s14653_s0 + $0x219] sm:$0xff] }
  0x21   :  { %9956 = vmatmul.mubr.msk.f32.gmra.mrb[12].mxu0 %vm284_vm0, %v3061_v46  ;;  %9558 = vmatprep.mubr.msk.f32.mxu1 %vm284_vm0, %v3060_v40  ;;  %v3087_v39 = vmax.f32 %v8194_v37, 0.0  ;;  %v3088_v40 = vmax.f32 %v8195_v38, 0.0  ;;  %v89_v37 = vmax.f32 %v25_v30, 0.0  ;;  %v26_v38 = vld [vmem:[%s14653_s0 + $0x20] sm:$0xff]  ;;  %v11755_v30 = vld [vmem:[%s14653_s0 + $0xca] sm:$0xff] }
  0x22   :  { %9958 = vmatprep.mubr.msk.f32.mxu0 %vm284_vm0, %v3062_v48 }
  0x24   :  { %9559 = vmatmul.mubr.msk.f32.gmra.mrb[14].mxu1 %vm284_vm0, %v3061_v46  ;;  %v8199_v46 = vld [vmem:[%s14653_s0 + $0x259] sm:$0xff] }
  0x25   :  { %9959 = vmatmul.mubr.msk.f32.gmra.mrb[14].mxu0 %vm284_vm0, %v3063_v51  ;;  %9561 = vmatprep.mubr.msk.f32.mxu1 %vm284_vm0, %v3062_v48  ;;  %v3091_v48 = vmax.f32 %v8198_v45, 0.0  ;;  %v3092_v49 = vmax.f32 %v8199_v46, 0.0  ;;  %v14707_v45 = vmax.f32 %v11541_v41, 0.0  ;;  %v11558_v46 = vld [vmem:[%s14653_s0 + $0x38] sm:$0xff] }
  0x26   :  { %9961 = vmatprep.mubr.msk.f32.mxu0 %vm284_vm0, %v3064_v52 }
  0x28   :  { %9562 = vmatmul.mubr.msk.f32.gmra.mrb[16].mxu1 %vm284_vm0, %v3063_v51  ;;  %v8201_v51 = vld [vmem:[%s14653_s0 + $0x271] sm:$0xff] }
  0x29   :  { %9962 = vmatmul.mubr.msk.f32.gmra.mrb[16].mxu0 %vm284_vm0, %v3065_v55  ;;  %9564 = vmatprep.mubr.msk.f32.mxu1 %vm284_vm0, %v3064_v52  ;;  %v3093_v52 = vmax.f32 %v8200_v50, 0.0  ;;  %v3094_v53 = vmax.f32 %v8201_v51, 0.0  ;;  %v14686_v50 = vmax.f32 %v11546_v42, 0.0  ;;  %v11574_v51 = vld [vmem:[%s14653_s0 + $0x52] sm:$0xff] }
  0x2a   :  { %9964 = vmatprep.mubr.msk.f32.mxu0 %vm284_vm0, %v3066_v56 }
  0x2c   :  { %9565 = vmatmul.mubr.msk.f32.gmra.mrb[18].mxu1 %vm284_vm0, %v3065_v55  ;;  %v8203_v55 = vld [vmem:[%s14653_s0 + $0x289] sm:$0xff] }
  0x2d   :  { %9965 = vmatmul.mubr.msk.f32.gmra.mrb[18].mxu0 %vm284_vm0, %v3067_v59  ;;  %9567 = vmatprep.mubr.msk.f32.mxu1 %vm284_vm0, %v3066_v56  ;;  %v3095_v56 = vmax.f32 %v8202_v54, 0.0  ;;  %v3096_v57 = vmax.f32 %v8203_v55, 0.0  ;;  %v14703_v54 = vmax.f32 %v11558_v46, 0.0  ;;  %v14683_v55 = vmax.f32 %v11574_v51, 0.0 }
  0x2e   :  { %9967 = vmatprep.mubr.msk.f32.mxu0 %vm284_vm0, %v3068_v60 }
  0x30   :  { %9568 = vmatmul.mubr.msk.f32.gmra.mrb[20].mxu1 %vm284_vm0, %v3067_v59  ;;  %v8205_v59 = vld [vmem:[%s14653_s0 + $0x2a1] sm:$0xff] }
  0x31   :  { %9968 = vmatmul.mubr.msk.f32.gmra.mrb[20].mxu0 %vm284_vm0, %v3069_v63  ;;  %9570 = vmatprep.mubr.msk.f32.mxu1 %vm284_vm0, %v3068_v60  ;;  %v3097_v60 = vmax.f32 %v8204_v58, 0.0  ;;  %v3098_v61 = vmax.f32 %v8205_v59, 0.0  ;;  %v11611_v59 = vld [vmem:[%s14653_s0 + $0x6a] sm:$0xff] }
  0x32   :  { %9970 = vmatprep.mubr.msk.f32.mxu0 %vm284_vm0, %v3070_v0 }
  0x34   :  { %9571 = vmatmul.mubr.msk.f32.gmra.mrb[22].mxu1 %vm284_vm0, %v3069_v63  ;;  %v8207_v63 = vld [vmem:[%s14653_s0 + $0x2b9] sm:$0xff] }
  0x35   :  { %9971 = vmatmul.mubr.msk.f32.gmra.mrb[22].mxu0 %vm284_vm0, %v3071_v3  ;;  %9573 = vmatprep.mubr.msk.f32.mxu1 %vm284_vm0, %v3070_v0  ;;  %v3099_v0 = vmax.f32 %v8206_v62, 0.0  ;;  %v3100_v1 = vmax.f32 %v8207_v63, 0.0  ;;  %v14675_v63 = vmax.f32 %v11611_v59, 0.0 }
  0x36   :  { %9973 = vmatprep.mubr.msk.f32.mxu0 %vm284_vm0, %v3072_v4 }
  0x38   :  { %9574 = vmatmul.mubr.msk.f32.gmra.mrb[24].mxu1 %vm284_vm0, %v3071_v3  ;;  %v8209_v3 = vld [vmem:[%s14653_s0 + $0x2d1] sm:$0xff] }
  0x39   :  { %9974 = vmatmul.mubr.msk.f32.gmra.mrb[24].mxu0 %vm284_vm0, %v3073_v7  ;;  %9576 = vmatprep.mubr.msk.f32.mxu1 %vm284_vm0, %v3072_v4  ;;  %v3101_v4 = vmax.f32 %v8208_v2, 0.0  ;;  %v3102_v5 = vmax.f32 %v8209_v3, 0.0  ;;  %v11647_v3 = vld [vmem:[%s14653_s0 + $0x82] sm:$0xff] }
  0x3a   :  { %9976 = vmatprep.mubr.msk.f32.mxu0 %vm284_vm0, %v3074_v8 }
  0x3c   :  { %9577 = vmatmul.mubr.msk.f32.gmra.mrb[26].mxu1 %vm284_vm0, %v3073_v7  ;;  %v8211_v7 = vld [vmem:[%s14653_s0 + $0x2e9] sm:$0xff] }
  0x3d   :  { %9977 = vmatmul.mubr.msk.f32.gmra.mrb[26].mxu0 %vm284_vm0, %v3075_v11  ;;  %9579 = vmatprep.mubr.msk.f32.mxu1 %vm284_vm0, %v3074_v8  ;;  %v3103_v8 = vmax.f32 %v8210_v6, 0.0  ;;  %v3104_v9 = vmax.f32 %v8211_v7, 0.0  ;;  %v14667_v7 = vmax.f32 %v11647_v3, 0.0 }
  0x3e   :  { %9979 = vmatprep.mubr.msk.f32.mxu0 %vm284_vm0, %v3076_v12 }
  0x40   :  { %9580 = vmatmul.mubr.msk.f32.gmra.mrb[28].mxu1 %vm284_vm0, %v3075_v11  ;;  %v8213_v11 = vld [vmem:[%s14653_s0 + $0x301] sm:$0xff] }
  0x41   :  { %9980 = vmatmul.mubr.msk.f32.gmra.mrb[28].mxu0 %vm284_vm0, %v3077_v15  ;;  %9582 = vmatprep.mubr.msk.f32.mxu1 %vm284_vm0, %v3076_v12  ;;  %v3105_v12 = vmax.f32 %v8212_v10, 0.0  ;;  %v3106_v13 = vmax.f32 %v8213_v11, 0.0  ;;  %v11683_v11 = vld [vmem:[%s14653_s0 + $0x9a] sm:$0xff] }
  0x42   :  { %9982 = vmatprep.mubr.msk.f32.mxu0 %vm284_vm0, %v3078_v16  ;;  %v3107_v16 = vmax.f32 %v8214_v14, 0.0 }
  0x44   :  { %9583 = vmatmul.mubr.msk.f32.gmra.mrb[30].mxu1 %vm284_vm0, %v3077_v15  ;;  %v8215_v15 = vld [vmem:[%s14653_s0 + $0x319] sm:$0xff] }
  0x45   :  { %9983 = vmatmul.mubr.msk.f32.gmra.mrb[30].mxu0 %vm284_vm0, %v3079_v20  ;;  %9585 = vmatprep.mubr.msk.f32.mxu1 %vm284_vm0, %v249_v21  ;;  %v3108_v17 = vmax.f32 %v8215_v15, 0.0  ;;  %v3109_v20 = vmax.f32 %v8216_v18, 0.0  ;;  %v3110_v21 = vmax.f32 %v8217_v19, 0.0  ;;  %v14662_v15 = vmax.f32 %v11683_v11, 0.0  ;;  %v11719_v19 = vld [vmem:[%s14653_s0 + $0xb2] sm:$0xff] }
  0x46   :  { %9985 = vmatprep.mubr.msk.f32.mxu0 %vm284_vm0, %v3080_v23 }
  0x48   :  { %9586 = vmatmul.mubr.msk.f32.gmra.mrb[32].mxu1 %vm284_vm0, %v250_v26 }
  0x49   :  { %9986 = vmatmul.mubr.msk.f32.gmra.mrb[32].mxu0 %vm284_vm0, %v3081_v27  ;;  %9588 = vmatprep.mubr.msk.f32.mxu1 %vm284_vm0, %v3080_v23  ;;  %v23_v23 = vld [vmem:[%s14653_s0] sm:$0xff] }
  0x4a   :  { %9988 = vmatprep.mubr.msk.f32.mxu0 %vm284_vm0, %v3082_v28  ;;  %v87_v26 = vmax.f32 %v23_v23, 0.0  ;;  %v14659_v23 = vmax.f32 %v11719_v19, 0.0 }
  0x4c   :  { %9589 = vmatmul.mubr.msk.f32.gmra.mrb[34].mxu1 %vm284_vm0, %v3081_v27  ;;  %v24_v27 = vld [vmem:[%s14653_s0 + $0x8] sm:$0xff] }
  0x4d   :  { %9989 = vmatmul.mubr.msk.f32.gmra.mrb[34].mxu0 %vm284_vm0, %v3083_v31  ;;  %9591 = vmatprep.mubr.msk.f32.mxu1 %vm284_vm0, %v3082_v28  ;;  %v11504_v28 = vld [vmem:[%s14653_s0 + $0x22] sm:$0xff] }
  0x4e   :  { %9991 = vmatprep.mubr.msk.f32.mxu0 %vm284_vm0, %v3084_v32 }
  0x50   :  { %9592 = vmatmul.mubr.msk.f32.gmra.mrb[36].mxu1 %vm284_vm0, %v3083_v31  ;;  %v7959_v31 = vld [vmem:[%s14652_s2 + $0x20] sm:$0xff] }
  0x51   :  { %9992 = vmatmul.mubr.msk.f32.gmra.mrb[36].mxu0 %vm284_vm0, %v3085_v35  ;;  %9594 = vmatprep.mubr.msk.f32.mxu1 %vm284_vm0, %v3084_v32  ;;  %v7960_v32 = vld [vmem:[%s14652_s2 + $0x28] sm:$0xff] }
  0x52   :  { %9994 = vmatprep.mubr.msk.f32.mxu0 %vm284_vm0, %v3086_v36  ;;  %v10545_v34 = vpack.c.bf16 %v7960_v32, %v7959_v31  ;;  %v11760_v31 = vld [vmem:[%s14653_s0 + $0xc0] sm:$0xff] }
  0x53   :  { %v11765_v32 = vld [vmem:[%s14653_s0 + $0xda] sm:$0xff] }
  0x54   :  { %9595 = vmatmul.mubr.msk.f32.gmra.mrb[38].mxu1 %vm284_vm0, %v3085_v35  ;;  %v88_v35 = vmax.f32 %v24_v27, 0.0  ;;  %10546 = vmatprep.subr.bf16.mxu1 %v10545_v34 }
  0x55   :  { %9995 = vmatmul.mubr.msk.f32.gmra.mrb[38].mxu0 %vm284_vm0, %v3087_v39  ;;  %9597 = vmatprep.mubr.msk.f32.mxu1 %vm284_vm0, %v3086_v36  ;;  %v14699_v36 = vmax.f32 %v11504_v28, 0.0 }
  0x56   :  { %9997 = vmatprep.mubr.msk.f32.mxu0 %vm284_vm0, %v3088_v40 }
  0x58   :  { %9598 = vmatmul.mubr.msk.f32.gmra.mrb[40].mxu1 %vm284_vm0, %v3087_v39  ;;  %v14694_v39 = vmax.f32 %v11520_v33, 0.0 }
  0x59   :  { %9998 = vmatmul.mubr.msk.f32.gmra.mrb[40].mxu0 %vm284_vm0, %v3089_v43  ;;  %9600 = vmatprep.mubr.msk.f32.mxu1 %vm284_vm0, %v3088_v40  ;;  %v11536_v40 = vld [vmem:[%s14653_s0 + $0x3a] sm:$0xff] }
  0x5a   :  { %10000 = vmatprep.mubr.msk.f32.mxu0 %vm284_vm0, %v3090_v44 }
  0x5c   :  { %9601 = vmatmul.mubr.msk.f32.gmra.mrb[42].mxu1 %vm284_vm0, %v3089_v43  ;;  %v90_v43 = vmax.f32 %v26_v38, 0.0  ;;  %v11782_v38 = vld [vmem:[%s14653_s0 + $0xc8] sm:$0xff] }
  0x5d   :  { %10001 = vmatmul.mubr.msk.f32.gmra.mrb[42].mxu0 %vm284_vm0, %v3091_v48  ;;  %9603 = vmatprep.mubr.msk.f32.mxu1 %vm284_vm0, %v3090_v44  ;;  %v14691_v44 = vmax.f32 %v11536_v40, 0.0 }
  0x5e   :  { %10003 = vmatprep.mubr.msk.f32.mxu0 %vm284_vm0, %v3092_v49 }
  0x60   :  { %9604 = vmatmul.mubr.msk.f32.gmra.mrb[44].mxu1 %vm284_vm0, %v3091_v48  ;;  %v8609_v48 = vld [vmem:[%s14652_s2 + $0x70] sm:$0xff] }
  0x61   :  { %10004 = vmatmul.mubr.msk.f32.gmra.mrb[44].mxu0 %vm284_vm0, %v3093_v52  ;;  %9606 = vmatprep.mubr.msk.f32.mxu1 %vm284_vm0, %v3092_v49  ;;  %v8610_v49 = vld [vmem:[%s14652_s2 + $0x78] sm:$0xff] }
  0x62   :  { %10006 = vmatprep.mubr.msk.f32.mxu0 %vm284_vm0, %v3094_v53 }
  0x64   :  { %9607 = vmatmul.mubr.msk.f32.gmra.mrb[46].mxu1 %vm284_vm0, %v3093_v52  ;;  %v11579_v52 = vld [vmem:[%s14653_s0 + $0x48] sm:$0xff] }
  0x65   :  { %10007 = vmatmul.mubr.msk.f32.gmra.mrb[46].mxu0 %vm284_vm0, %v3095_v56  ;;  %9609 = vmatprep.mubr.msk.f32.mxu1 %vm284_vm0, %v3094_v53  ;;  %v11581_v53 = vpack.c.bf16 %v8610_v49, %v8609_v48  ;;  %v11791_v48 = vld [vmem:[%s14653_s0 + $0xe2] sm:$0xff]  ;;  %v11796_v49 = vld [vmem:[%s14653_s0 + $0xd8] sm:$0xff] }
  0x66   :  { %10009 = vmatprep.mubr.msk.f32.mxu0 %vm284_vm0, %v3096_v57 }
  0x68   :  { %9610 = vmatmul.mubr.msk.f32.gmra.mrb[48].mxu1 %vm284_vm0, %v3095_v56  ;;  %v14701_v56 = vmax.f32 %v11579_v52, 0.0 }
  0x69   :  { %10010 = vmatmul.mubr.msk.f32.gmra.mrb[48].mxu0 %vm284_vm0, %v3097_v60  ;;  %9612 = vmatprep.mubr.msk.f32.mxu1 %vm284_vm0, %v3096_v57  ;;  %v11602_v57 = vld [vmem:[%s14653_s0 + $0x50] sm:$0xff] }
  0x6a   :  { %10012 = vmatprep.mubr.msk.f32.mxu0 %vm284_vm0, %v3098_v61  ;;  %v14695_v62 = vmax.f32 %v11602_v57, 0.0 }
  0x6c   :  { %9613 = vmatmul.mubr.msk.f32.gmra.mrb[50].mxu1 %vm284_vm0, %v3097_v60  ;;  %v11616_v60 = vld [vmem:[%s14653_s0 + $0x60] sm:$0xff] }
  0x6d   :  { %10013 = vmatmul.mubr.msk.f32.gmra.mrb[50].mxu0 %vm284_vm0, %v3099_v0  ;;  %9615 = vmatprep.mubr.msk.f32.mxu1 %vm284_vm0, %v3098_v61  ;;  %v11621_v61 = vld [vmem:[%s14653_s0 + $0x7a] sm:$0xff] }
  0x6e   :  { %10015 = vmatprep.mubr.msk.f32.mxu0 %vm284_vm0, %v3100_v1  ;;  %v14670_v2 = vmax.f32 %v11621_v61, 0.0 }
  0x70   :  { %9616 = vmatmul.mubr.msk.f32.gmra.mrb[52].mxu1 %vm284_vm0, %v3099_v0  ;;  %v14693_v0 = vmax.f32 %v11616_v60, 0.0 }
  0x71   :  { %10016 = vmatmul.mubr.msk.f32.gmra.mrb[52].mxu0 %vm284_vm0, %v3101_v4  ;;  %9618 = vmatprep.mubr.msk.f32.mxu1 %vm284_vm0, %v3100_v1  ;;  %v11638_v1 = vld [vmem:[%s14653_s0 + $0x68] sm:$0xff] }
  0x72   :  { %10018 = vmatprep.mubr.msk.f32.mxu0 %vm284_vm0, %v3102_v5  ;;  %v14687_v6 = vmax.f32 %v11638_v1, 0.0 }
  0x74   :  { %9619 = vmatmul.mubr.msk.f32.gmra.mrb[54].mxu1 %vm284_vm0, %v3101_v4  ;;  %v11652_v4 = vld [vmem:[%s14653_s0 + $0x78] sm:$0xff] }
  0x75   :  { %10019 = vmatmul.mubr.msk.f32.gmra.mrb[54].mxu0 %vm284_vm0, %v3103_v8  ;;  %9621 = vmatprep.mubr.msk.f32.mxu1 %vm284_vm0, %v3102_v5  ;;  %v11657_v5 = vld [vmem:[%s14653_s0 + $0x92] sm:$0xff] }
  0x76   :  { %10021 = vmatprep.mubr.msk.f32.mxu0 %vm284_vm0, %v3104_v9  ;;  %v14663_v10 = vmax.f32 %v11657_v5, 0.0 }
  0x78   :  { %9622 = vmatmul.mubr.msk.f32.gmra.mrb[56].mxu1 %vm284_vm0, %v3103_v8  ;;  %v14685_v8 = vmax.f32 %v11652_v4, 0.0 }
  0x79   :  { %10022 = vmatmul.mubr.msk.f32.gmra.mrb[56].mxu0 %vm284_vm0, %v3105_v12  ;;  %9624 = vmatprep.mubr.msk.f32.mxu1 %vm284_vm0, %v3104_v9  ;;  %v11674_v9 = vld [vmem:[%s14653_s0 + $0x80] sm:$0xff] }
  0x7a   :  { %10024 = vmatprep.mubr.msk.f32.mxu0 %vm284_vm0, %v3106_v13  ;;  %v14679_v14 = vmax.f32 %v11674_v9, 0.0 }
  0x7c   :  { %9625 = vmatmul.mubr.msk.f32.gmra.mrb[58].mxu1 %vm284_vm0, %v3105_v12  ;;  %v11688_v12 = vld [vmem:[%s14653_s0 + $0x90] sm:$0xff] }
  0x7d   :  { %10025 = vmatmul.mubr.msk.f32.gmra.mrb[58].mxu0 %vm284_vm0, %v3107_v16  ;;  %9627 = vmatprep.mubr.msk.f32.mxu1 %vm284_vm0, %v3106_v13  ;;  %v11693_v13 = vld [vmem:[%s14653_s0 + $0xaa] sm:$0xff] }
  0x7e   :  { %10027 = vmatprep.mubr.msk.f32.mxu0 %vm284_vm0, %v3108_v17  ;;  %v14661_v18 = vmax.f32 %v11693_v13, 0.0 }
  0x80   :  { %9628 = vmatmul.mubr.msk.f32.gmra.mrb[60].mxu1 %vm284_vm0, %v3107_v16  ;;  %v14677_v16 = vmax.f32 %v11688_v12, 0.0 }
  0x81   :  { %10028 = vmatmul.mubr.msk.f32.gmra.mrb[60].mxu0 %vm284_vm0, %v3109_v20  ;;  %9630 = vmatprep.mubr.msk.f32.mxu1 %vm284_vm0, %v3108_v17  ;;  %v11710_v17 = vld [vmem:[%s14653_s0 + $0x98] sm:$0xff] }
  0x82   :  { %10030 = vmatprep.mubr.msk.f32.mxu0 %vm284_vm0, %v3110_v21  ;;  %v11729_v21 = vld [vmem:[%s14653_s0 + $0xc2] sm:$0xff]  ;;  %v14671_v22 = vmax.f32 %v11710_v17, 0.0 }
  0x83   :  { %v14660_v27 = vmax.f32 %v11729_v21, 0.0 }
  0x84   :  { %9631 = vmatmul.mubr.msk.f32.gmra.mrb[62].mxu1 %vm284_vm0, %v3109_v20  ;;  %v11724_v20 = vld [vmem:[%s14653_s0 + $0xa8] sm:$0xff] }
  0x85   :  { %10031 = vmatmul.mubr.msk.f32.gmra.mrb[62].mxu0 %vm284_vm0, %v3111_v25  ;;  %9637 = vmatprep.mubr.msk.f32.mxu1 %vm284_vm0, %v87_v26  ;;  %v14669_v25 = vmax.f32 %v11724_v20, 0.0  ;;  %v11746_v26 = vld [vmem:[%s14653_s0 + $0xb0] sm:$0xff] }
  0x86   :  { %10037 = vmatprep.mubr.msk.f32.mxu0 %vm284_vm0, %v14702_v29 }
  0x88   :  { %9638 = vmatmul.mubr.msk.f32.vlgmr.msra.gmra.mrb[0].mxu1 %vm284_vm0, %v88_v35  ;;  %v14665_v35 = vmax.f32 %v11755_v30, 0.0 }
  0x89   :  { %10038 = vmatmul.mubr.msk.f32.vlgmr.msra.gmra.mrb[0].mxu0 %vm284_vm0, %v14699_v36  ;;  %9640 = vmatprep.mubr.msk.f32.mxu1 %vm284_vm0, %v89_v37  ;;  %v14666_v37 = vmax.f32 %v11760_v31, 0.0  ;;  %v11981_v36 = vld [vmem:[%s14653_s0 + $0x16a] sm:$0xff] }
  0x8a   :  { %10564 = vmatpush3.bf16.msra.mxu0 %v11234_v47  ;;  %10040 = vmatprep.mubr.msk.f32.mxu0 %vm284_vm0, %v14694_v39  ;;  %v11586_v47 = vld [vmem:[%s14653_s0 + $0x62] sm:$0xff]  ;;  %14784 = vst [vmem:[#allocation7_spill] sm:$0xff] %v11981_v36 }
  0x8b   :  { %10548 = vmatpush3.bf16.msra.mxu1 %v10545_v34  ;;  %10566 = vmatprep.subr.bf16.mxu0 %v11581_v53  ;;  %v14678_v58 = vmax.f32 %v11586_v47, 0.0  ;;  %v14664_v34 = vmax.f32 %v11746_v26, 0.0 }
  0x8c   :  { %9641 = vmatmul.mubr.msk.f32.gmra.mrb[2].mxu1 %vm284_vm0, %v90_v43  ;;  %v14668_v43 = vmax.f32 %v11765_v32, 0.0 }
  0x8d   :  { %10041 = vmatmul.mubr.msk.f32.gmra.mrb[2].mxu0 %vm284_vm0, %v14691_v44  ;;  %9643 = vmatprep.mubr.msk.f32.mxu1 %vm284_vm0, %v14707_v45  ;;  %v11945_v44 = vld [vmem:[%s14653_s0 + $0x152] sm:$0xff]  ;;  %v8315_v45 = vld [vmem:[%s14653_s0 + $0x182] sm:$0xff] }
  0x8e   :  { %10043 = vmatprep.mubr.msk.f32.mxu0 %vm284_vm0, %v14686_v50  ;;  %14782 = vst [vmem:[#allocation5_spill] sm:$0xff] %v11945_v44 }
  0x90   :  { %9644 = vmatmul.mubr.msk.f32.gmra.mrb[4].mxu1 %vm284_vm0, %v14703_v54  ;;  %v11998_v54 = vld [vmem:[%s14653_s0 + $0x158] sm:$0xff] }
  0x91   :  { %10044 = vmatmul.mubr.msk.f32.gmra.mrb[4].mxu0 %vm284_vm0, %v14683_v55  ;;  %9646 = vmatprep.mubr.msk.f32.mxu1 %vm284_vm0, %v14701_v56  ;;  %v11909_v55 = vld [vmem:[%s14653_s0 + $0x13a] sm:$0xff] }
  0x92   :  { %10046 = vmatprep.mubr.msk.f32.mxu0 %vm284_vm0, %v14678_v58  ;;  %14780 = vst [vmem:[#allocation3_spill] sm:$0xff] %v11909_v55 }
  0x94   :  { %9647 = vmatmul.mubr.msk.f32.gmra.mrb[6].mxu1 %vm284_vm0, %v14695_v62  ;;  %v11962_v62 = vld [vmem:[%s14653_s0 + $0x140] sm:$0xff] }
  0x95   :  { %10047 = vmatmul.mubr.msk.f32.gmra.mrb[6].mxu0 %vm284_vm0, %v14675_v63  ;;  %9649 = vmatprep.mubr.msk.f32.mxu1 %vm284_vm0, %v14693_v0  ;;  %v11873_v63 = vld [vmem:[%s14653_s0 + $0x122] sm:$0xff] }
  0x96   :  { %10049 = vmatprep.mubr.msk.f32.mxu0 %vm284_vm0, %v14670_v2 }
  0x98   :  { %9650 = vmatmul.mubr.msk.f32.gmra.mrb[8].mxu1 %vm284_vm0, %v14687_v6  ;;  %v11926_v6 = vld [vmem:[%s14653_s0 + $0x128] sm:$0xff] }
  0x99   :  { %10050 = vmatmul.mubr.msk.f32.gmra.mrb[8].mxu0 %vm284_vm0, %v14667_v7  ;;  %9652 = vmatprep.mubr.msk.f32.mxu1 %vm284_vm0, %v14685_v8  ;;  %v11837_v7 = vld [vmem:[%s14653_s0 + $0x10a] sm:$0xff] }
  0x9a   :  { %10052 = vmatprep.mubr.msk.f32.mxu0 %vm284_vm0, %v14663_v10  ;;  %v11818_v10 = vld [vmem:[%s14653_s0 + $0xe0] sm:$0xff] }
  0x9c   :  { %9653 = vmatmul.mubr.msk.f32.gmra.mrb[10].mxu1 %vm284_vm0, %v14679_v14  ;;  %v11890_v14 = vld [vmem:[%s14653_s0 + $0x110] sm:$0xff] }
  0x9d   :  { %10053 = vmatmul.mubr.msk.f32.gmra.mrb[10].mxu0 %vm284_vm0, %v14662_v15  ;;  %9655 = vmatprep.mubr.msk.f32.mxu1 %vm284_vm0, %v14677_v16  ;;  %v14674_v15 = vmax.f32 %v11796_v49, 0.0 }
  0x9e   :  { %10055 = vmatprep.mubr.msk.f32.mxu0 %vm284_vm0, %v14661_v18  ;;  %v14673_v18 = vmax.f32 %v11791_v48, 0.0 }
  0xa0   :  { %9656 = vmatmul.mubr.msk.f32.gmra.mrb[12].mxu1 %vm284_vm0, %v14671_v22  ;;  %v11854_v22 = vld [vmem:[%s14653_s0 + $0xf8] sm:$0xff] }
  0xa1   :  { %10056 = vmatmul.mubr.msk.f32.gmra.mrb[12].mxu0 %vm284_vm0, %v14659_v23  ;;  %9658 = vmatprep.mubr.msk.f32.mxu1 %vm284_vm0, %v14669_v25  ;;  %v11801_v23 = vld [vmem:[%s14653_s0 + $0xf2] sm:$0xff] }
  0xa2   :  { %10058 = vmatprep.mubr.msk.f32.mxu0 %vm284_vm0, %v14660_v27  ;;  %v14672_v27 = vmax.f32 %v11782_v38, 0.0 }
  0xa4   :  { %9659 = vmatmul.mubr.msk.f32.gmra.mrb[14].mxu1 %vm284_vm0, %v14664_v34  ;;  %v14676_v34 = vmax.f32 %v11801_v23, 0.0 }
  0xa5   :  { %10059 = vmatmul.mubr.msk.f32.gmra.mrb[14].mxu0 %vm284_vm0, %v14665_v35  ;;  %9661 = vmatprep.mubr.msk.f32.mxu1 %vm284_vm0, %v14666_v37  ;;  %v11827_v35 = vld [vmem:[%s14653_s0 + $0xfa] sm:$0xff]  ;;  %v11832_v37 = vld [vmem:[%s14653_s0 + $0xf0] sm:$0xff] }
  0xa6   :  { %10061 = vmatprep.mubr.msk.f32.mxu0 %vm284_vm0, %v14668_v43  ;;  %v14680_v43 = vmax.f32 %v11818_v10, 0.0  ;;  %v14681_v25 = vmax.f32 %v11827_v35, 0.0  ;;  %v14682_v2 = vmax.f32 %v11832_v37, 0.0 }
  0xa8   :  { %9662 = vmatmul.mubr.msk.f32.gmra.mrb[16].mxu1 %vm284_vm0, %v14672_v27  ;;  %v14684_v27 = vmax.f32 %v11837_v7, 0.0 }
  0xa9   :  { %10062 = vmatmul.mubr.msk.f32.gmra.mrb[16].mxu0 %vm284_vm0, %v14673_v18  ;;  %9664 = vmatprep.mubr.msk.f32.mxu1 %vm284_vm0, %v14674_v15  ;;  %v11863_v18 = vld [vmem:[%s14653_s0 + $0x112] sm:$0xff]  ;;  %v11868_v15 = vld [vmem:[%s14653_s0 + $0x108] sm:$0xff] }
  0xaa   :  { %10064 = vmatprep.mubr.msk.f32.mxu0 %vm284_vm0, %v14676_v34  ;;  %v14688_v34 = vmax.f32 %v11854_v22, 0.0  ;;  %v14689_v16 = vmax.f32 %v11863_v18, 0.0  ;;  %v14690_v58 = vmax.f32 %v11868_v15, 0.0 }
  0xac   :  { %9665 = vmatmul.mubr.msk.f32.gmra.mrb[18].mxu1 %vm284_vm0, %v14680_v43  ;;  %v14692_v43 = vmax.f32 %v11873_v63, 0.0 }
  0xad   :  { %10065 = vmatmul.mubr.msk.f32.gmra.mrb[18].mxu0 %vm284_vm0, %v14681_v25  ;;  %9667 = vmatprep.mubr.msk.f32.mxu1 %vm284_vm0, %v14682_v2  ;;  %v11899_v25 = vld [vmem:[%s14653_s0 + $0x12a] sm:$0xff]  ;;  %v11904_v2 = vld [vmem:[%s14653_s0 + $0x120] sm:$0xff] }
  0xae   :  { %10067 = vmatprep.mubr.msk.f32.mxu0 %vm284_vm0, %v14684_v27  ;;  %14779 = vst [vmem:[#allocation2_spill] sm:$0xff] %v11899_v25  ;;  %v14696_v27 = vmax.f32 %v11890_v14, 0.0  ;;  %v14697_v8 = vmax.f32 %v11899_v25, 0.0  ;;  %v14698_v50 = vmax.f32 %v11904_v2, 0.0  ;;  %v56_v25 = vld [vmem:[%s14653_s0 + $0x1b8] sm:$0xff] }
  0xb0   :  { %9668 = vmatmul.mubr.msk.f32.gmra.mrb[20].mxu1 %vm284_vm0, %v14688_v34  ;;  %v14700_v34 = vmax.f32 %v11909_v55, 0.0 }
  0xb1   :  { %10068 = vmatmul.mubr.msk.f32.gmra.mrb[20].mxu0 %vm284_vm0, %v14689_v16  ;;  %9670 = vmatprep.mubr.msk.f32.mxu1 %vm284_vm0, %v14690_v58  ;;  %v11935_v16 = vld [vmem:[%s14653_s0 + $0x142] sm:$0xff]  ;;  %v11940_v58 = vld [vmem:[%s14653_s0 + $0x138] sm:$0xff] }
  0xb2   :  { %10070 = vmatprep.mubr.msk.f32.mxu0 %vm284_vm0, %v14692_v43  ;;  %14781 = vst [vmem:[#allocation4_spill] sm:$0xff] %v11935_v16  ;;  %v14704_v43 = vmax.f32 %v11926_v6, 0.0  ;;  %v14705_v0 = vmax.f32 %v11935_v16, 0.0  ;;  %v14706_v39 = vmax.f32 %v11940_v58, 0.0  ;;  %v12032_v16 = vld [vmem:[%s14653_s0 + $0x170] sm:$0xff] }
  0xb3   :  { %14787 = vst [vmem:[#allocation10_spill] sm:$0xff] %v12032_v16 }
  0xb4   :  { %9671 = vmatmul.mubr.msk.f32.gmra.mrb[22].mxu1 %vm284_vm0, %v14696_v27  ;;  %v14708_v27 = vmax.f32 %v11945_v44, 0.0  ;;  %v12046_v44 = vld [vmem:[%s14653_s0 + $0x1ca] sm:$0xff] }
  0xb5   :  { %10071 = vmatmul.mubr.msk.f32.gmra.mrb[22].mxu0 %vm284_vm0, %v14697_v8  ;;  %9673 = vmatprep.mubr.msk.f32.mxu1 %vm284_vm0, %v14698_v50  ;;  %v11971_v8 = vld [vmem:[%s14653_s0 + $0x15a] sm:$0xff]  ;;  %v11976_v50 = vld [vmem:[%s14653_s0 + $0x150] sm:$0xff]  ;;  %14789 = vst [vmem:[#allocation11_spill] sm:$0xff] %v12046_v44 }
  0xb6   :  { %10073 = vmatprep.mubr.msk.f32.mxu0 %vm284_vm0, %v14700_v34  ;;  %14783 = vst [vmem:[#allocation6_spill] sm:$0xff] %v11971_v8  ;;  %v14711_v34 = vmax.f32 %v11962_v62, 0.0  ;;  %v14712_v56 = vmax.f32 %v11971_v8, 0.0  ;;  %v14713_v29 = vmax.f32 %v11976_v50, 0.0 }
  0xb8   :  { %9674 = vmatmul.mubr.msk.f32.gmra.mrb[24].mxu1 %vm284_vm0, %v14704_v43  ;;  %v14790_v43 = vmax.f32 %v11998_v54, 0.0 }
  0xb9   :  { %10074 = vmatmul.mubr.msk.f32.gmra.mrb[24].mxu0 %vm284_vm0, %v14705_v0  ;;  %9676 = vmatprep.mubr.msk.f32.mxu1 %vm284_vm0, %v14706_v39  ;;  %v12007_v0 = vld [vmem:[%s14653_s0 + $0x172] sm:$0xff]  ;;  %v12012_v39 = vld [vmem:[%s14653_s0 + $0x168] sm:$0xff] }
  0xba   :  { %10076 = vmatprep.mubr.msk.f32.mxu0 %vm284_vm0, %v14708_v27  ;;  %14785 = vst [vmem:[#allocation8_spill] sm:$0xff] %v12007_v0  ;;  %14786 = vst [vmem:[#allocation9_spill] sm:$0xff] %v12012_v39  ;;  %v3850_v27 = vmax.f32 %v8315_v45, 0.0  ;;  %v14791_v45 = vmax.f32 %v12007_v0, 0.0  ;;  %v58_v0 = vld [vmem:[%s14653_s0 + $0x1d0] sm:$0xff] }
  0xbc   :  { %9677 = vmatmul.mubr.msk.f32.gmra.mrb[26].mxu1 %vm284_vm0, %v14711_v34  ;;  %v14788_v34 = vmax.f32 %v11981_v36, 0.0  ;;  %v14792_v36 = vmax.f32 %v12012_v39, 0.0  ;;  %v14796_v39 = vmax.f32 %v12046_v44, 0.0 }
  0xbd   :  { %10077 = vmatmul.mubr.msk.f32.gmra.mrb[26].mxu0 %vm284_vm0, %v14712_v56  ;;  %9679 = vmatprep.mubr.msk.f32.mxu1 %vm284_vm0, %v14713_v29  ;;  %v8316_v56 = vld [vmem:[%s14653_s0 + $0x18a] sm:$0xff] }
  0xbe   :  { %10079 = vmatprep.mubr.msk.f32.mxu0 %vm284_vm0, %v14788_v34  ;;  %v55_v29 = vld [vmem:[%s14653_s0 + $0x1b0] sm:$0xff]  ;;  %v3851_v8 = vmax.f32 %v8316_v56, 0.0  ;;  %v120_v56 = vmax.f32 %v56_v25, 0.0 }
  0xbf   :  { %v119_v55 = vmax.f32 %v55_v29, 0.0  ;;  %v12066_v34 = vld [vmem:[%s14653_s0 + $0x1d2] sm:$0xff]  ;;  %v12074_v29 = vld [vmem:[%s14653_s0 + $0x1e2] sm:$0xff]  ;;  %v12092_v25 = vld [vmem:[%s14653_s0 + $0x1ea] sm:$0xff] }
  0xc0   :  { %9680 = vmatmul.mubr.msk.f32.gmra.mrb[28].mxu1 %vm284_vm0, %v14790_v43  ;;  %14793 = vst [vmem:[#allocation12_spill] sm:$0xff] %v12066_v34  ;;  %14794 = vst [vmem:[#allocation13_spill] sm:$0xff] %v12074_v29  ;;  %v14801_v44 = vmax.f32 %v12074_v29, 0.0  ;;  %v12167_v29 = vld [vmem:[%s14653_s0 + $0x22a] sm:$0xff] }
  0xc1   :  { %10080 = vmatmul.mubr.msk.f32.gmra.mrb[28].mxu0 %vm284_vm0, %v14791_v45  ;;  %9682 = vmatprep.mubr.msk.f32.mxu1 %vm284_vm0, %v14792_v36  ;;  %v57_v45 = vld [vmem:[%s14653_s0 + $0x1c8] sm:$0xff]  ;;  %v14795_v36 = vmax.f32 %v12032_v16, 0.0  ;;  %14797 = vst [vmem:[#allocation14_spill] sm:$0xff] %v12092_v25  ;;  %14809 = vst [vmem:[#allocation24_spill] sm:$0xff] %v12167_v29 }
  0xc2   :  { %10082 = vmatprep.mubr.msk.f32.mxu0 %vm284_vm0, %v3850_v27  ;;  %v14722_v27 = vmax.f32 %v12066_v34, 0.0  ;;  %v121_v43 = vmax.f32 %v57_v45, 0.0  ;;  %v14725_v45 = vmax.f32 %v12092_v25, 0.0  ;;  %v12114_v16 = vld [vmem:[%s14653_s0 + $0x1e8] sm:$0xff]  ;;  %v12148_v34 = vld [vmem:[%s14653_s0 + $0x200] sm:$0xff] }
  0xc3   :  { %14800 = vst [vmem:[#allocation17_spill] sm:$0xff] %v12114_v16  ;;  %14805 = vst [vmem:[#allocation21_spill] sm:$0xff] %v12148_v34  ;;  %v14818_v25 = vmax.f32 %v12148_v34, 0.0  ;;  %v12220_v34 = vld [vmem:[%s14653_s0 + $0x230] sm:$0xff] }
  0xc4   :  { %9683 = vmatmul.mubr.msk.f32.gmra.mrb[30].mxu1 %vm284_vm0, %v14795_v36  ;;  %14821 = vst [vmem:[#allocation29_spill] sm:$0xff] %v12220_v34 }
  0xc5   :  { %10083 = vmatmul.mubr.msk.f32.gmra.mrb[30].mxu0 %vm284_vm0, %v3851_v8  ;;  %9685 = vmatprep.mubr.msk.f32.mxu1 %vm284_vm0, %v119_v55  ;;  %v12097_v55 = vld [vmem:[%s14653_s0 + $0x1e0] sm:$0xff] }
  0xc6   :  { %10085 = vmatprep.mubr.msk.f32.mxu0 %vm284_vm0, %v14796_v39  ;;  %14798 = vst [vmem:[#allocation15_spill] sm:$0xff] %v12097_v55  ;;  %v12102_v8 = vld [vmem:[%s14653_s0 + $0x1fa] sm:$0xff]  ;;  %v122_v39 = vmax.f32 %v58_v0, 0.0  ;;  %v14726_v36 = vmax.f32 %v12097_v55, 0.0  ;;  %v14810_v0 = vmax.f32 %v12114_v16, 0.0  ;;  %v12203_v55 = vld [vmem:[%s14653_s0 + $0x242] sm:$0xff] }
  0xc7   :  { %14799 = vst [vmem:[#allocation16_spill] sm:$0xff] %v12102_v8  ;;  %v12184_v16 = vld [vmem:[%s14653_s0 + $0x218] sm:$0xff]  ;;  %14817 = vst [vmem:[#allocation28_spill] sm:$0xff] %v12203_v55 }
  0xc8   :  { %9686 = vmatmul.mubr.msk.f32.gmra.mrb[32].mxu1 %vm284_vm0, %v120_v56  ;;  %v12123_v56 = vld [vmem:[%s14653_s0 + $0x202] sm:$0xff]  ;;  %14813 = vst [vmem:[#allocation25_spill] sm:$0xff] %v12184_v16 }
  0xc9   :  { %10086 = vmatmul.mubr.msk.f32.gmra.mrb[32].mxu0 %vm284_vm0, %v14722_v27  ;;  %9688 = vmatprep.mubr.msk.f32.mxu1 %vm284_vm0, %v121_v43  ;;  %14802 = vst [vmem:[#allocation18_spill] sm:$0xff] %v12123_v56  ;;  %v12128_v43 = vld [vmem:[%s14653_s0 + $0x1f8] sm:$0xff] }
  0xca   :  { %10088 = vmatprep.mubr.msk.f32.mxu0 %vm284_vm0, %v14801_v44  ;;  %14803 = vst [vmem:[#allocation19_spill] sm:$0xff] %v12128_v43  ;;  %v12133_v27 = vld [vmem:[%s14653_s0 + $0x212] sm:$0xff]  ;;  %v14811_v44 = vmax.f32 %v12123_v56, 0.0  ;;  %v14826_v56 = vmax.f32 %v12184_v16, 0.0  ;;  %v12256_v16 = vld [vmem:[%s14653_s0 + $0x248] sm:$0xff] }
  0xcb   :  { %14804 = vst [vmem:[#allocation20_spill] sm:$0xff] %v12133_v27  ;;  %14829 = vst [vmem:[#allocation33_spill] sm:$0xff] %v12256_v16 }
  0xcc   :  { %9689 = vmatmul.mubr.msk.f32.gmra.mrb[34].mxu1 %vm284_vm0, %v122_v39  ;;  %v14806_v39 = vmax.f32 %v12102_v8, 0.0  ;;  %v14812_v8 = vmax.f32 %v12128_v43, 0.0  ;;  %v12239_v43 = vld [vmem:[%s14653_s0 + $0x25a] sm:$0xff] }
  0xcd   :  { %10089 = vmatmul.mubr.msk.f32.gmra.mrb[34].mxu0 %vm284_vm0, %v14725_v45  ;;  %9691 = vmatprep.mubr.msk.f32.mxu1 %vm284_vm0, %v14726_v36  ;;  %v12157_v45 = vld [vmem:[%s14653_s0 + $0x21a] sm:$0xff]  ;;  %v12162_v36 = vld [vmem:[%s14653_s0 + $0x210] sm:$0xff]  ;;  %14825 = vst [vmem:[#allocation32_spill] sm:$0xff] %v12239_v43 }
  0xce   :  { %10091 = vmatprep.mubr.msk.f32.mxu0 %vm284_vm0, %v14806_v39  ;;  %14807 = vst [vmem:[#allocation22_spill] sm:$0xff] %v12157_v45  ;;  %14808 = vst [vmem:[#allocation23_spill] sm:$0xff] %v12162_v36  ;;  %v14819_v39 = vmax.f32 %v12157_v45, 0.0  ;;  %v14834_v45 = vmax.f32 %v12220_v34, 0.0  ;;  %v12292_v34 = vld [vmem:[%s14653_s0 + $0x260] sm:$0xff] }
  0xcf   :  { %14837 = vst [vmem:[#allocation37_spill] sm:$0xff] %v12292_v34 }
  0xd0   :  { %9692 = vmatmul.mubr.msk.f32.gmra.mrb[36].mxu1 %vm284_vm0, %v14810_v0  ;;  %v14814_v0 = vmax.f32 %v12133_v27, 0.0  ;;  %v14820_v27 = vmax.f32 %v12162_v36, 0.0  ;;  %v12275_v36 = vld [vmem:[%s14653_s0 + $0x272] sm:$0xff] }
  0xd1   :  { %10092 = vmatmul.mubr.msk.f32.gmra.mrb[36].mxu0 %vm284_vm0, %v14811_v44  ;;  %9694 = vmatprep.mubr.msk.f32.mxu1 %vm284_vm0, %v14812_v8  ;;  %v12193_v44 = vld [vmem:[%s14653_s0 + $0x232] sm:$0xff]  ;;  %v12198_v8 = vld [vmem:[%s14653_s0 + $0x228] sm:$0xff]  ;;  %14833 = vst [vmem:[#allocation36_spill] sm:$0xff] %v12275_v36 }
  0xd2   :  { %10094 = vmatprep.mubr.msk.f32.mxu0 %vm284_vm0, %v14814_v0  ;;  %14815 = vst [vmem:[#allocation26_spill] sm:$0xff] %v12193_v44  ;;  %14816 = vst [vmem:[#allocation27_spill] sm:$0xff] %v12198_v8  ;;  %v14827_v0 = vmax.f32 %v12193_v44, 0.0  ;;  %v14842_v44 = vmax.f32 %v12256_v16, 0.0  ;;  %v12328_v16 = vld [vmem:[%s14653_s0 + $0x278] sm:$0xff] }
  0xd3   :  { %14845 = vst [vmem:[#allocation41_spill] sm:$0xff] %v12328_v16 }
  0xd4   :  { %9695 = vmatmul.mubr.msk.f32.gmra.mrb[38].mxu1 %vm284_vm0, %v14818_v25  ;;  %v14822_v25 = vmax.f32 %v12167_v29, 0.0  ;;  %v14828_v29 = vmax.f32 %v12198_v8, 0.0  ;;  %v12311_v8 = vld [vmem:[%s14653_s0 + $0x28a] sm:$0xff] }
  0xd5   :  { %10095 = vmatmul.mubr.msk.f32.gmra.mrb[38].mxu0 %vm284_vm0, %v14819_v39  ;;  %9697 = vmatprep.mubr.msk.f32.mxu1 %vm284_vm0, %v14820_v27  ;;  %v12229_v39 = vld [vmem:[%s14653_s0 + $0x24a] sm:$0xff]  ;;  %v12234_v27 = vld [vmem:[%s14653_s0 + $0x240] sm:$0xff]  ;;  %14841 = vst [vmem:[#allocation40_spill] sm:$0xff] %v12311_v8 }
  0xd6   :  { %10097 = vmatprep.mubr.msk.f32.mxu0 %vm284_vm0, %v14822_v25  ;;  %14823 = vst [vmem:[#allocation30_spill] sm:$0xff] %v12229_v39  ;;  %14824 = vst [vmem:[#allocation31_spill] sm:$0xff] %v12234_v27  ;;  %v14835_v25 = vmax.f32 %v12229_v39, 0.0  ;;  %v14850_v39 = vmax.f32 %v12292_v34, 0.0  ;;  %v12364_v34 = vld [vmem:[%s14653_s0 + $0x290] sm:$0xff] }
  0xd7   :  { %14853 = vst [vmem:[#allocation45_spill] sm:$0xff] %v12364_v34 }
  0xd8   :  { %9698 = vmatmul.mubr.msk.f32.gmra.mrb[40].mxu1 %vm284_vm0, %v14826_v56  ;;  %v14830_v56 = vmax.f32 %v12203_v55, 0.0  ;;  %v14836_v55 = vmax.f32 %v12234_v27, 0.0  ;;  %v12347_v27 = vld [vmem:[%s14653_s0 + $0x2a2] sm:$0xff] }
  0xd9   :  { %10098 = vmatmul.mubr.msk.f32.gmra.mrb[40].mxu0 %vm284_vm0, %v14827_v0  ;;  %9700 = vmatprep.mubr.msk.f32.mxu1 %vm284_vm0, %v14828_v29  ;;  %v12265_v0 = vld [vmem:[%s14653_s0 + $0x262] sm:$0xff]  ;;  %v12270_v29 = vld [vmem:[%s14653_s0 + $0x258] sm:$0xff]  ;;  %14849 = vst [vmem:[#allocation44_spill] sm:$0xff] %v12347_v27 }
  0xda   :  { %10100 = vmatprep.mubr.msk.f32.mxu0 %vm284_vm0, %v14830_v56  ;;  %14831 = vst [vmem:[#allocation34_spill] sm:$0xff] %v12265_v0  ;;  %14832 = vst [vmem:[#allocation35_spill] sm:$0xff] %v12270_v29  ;;  %v14843_v56 = vmax.f32 %v12265_v0, 0.0  ;;  %v14858_v0 = vmax.f32 %v12328_v16, 0.0  ;;  %v12400_v16 = vld [vmem:[%s14653_s0 + $0x2a8] sm:$0xff] }
  0xdb   :  { %14861 = vst [vmem:[#allocation49_spill] sm:$0xff] %v12400_v16 }
  0xdc   :  { %9701 = vmatmul.mubr.msk.f32.gmra.mrb[42].mxu1 %vm284_vm0, %v14834_v45  ;;  %v14838_v45 = vmax.f32 %v12239_v43, 0.0  ;;  %v14844_v43 = vmax.f32 %v12270_v29, 0.0  ;;  %v12383_v29 = vld [vmem:[%s14653_s0 + $0x2ba] sm:$0xff] }
  0xdd   :  { %10101 = vmatmul.mubr.msk.f32.gmra.mrb[42].mxu0 %vm284_vm0, %v14835_v25  ;;  %9703 = vmatprep.mubr.msk.f32.mxu1 %vm284_vm0, %v14836_v55  ;;  %v12301_v25 = vld [vmem:[%s14653_s0 + $0x27a] sm:$0xff]  ;;  %v12306_v55 = vld [vmem:[%s14653_s0 + $0x270] sm:$0xff]  ;;  %14857 = vst [vmem:[#allocation48_spill] sm:$0xff] %v12383_v29 }
  0xde   :  { %10103 = vmatprep.mubr.msk.f32.mxu0 %vm284_vm0, %v14838_v45  ;;  %14839 = vst [vmem:[#allocation38_spill] sm:$0xff] %v12301_v25  ;;  %14840 = vst [vmem:[#allocation39_spill] sm:$0xff] %v12306_v55  ;;  %v14851_v45 = vmax.f32 %v12301_v25, 0.0  ;;  %v14866_v25 = vmax.f32 %v12364_v34, 0.0  ;;  %v12436_v34 = vld [vmem:[%s14653_s0 + $0x2c0] sm:$0xff] }
  0xdf   :  { %14869 = vst [vmem:[#allocation53_spill] sm:$0xff] %v12436_v34 }
  0xe0   :  { %9704 = vmatmul.mubr.msk.f32.gmra.mrb[44].mxu1 %vm284_vm0, %v14842_v44  ;;  %v14846_v44 = vmax.f32 %v12275_v36, 0.0  ;;  %v14852_v36 = vmax.f32 %v12306_v55, 0.0  ;;  %v12419_v55 = vld [vmem:[%s14653_s0 + $0x2d2] sm:$0xff] }
  0xe1   :  { %10104 = vmatmul.mubr.msk.f32.gmra.mrb[44].mxu0 %vm284_vm0, %v14843_v56  ;;  %9706 = vmatprep.mubr.msk.f32.mxu1 %vm284_vm0, %v14844_v43  ;;  %v12337_v56 = vld [vmem:[%s14653_s0 + $0x292] sm:$0xff]  ;;  %v12342_v43 = vld [vmem:[%s14653_s0 + $0x288] sm:$0xff]  ;;  %14865 = vst [vmem:[#allocation52_spill] sm:$0xff] %v12419_v55 }
  0xe2   :  { %10106 = vmatprep.mubr.msk.f32.mxu0 %vm284_vm0, %v14846_v44  ;;  %14847 = vst [vmem:[#allocation42_spill] sm:$0xff] %v12337_v56  ;;  %14848 = vst [vmem:[#allocation43_spill] sm:$0xff] %v12342_v43  ;;  %v14859_v44 = vmax.f32 %v12337_v56, 0.0  ;;  %v14874_v56 = vmax.f32 %v12400_v16, 0.0  ;;  %v12472_v16 = vld [vmem:[%s14653_s0 + $0x2d8] sm:$0xff] }
  0xe3   :  { %14877 = vst [vmem:[#allocation57_spill] sm:$0xff] %v12472_v16 }
  0xe4   :  { %9707 = vmatmul.mubr.msk.f32.gmra.mrb[46].mxu1 %vm284_vm0, %v14850_v39  ;;  %v14854_v39 = vmax.f32 %v12311_v8, 0.0  ;;  %v14860_v8 = vmax.f32 %v12342_v43, 0.0  ;;  %v12455_v43 = vld [vmem:[%s14653_s0 + $0x2ea] sm:$0xff] }
  0xe5   :  { %10107 = vmatmul.mubr.msk.f32.gmra.mrb[46].mxu0 %vm284_vm0, %v14851_v45  ;;  %9709 = vmatprep.mubr.msk.f32.mxu1 %vm284_vm0, %v14852_v36  ;;  %v12373_v45 = vld [vmem:[%s14653_s0 + $0x2aa] sm:$0xff]  ;;  %v12378_v36 = vld [vmem:[%s14653_s0 + $0x2a0] sm:$0xff]  ;;  %14873 = vst [vmem:[#allocation56_spill] sm:$0xff] %v12455_v43 }
  0xe6   :  { %10109 = vmatprep.mubr.msk.f32.mxu0 %vm284_vm0, %v14854_v39  ;;  %14855 = vst [vmem:[#allocation46_spill] sm:$0xff] %v12373_v45  ;;  %14856 = vst [vmem:[#allocation47_spill] sm:$0xff] %v12378_v36  ;;  %v14867_v39 = vmax.f32 %v12373_v45, 0.0  ;;  %v14882_v45 = vmax.f32 %v12436_v34, 0.0  ;;  %v12508_v34 = vld [vmem:[%s14653_s0 + $0x2f0] sm:$0xff] }
  0xe7   :  { %14885 = vst [vmem:[#allocation61_spill] sm:$0xff] %v12508_v34 }
  0xe8   :  { %9710 = vmatmul.mubr.msk.f32.gmra.mrb[48].mxu1 %vm284_vm0, %v14858_v0  ;;  %v14862_v0 = vmax.f32 %v12347_v27, 0.0  ;;  %v14868_v27 = vmax.f32 %v12378_v36, 0.0  ;;  %v12491_v36 = vld [vmem:[%s14653_s0 + $0x302] sm:$0xff] }
  0xe9   :  { %10110 = vmatmul.mubr.msk.f32.gmra.mrb[48].mxu0 %vm284_vm0, %v14859_v44  ;;  %9712 = vmatprep.mubr.msk.f32.mxu1 %vm284_vm0, %v14860_v8  ;;  %v12409_v44 = vld [vmem:[%s14653_s0 + $0x2c2] sm:$0xff]  ;;  %v12414_v8 = vld [vmem:[%s14653_s0 + $0x2b8] sm:$0xff]  ;;  %14881 = vst [vmem:[#allocation60_spill] sm:$0xff] %v12491_v36 }
  0xea   :  { %10112 = vmatprep.mubr.msk.f32.mxu0 %vm284_vm0, %v14862_v0  ;;  %14863 = vst [vmem:[#allocation50_spill] sm:$0xff] %v12409_v44  ;;  %14864 = vst [vmem:[#allocation51_spill] sm:$0xff] %v12414_v8  ;;  %v14875_v0 = vmax.f32 %v12409_v44, 0.0  ;;  %v14890_v44 = vmax.f32 %v12472_v16, 0.0  ;;  %v12544_v16 = vld [vmem:[%s14653_s0 + $0x308] sm:$0xff] }
  0xec   :  { %9713 = vmatmul.mubr.msk.f32.gmra.mrb[50].mxu1 %vm284_vm0, %v14866_v25  ;;  %v14870_v25 = vmax.f32 %v12383_v29, 0.0  ;;  %v14876_v29 = vmax.f32 %v12414_v8, 0.0  ;;  %v12527_v8 = vld [vmem:[%s14653_s0 + $0x31a] sm:$0xff] }
  0xed   :  { %10113 = vmatmul.mubr.msk.f32.gmra.mrb[50].mxu0 %vm284_vm0, %v14867_v39  ;;  %9715 = vmatprep.mubr.msk.f32.mxu1 %vm284_vm0, %v14868_v27  ;;  %v12445_v39 = vld [vmem:[%s14653_s0 + $0x2da] sm:$0xff]  ;;  %v12450_v27 = vld [vmem:[%s14653_s0 + $0x2d0] sm:$0xff]  ;;  %14889 = vst [vmem:[#allocation64_spill] sm:$0xff] %v12527_v8 }
  0xee   :  { %10115 = vmatprep.mubr.msk.f32.mxu0 %vm284_vm0, %v14870_v25  ;;  %14871 = vst [vmem:[#allocation54_spill] sm:$0xff] %v12445_v39  ;;  %14872 = vst [vmem:[#allocation55_spill] sm:$0xff] %v12450_v27  ;;  %v14883_v25 = vmax.f32 %v12445_v39, 0.0  ;;  %v14895_v39 = vmax.f32 %v12508_v34, 0.0  ;;  %v12578_v34 = vld [vmem:[%s14653_s0 + $0x320] sm:$0xff] }
  0xf0   :  { %9716 = vmatmul.mubr.msk.f32.gmra.mrb[52].mxu1 %vm284_vm0, %v14874_v56  ;;  %v14878_v56 = vmax.f32 %v12419_v55, 0.0  ;;  %v14884_v55 = vmax.f32 %v12450_v27, 0.0  ;;  %v8347_v27 = vld [vmem:[%s14653_s0 + $0x332] sm:$0xff] }
  0xf1   :  { %10116 = vmatmul.mubr.msk.f32.gmra.mrb[52].mxu0 %vm284_vm0, %v14875_v0  ;;  %9718 = vmatprep.mubr.msk.f32.mxu1 %vm284_vm0, %v14876_v29  ;;  %v12481_v0 = vld [vmem:[%s14653_s0 + $0x2f2] sm:$0xff]  ;;  %v12486_v29 = vld [vmem:[%s14653_s0 + $0x2e8] sm:$0xff] }
  0xf2   :  { %10118 = vmatprep.mubr.msk.f32.mxu0 %vm284_vm0, %v14878_v56  ;;  %14879 = vst [vmem:[#allocation58_spill] sm:$0xff] %v12481_v0  ;;  %14880 = vst [vmem:[#allocation59_spill] sm:$0xff] %v12486_v29  ;;  %v14891_v56 = vmax.f32 %v12481_v0, 0.0 }
  0xf4   :  { %9719 = vmatmul.mubr.msk.f32.gmra.mrb[54].mxu1 %vm284_vm0, %v14882_v45  ;;  %v14886_v45 = vmax.f32 %v12455_v43, 0.0  ;;  %v14892_v43 = vmax.f32 %v12486_v29, 0.0  ;;  %v14899_v29 = vmax.f32 %v12544_v16, 0.0 }
  0xf5   :  { %10119 = vmatmul.mubr.msk.f32.gmra.mrb[54].mxu0 %vm284_vm0, %v14883_v25  ;;  %9721 = vmatprep.mubr.msk.f32.mxu1 %vm284_vm0, %v14884_v55  ;;  %v12517_v25 = vld [vmem:[%s14653_s0 + $0x30a] sm:$0xff]  ;;  %v12522_v55 = vld [vmem:[%s14653_s0 + $0x300] sm:$0xff] }
  0xf6   :  { %10121 = vmatprep.mubr.msk.f32.mxu0 %vm284_vm0, %v14886_v45  ;;  %14887 = vst [vmem:[#allocation62_spill] sm:$0xff] %v12517_v25  ;;  %14888 = vst [vmem:[#allocation63_spill] sm:$0xff] %v12522_v55  ;;  %v14896_v45 = vmax.f32 %v12517_v25, 0.0 }
  0xf8   :  { %9722 = vmatmul.mubr.msk.f32.gmra.mrb[56].mxu1 %vm284_vm0, %v14890_v44  ;;  %v14893_v44 = vmax.f32 %v12491_v36, 0.0  ;;  %v14897_v36 = vmax.f32 %v12522_v55, 0.0  ;;  %v1440_v55 = vld [vmem:[%s14653_s0 + $0xa] sm:$0xff] }
  0xf9   :  { %10122 = vmatmul.mubr.msk.f32.gmra.mrb[56].mxu0 %vm284_vm0, %v14891_v56  ;;  %9724 = vmatprep.mubr.msk.f32.mxu1 %vm284_vm0, %v14892_v43  ;;  %v12553_v56 = vld [vmem:[%s14653_s0 + $0x322] sm:$0xff]  ;;  %v12558_v43 = vld [vmem:[%s14653_s0 + $0x318] sm:$0xff] }
  0xfa   :  { %10124 = vmatprep.mubr.msk.f32.mxu0 %vm284_vm0, %v14893_v44  ;;  %14894 = vst [vmem:[#allocation65_spill] sm:$0xff] %v12553_v56  ;;  %v3882_v44 = vmax.f32 %v8347_v27, 0.0  ;;  %v14900_v25 = vmax.f32 %v12553_v56, 0.0  ;;  %v14901_v27 = vmax.f32 %v12558_v43, 0.0  ;;  %v14902_v56 = vmax.f32 %v12578_v34, 0.0 }
  0xfc   :  { %9725 = vmatmul.mubr.msk.f32.gmra.mrb[58].mxu1 %vm284_vm0, %v14895_v39  ;;  %v14898_v39 = vmax.f32 %v12527_v8, 0.0 }
  0xfd   :  { %10125 = vmatmul.mubr.msk.f32.gmra.mrb[58].mxu0 %vm284_vm0, %v14896_v45  ;;  %9727 = vmatprep.mubr.msk.f32.mxu1 %vm284_vm0, %v14897_v36  ;;  %v8348_v45 = vld [vmem:[%s14653_s0 + $0x33a] sm:$0xff]  ;;  %v1439_v36 = vld [vmem:[%s14653_s0 + $0x2] sm:$0xff] }
  0xfe   :  { %10127 = vmatprep.mubr.msk.f32.mxu0 %vm284_vm0, %v14898_v39  ;;  %v3883_v39 = vmax.f32 %v8348_v45, 0.0  ;;  %v1503_v8 = vmax.f32 %v1439_v36, 0.0  ;;  %v1504_v45 = vmax.f32 %v1440_v55, 0.0  ;;  %v14904_v36 = vmax.f32 %v11558_v46, 0.0  ;;  %v8739_v55 = vld [vmem:[%s14652_s2 + $0x80] sm:$0xff] }
 0x100   :  { %9728 = vmatmul.mubr.msk.f32.gmra.mrb[60].mxu1 %vm284_vm0, %v14899_v29  ;;  %v8089_v29 = vld [vmem:[%s14652_s2 + $0x30] sm:$0xff] }
 0x101   :  { %10128 = vmatmul.mubr.msk.f32.gmra.mrb[60].mxu0 %vm284_vm0, %v14900_v25  ;;  %9730 = vmatprep.mubr.msk.f32.mxu1 %vm284_vm0, %v14901_v27  ;;  %v8090_v25 = vld [vmem:[%s14652_s2 + $0x38] sm:$0xff]  ;;  %v14905_v27 = vmax.f32 %v11493_v24, 0.0  ;;  %v14907_v24 = vmax.f32 %v11504_v28, 0.0  ;;  %v14912_v28 = vmax.f32 %v11638_v1, 0.0  ;;  %v14917_v1 = vmax.f32 %v11586_v47, 0.0 }
 0x102   :  { %10130 = vmatprep.mubr.msk.f32.mxu0 %vm284_vm0, %v3882_v44  ;;  %v10549_v0 = vpack.c.bf16 %v8090_v25, %v8089_v29  ;;  %v14903_v44 = vmax.f32 %v11541_v41, 0.0  ;;  %v8740_v41 = vld [vmem:[%s14652_s2 + $0x88] sm:$0xff]  ;;  %v14922_v47 = vmax.f32 %v11724_v20, 0.0  ;;  %v14927_v20 = vmax.f32 %v11683_v11, 0.0 }
 0x103   :  { %v12634_v46 = vpack.c.bf16 %v8740_v41, %v8739_v55  ;;  %v14932_v11 = vmax.f32 %v11818_v10, 0.0  ;;  %v14937_v10 = vmax.f32 %v11765_v32, 0.0  ;;  %v14942_v32 = vmax.f32 %v11904_v2, 0.0  ;;  %v14960_v55 = vld [vmem:[#allocation10_spill] sm:$0xff] }
 0x104   :  { %9731 = vmatmul.mubr.msk.f32.gmra.mrb[62].mxu1 %vm284_vm0, %v14902_v56  ;;  %10550 = vmatprep.subr.bf16.mxu1 %v10549_v0  ;;  %v14908_v56 = vmax.f32 %v11602_v57, 0.0  ;;  %v14913_v57 = vmax.f32 %v11546_v42, 0.0  ;;  %v14918_v42 = vmax.f32 %v11688_v12, 0.0  ;;  %v14923_v12 = vmax.f32 %v11647_v3, 0.0 }
 0x105   :  { %10131 = vmatmul.mubr.msk.f32.gmra.mrb[62].mxu0 %vm284_vm0, %v3883_v39  ;;  %9737 = vmatprep.mubr.msk.f32.mxu1 %vm284_vm0, %v1503_v8  ;;  %v14906_v8 = vmax.f32 %v11579_v52, 0.0  ;;  %v14909_v39 = vmax.f32 %v11520_v33, 0.0  ;;  %v14910_v52 = vmax.f32 %v11616_v60, 0.0  ;;  %v14914_v33 = vmax.f32 %v11652_v4, 0.0 }
 0x106   :  { %10137 = vmatprep.mubr.msk.f32.mxu0 %vm284_vm0, %v14903_v44  ;;  %v14915_v60 = vmax.f32 %v11574_v51, 0.0  ;;  %v14919_v4 = vmax.f32 %v11611_v59, 0.0  ;;  %v14920_v51 = vmax.f32 %v11710_v17, 0.0  ;;  %v14924_v59 = vmax.f32 %v11746_v26, 0.0  ;;  %v12790_v44 = vld [vmem:[%s14653_s0 + $0x188] sm:$0xff] }
 0x107   :  { %v14925_v17 = vmax.f32 %v11657_v5, 0.0  ;;  %v14928_v3 = vmax.f32 %v11782_v38, 0.0  ;;  %v14929_v26 = vmax.f32 %v11693_v13, 0.0  ;;  %v14930_v5 = vmax.f32 %v11796_v49, 0.0 }
 0x108   :  { %9738 = vmatmul.mubr.msk.f32.vlgmr.msra.gmra.mrb[0].mxu1 %vm284_vm0, %v1504_v45  ;;  %v14933_v38 = vmax.f32 %v11729_v21, 0.0  ;;  %v14934_v13 = vmax.f32 %v11832_v37, 0.0  ;;  %v14935_v49 = vmax.f32 %v11755_v30, 0.0  ;;  %v14938_v21 = vmax.f32 %v11868_v15, 0.0 }
 0x109   :  { %10138 = vmatmul.mubr.msk.f32.vlgmr.msra.gmra.mrb[0].mxu0 %vm284_vm0, %v14904_v36  ;;  %9740 = vmatprep.mubr.msk.f32.mxu1 %vm284_vm0, %v14905_v27  ;;  %v14939_v37 = vmax.f32 %v11791_v48, 0.0  ;;  %v14940_v30 = vmax.f32 %v11890_v14, 0.0  ;;  %v14943_v15 = vmax.f32 %v11827_v35, 0.0  ;;  %v14944_v48 = vmax.f32 %v11926_v6, 0.0  ;;  %v14958_v36 = vld [vmem:[#allocation4_spill] sm:$0xff] }
 0x10a   :  { %10568 = vmatpush3.bf16.msra.mxu0 %v11581_v53  ;;  %10140 = vmatprep.mubr.msk.f32.mxu0 %vm284_vm0, %v14906_v8  ;;  %v14911_v53 = vmax.f32 %v11536_v40, 0.0  ;;  %v14916_v40 = vmax.f32 %v11674_v9, 0.0  ;;  %v14921_v9 = vmax.f32 %v11621_v61, 0.0  ;;  %v14926_v61 = vmax.f32 %v11760_v31, 0.0  ;;  %v14962_v8 = vld [vmem:[#allocation5_spill] sm:$0xff] }
 0x10b   :  { %10552 = vmatpush3.bf16.msra.mxu1 %v10549_v0  ;;  %10570 = vmatprep.subr.bf16.mxu0 %v12634_v46  ;;  %v14931_v31 = vmax.f32 %v11719_v19, 0.0  ;;  %v14936_v19 = vmax.f32 %v11854_v22, 0.0  ;;  %v14941_v22 = vmax.f32 %v11801_v23, 0.0  ;;  %v14945_v14 = vmax.f32 %v11837_v7, 0.0 }
 0x10c   :  { %9741 = vmatmul.mubr.msk.f32.gmra.mrb[2].mxu1 %vm284_vm0, %v14907_v24  ;;  %v14946_v23 = vmax.f32 %v11940_v58, 0.0  ;;  %v14947_v2 = vmax.f32 %v11863_v18, 0.0  ;;  %v14948_v35 = vmax.f32 %v11962_v62, 0.0  ;;  %v14949_v6 = vmax.f32 %v11873_v63, 0.0  ;;  %v12772_v58 = vld [vmem:[%s14653_s0 + $0x180] sm:$0xff]  ;;  %v14954_v63 = vld [vmem:[#allocation3_spill] sm:$0xff] }
 0x10d   :  { %10141 = vmatmul.mubr.msk.f32.gmra.mrb[2].mxu0 %vm284_vm0, %v14908_v56  ;;  %9743 = vmatprep.mubr.msk.f32.mxu1 %vm284_vm0, %v14909_v39  ;;  %v14950_v7 = vmax.f32 %v11976_v50, 0.0  ;;  %v14951_v18 = vld [vmem:[#allocation2_spill] sm:$0xff]  ;;  %v14953_v62 = vmax.f32 %v11998_v54, 0.0  ;;  %v14955_v29 = vmax.f32 %v14954_v63, 0.0  ;;  %v14956_v50 = vld [vmem:[#allocation9_spill] sm:$0xff]  ;;  %v4621_v45 = vmax.f32 %v12772_v58, 0.0 }
 0x10e   :  { %10143 = vmatprep.mubr.msk.f32.mxu0 %vm284_vm0, %v14910_v52  ;;  %v14952_v0 = vmax.f32 %v14951_v18, 0.0  ;;  %v14957_v25 = vmax.f32 %v14956_v50, 0.0  ;;  %v8445_v54 = vld [vmem:[%s14653_s0 + $0x198] sm:$0xff]  ;;  %v14959_v27 = vmax.f32 %v14958_v36, 0.0  ;;  %v14961_v41 = vmax.f32 %v14960_v55, 0.0  ;;  %v8446_v52 = vld [vmem:[%s14653_s0 + $0x1a0] sm:$0xff] }
 0x10f   :  { %v14963_v24 = vmax.f32 %v14962_v8, 0.0  ;;  %v4622_v56 = vmax.f32 %v12790_v44, 0.0  ;;  %v4623_v39 = vmax.f32 %v8445_v54, 0.0  ;;  %v15002_v63 = vld [vmem:[#allocation22_spill] sm:$0xff]  ;;  %v15004_v50 = vld [vmem:[#allocation33_spill] sm:$0xff]  ;;  %v15006_v54 = vld [vmem:[#allocation24_spill] sm:$0xff] }
 0x110   :  { %9744 = vmatmul.mubr.msk.f32.gmra.mrb[4].mxu1 %vm284_vm0, %v14911_v53  ;;  %v1471_v53 = vld [vmem:[%s14653_s0 + $0x1b2] sm:$0xff]  ;;  %v15007_v36 = vmax.f32 %v15006_v54, 0.0  ;;  %v8580_v44 = vld [vmem:[%s14653_s0 + $0x201] sm:$0xff] }
 0x111   :  { %10144 = vmatmul.mubr.msk.f32.gmra.mrb[4].mxu0 %vm284_vm0, %v14912_v28  ;;  %9746 = vmatprep.mubr.msk.f32.mxu1 %vm284_vm0, %v14913_v57  ;;  %v14964_v28 = vld [vmem:[#allocation6_spill] sm:$0xff]  ;;  %v15062_v54 = vld [vmem:[#allocation52_spill] sm:$0xff] }
 0x112   :  { %10146 = vmatprep.mubr.msk.f32.mxu0 %vm284_vm0, %v14914_v33  ;;  %v14965_v57 = vmax.f32 %v14964_v28, 0.0  ;;  %v14966_v33 = vld [vmem:[#allocation7_spill] sm:$0xff]  ;;  %v8579_v58 = vld [vmem:[%s14653_s0 + $0x1f9] sm:$0xff] }
 0x113   :  { %v15016_v28 = vld [vmem:[#allocation39_spill] sm:$0xff] }
 0x114   :  { %9747 = vmatmul.mubr.msk.f32.gmra.mrb[6].mxu1 %vm284_vm0, %v14915_v60  ;;  %v14967_v60 = vmax.f32 %v14966_v33, 0.0  ;;  %v15018_v33 = vld [vmem:[#allocation30_spill] sm:$0xff] }
 0x115   :  { %10147 = vmatmul.mubr.msk.f32.gmra.mrb[6].mxu0 %vm284_vm0, %v14916_v40  ;;  %9749 = vmatprep.mubr.msk.f32.mxu1 %vm284_vm0, %v14917_v1  ;;  %v4624_v40 = vmax.f32 %v8446_v52, 0.0  ;;  %v1535_v1 = vmax.f32 %v1471_v53, 0.0  ;;  %v15014_v52 = vld [vmem:[#allocation28_spill] sm:$0xff] }
 0x116   :  { %10149 = vmatprep.mubr.msk.f32.mxu0 %vm284_vm0, %v14918_v42  ;;  %v1472_v42 = vld [vmem:[%s14653_s0 + $0x1ba] sm:$0xff]  ;;  %v15015_v53 = vmax.f32 %v15014_v52, 0.0  ;;  %v15069_v52 = vld [vmem:[#allocation56_spill] sm:$0xff] }
 0x118   :  { %9750 = vmatmul.mubr.msk.f32.gmra.mrb[8].mxu1 %vm284_vm0, %v14919_v4  ;;  %v14968_v4 = vld [vmem:[#allocation8_spill] sm:$0xff] }
 0x119   :  { %10150 = vmatmul.mubr.msk.f32.gmra.mrb[8].mxu0 %vm284_vm0, %v14920_v51  ;;  %9752 = vmatprep.mubr.msk.f32.mxu1 %vm284_vm0, %v14921_v9  ;;  %v14969_v51 = vmax.f32 %v14968_v4, 0.0  ;;  %v1536_v9 = vmax.f32 %v1472_v42, 0.0  ;;  %v15022_v42 = vld [vmem:[#allocation32_spill] sm:$0xff] }
 0x11a   :  { %10152 = vmatprep.mubr.msk.f32.mxu0 %vm284_vm0, %v14922_v47  ;;  %v14970_v47 = vld [vmem:[#allocation15_spill] sm:$0xff]  ;;  %v15023_v4 = vmax.f32 %v15022_v42, 0.0 }
 0x11c   :  { %9753 = vmatmul.mubr.msk.f32.gmra.mrb[10].mxu1 %vm284_vm0, %v14923_v12  ;;  %v14971_v12 = vmax.f32 %v14970_v47, 0.0  ;;  %v15026_v47 = vld [vmem:[#allocation34_spill] sm:$0xff] }
 0x11d   :  { %10153 = vmatmul.mubr.msk.f32.gmra.mrb[10].mxu0 %vm284_vm0, %v14924_v59  ;;  %9755 = vmatprep.mubr.msk.f32.mxu1 %vm284_vm0, %v14925_v17  ;;  %v14972_v59 = vld [vmem:[#allocation17_spill] sm:$0xff] }
 0x11e   :  { %10155 = vmatprep.mubr.msk.f32.mxu0 %vm284_vm0, %v14926_v61  ;;  %v14973_v17 = vmax.f32 %v14972_v59, 0.0  ;;  %v14974_v61 = vld [vmem:[#allocation11_spill] sm:$0xff]  ;;  %v15028_v59 = vld [vmem:[#allocation45_spill] sm:$0xff] }
 0x120   :  { %9756 = vmatmul.mubr.msk.f32.gmra.mrb[12].mxu1 %vm284_vm0, %v14927_v20  ;;  %v14975_v20 = vmax.f32 %v14974_v61, 0.0  ;;  %v15030_v61 = vld [vmem:[#allocation36_spill] sm:$0xff] }
 0x121   :  { %10156 = vmatmul.mubr.msk.f32.gmra.mrb[12].mxu0 %vm284_vm0, %v14928_v3  ;;  %9758 = vmatprep.mubr.msk.f32.mxu1 %vm284_vm0, %v14929_v26  ;;  %v14976_v3 = vld [vmem:[#allocation19_spill] sm:$0xff] }
 0x122   :  { %10158 = vmatprep.mubr.msk.f32.mxu0 %vm284_vm0, %v14930_v5  ;;  %v14977_v26 = vmax.f32 %v14976_v3, 0.0  ;;  %v14978_v5 = vld [vmem:[#allocation12_spill] sm:$0xff]  ;;  %v15032_v3 = vld [vmem:[#allocation47_spill] sm:$0xff] }
 0x124   :  { %9759 = vmatmul.mubr.msk.f32.gmra.mrb[14].mxu1 %vm284_vm0, %v14931_v31  ;;  %v14979_v31 = vmax.f32 %v14978_v5, 0.0  ;;  %v15034_v5 = vld [vmem:[#allocation38_spill] sm:$0xff] }
 0x125   :  { %10159 = vmatmul.mubr.msk.f32.gmra.mrb[14].mxu0 %vm284_vm0, %v14932_v11  ;;  %9761 = vmatprep.mubr.msk.f32.mxu1 %vm284_vm0, %v14933_v38  ;;  %v14980_v11 = vld [vmem:[#allocation21_spill] sm:$0xff] }
 0x126   :  { %10161 = vmatprep.mubr.msk.f32.mxu0 %vm284_vm0, %v14934_v13  ;;  %v14981_v38 = vmax.f32 %v14980_v11, 0.0  ;;  %v14982_v13 = vld [vmem:[#allocation13_spill] sm:$0xff] }
 0x127   :  { %v15036_v11 = vld [vmem:[#allocation49_spill] sm:$0xff] }
 0x128   :  { %9762 = vmatmul.mubr.msk.f32.gmra.mrb[16].mxu1 %vm284_vm0, %v14935_v49  ;;  %v14983_v49 = vmax.f32 %v14982_v13, 0.0  ;;  %v15038_v13 = vld [vmem:[#allocation40_spill] sm:$0xff] }
 0x129   :  { %10162 = vmatmul.mubr.msk.f32.gmra.mrb[16].mxu0 %vm284_vm0, %v14936_v19  ;;  %9764 = vmatprep.mubr.msk.f32.mxu1 %vm284_vm0, %v14937_v10  ;;  %v14984_v19 = vld [vmem:[#allocation23_spill] sm:$0xff] }
 0x12a   :  { %10164 = vmatprep.mubr.msk.f32.mxu0 %vm284_vm0, %v14938_v21  ;;  %v14985_v10 = vmax.f32 %v14984_v19, 0.0  ;;  %v14986_v21 = vld [vmem:[#allocation14_spill] sm:$0xff]  ;;  %v15040_v19 = vld [vmem:[#allocation51_spill] sm:$0xff] }
 0x12c   :  { %9765 = vmatmul.mubr.msk.f32.gmra.mrb[18].mxu1 %vm284_vm0, %v14939_v37  ;;  %v14987_v37 = vmax.f32 %v14986_v21, 0.0  ;;  %v15042_v21 = vld [vmem:[#allocation42_spill] sm:$0xff] }
 0x12d   :  { %10165 = vmatmul.mubr.msk.f32.gmra.mrb[18].mxu0 %vm284_vm0, %v14940_v30  ;;  %9767 = vmatprep.mubr.msk.f32.mxu1 %vm284_vm0, %v14941_v22  ;;  %v14988_v30 = vld [vmem:[#allocation25_spill] sm:$0xff] }
 0x12e   :  { %10167 = vmatprep.mubr.msk.f32.mxu0 %vm284_vm0, %v14942_v32  ;;  %v14989_v22 = vmax.f32 %v14988_v30, 0.0  ;;  %v14990_v32 = vld [vmem:[#allocation16_spill] sm:$0xff]  ;;  %v15044_v30 = vld [vmem:[#allocation53_spill] sm:$0xff] }
 0x130   :  { %9768 = vmatmul.mubr.msk.f32.gmra.mrb[20].mxu1 %vm284_vm0, %v14943_v15  ;;  %v14991_v15 = vmax.f32 %v14990_v32, 0.0  ;;  %v15046_v32 = vld [vmem:[#allocation44_spill] sm:$0xff] }
 0x131   :  { %10168 = vmatmul.mubr.msk.f32.gmra.mrb[20].mxu0 %vm284_vm0, %v14944_v48  ;;  %9770 = vmatprep.mubr.msk.f32.mxu1 %vm284_vm0, %v14945_v14  ;;  %v14992_v48 = vld [vmem:[#allocation27_spill] sm:$0xff] }
 0x132   :  { %10170 = vmatprep.mubr.msk.f32.mxu0 %vm284_vm0, %v14946_v23  ;;  %v14993_v14 = vmax.f32 %v14992_v48, 0.0  ;;  %v14994_v23 = vld [vmem:[#allocation18_spill] sm:$0xff]  ;;  %v15048_v48 = vld [vmem:[#allocation55_spill] sm:$0xff] }
 0x134   :  { %9771 = vmatmul.mubr.msk.f32.gmra.mrb[22].mxu1 %vm284_vm0, %v14947_v2  ;;  %v14995_v2 = vmax.f32 %v14994_v23, 0.0  ;;  %v15050_v23 = vld [vmem:[#allocation46_spill] sm:$0xff] }
 0x135   :  { %10171 = vmatmul.mubr.msk.f32.gmra.mrb[22].mxu0 %vm284_vm0, %v14948_v35  ;;  %9773 = vmatprep.mubr.msk.f32.mxu1 %vm284_vm0, %v14949_v6  ;;  %v14996_v35 = vld [vmem:[#allocation29_spill] sm:$0xff] }
 0x136   :  { %10173 = vmatprep.mubr.msk.f32.mxu0 %vm284_vm0, %v14950_v7  ;;  %v14997_v6 = vmax.f32 %v14996_v35, 0.0  ;;  %v14998_v7 = vld [vmem:[#allocation20_spill] sm:$0xff]  ;;  %v15052_v35 = vld [vmem:[#allocation57_spill] sm:$0xff] }
 0x137   :  { %v14999_v18 = vmax.f32 %v14998_v7, 0.0  ;;  %v15054_v7 = vld [vmem:[#allocation48_spill] sm:$0xff] }
 0x138   :  { %9774 = vmatmul.mubr.msk.f32.gmra.mrb[24].mxu1 %vm284_vm0, %v14952_v0  ;;  %v15000_v0 = vld [vmem:[#allocation31_spill] sm:$0xff] }
 0x139   :  { %10174 = vmatmul.mubr.msk.f32.gmra.mrb[24].mxu0 %vm284_vm0, %v14953_v62  ;;  %9776 = vmatprep.mubr.msk.f32.mxu1 %vm284_vm0, %v14955_v29  ;;  %v15001_v62 = vmax.f32 %v15000_v0, 0.0  ;;  %v15003_v29 = vmax.f32 %v15002_v63, 0.0  ;;  %v15056_v0 = vld [vmem:[#allocation59_spill] sm:$0xff]  ;;  %v15058_v63 = vld [vmem:[#allocation50_spill] sm:$0xff] }
 0x13a   :  { %10176 = vmatprep.mubr.msk.f32.mxu0 %vm284_vm0, %v14957_v25  ;;  %v15005_v25 = vmax.f32 %v15004_v50, 0.0  ;;  %v15060_v50 = vld [vmem:[#allocation61_spill] sm:$0xff] }
 0x13c   :  { %9777 = vmatmul.mubr.msk.f32.gmra.mrb[26].mxu1 %vm284_vm0, %v14959_v27  ;;  %v15008_v27 = vld [vmem:[#allocation35_spill] sm:$0xff] }
 0x13d   :  { %10177 = vmatmul.mubr.msk.f32.gmra.mrb[26].mxu0 %vm284_vm0, %v14961_v41  ;;  %9779 = vmatprep.mubr.msk.f32.mxu1 %vm284_vm0, %v14963_v24  ;;  %v15009_v55 = vmax.f32 %v15008_v27, 0.0  ;;  %v15010_v41 = vld [vmem:[#allocation26_spill] sm:$0xff]  ;;  %v15012_v24 = vld [vmem:[#allocation37_spill] sm:$0xff]  ;;  %v15064_v27 = vld [vmem:[#allocation63_spill] sm:$0xff] }
 0x13e   :  { %10179 = vmatprep.mubr.msk.f32.mxu0 %vm284_vm0, %v4621_v45  ;;  %v15011_v8 = vmax.f32 %v15010_v41, 0.0  ;;  %v12980_v41 = vld [vmem:[%s14653_s0 + $0x330] sm:$0xff] }
 0x140   :  { %9780 = vmatmul.mubr.msk.f32.gmra.mrb[28].mxu1 %vm284_vm0, %v14965_v57  ;;  %v15017_v57 = vmax.f32 %v15016_v28, 0.0  ;;  %v15071_v28 = vmax.f32 %v12558_v43, 0.0  ;;  %v15075_v43 = vld [vmem:[#allocation60_spill] sm:$0xff] }
 0x141   :  { %10180 = vmatmul.mubr.msk.f32.gmra.mrb[28].mxu0 %vm284_vm0, %v4622_v56  ;;  %9782 = vmatprep.mubr.msk.f32.mxu1 %vm284_vm0, %v14967_v60  ;;  %v15019_v60 = vmax.f32 %v15018_v33, 0.0  ;;  %v12998_v33 = vld [vmem:[%s14653_s0 + $0x338] sm:$0xff]  ;;  %v15076_v42 = vmax.f32 %v15075_v43, 0.0 }
 0x142   :  { %10182 = vmatprep.mubr.msk.f32.mxu0 %vm284_vm0, %v4623_v39  ;;  %v15013_v39 = vmax.f32 %v15012_v24, 0.0  ;;  %v8556_v43 = vld [vmem:[%s14653_s0 + $0xb1] sm:$0xff] }
 0x144   :  { %9783 = vmatmul.mubr.msk.f32.gmra.mrb[30].mxu1 %vm284_vm0, %v14969_v51  ;;  %v15024_v51 = vld [vmem:[#allocation43_spill] sm:$0xff] }
 0x145   :  { %10183 = vmatmul.mubr.msk.f32.gmra.mrb[30].mxu0 %vm284_vm0, %v4624_v40  ;;  %9785 = vmatprep.mubr.msk.f32.mxu1 %vm284_vm0, %v1535_v1  ;;  %v15020_v40 = vld [vmem:[#allocation41_spill] sm:$0xff] }
 0x146   :  { %10185 = vmatprep.mubr.msk.f32.mxu0 %vm284_vm0, %v14971_v12  ;;  %v15021_v1 = vmax.f32 %v15020_v40, 0.0  ;;  %v15027_v12 = vmax.f32 %v15026_v47, 0.0  ;;  %v8545_v47 = vld [vmem:[%s14653_s0 + $0x31] sm:$0xff] }
 0x148   :  { %9786 = vmatmul.mubr.msk.f32.gmra.mrb[32].mxu1 %vm284_vm0, %v1536_v9  ;;  %v15025_v9 = vmax.f32 %v15024_v51, 0.0 }
 0x149   :  { %10186 = vmatmul.mubr.msk.f32.gmra.mrb[32].mxu0 %vm284_vm0, %v14973_v17  ;;  %9788 = vmatprep.mubr.msk.f32.mxu1 %vm284_vm0, %v14975_v20  ;;  %v15029_v17 = vmax.f32 %v15028_v59, 0.0  ;;  %v15031_v20 = vmax.f32 %v15030_v61, 0.0 }
 0x14a   :  { %10188 = vmatprep.mubr.msk.f32.mxu0 %vm284_vm0, %v14977_v26  ;;  %v15033_v26 = vmax.f32 %v15032_v3, 0.0 }
 0x14c   :  { %9789 = vmatmul.mubr.msk.f32.gmra.mrb[34].mxu1 %vm284_vm0, %v14979_v31  ;;  %v15035_v31 = vmax.f32 %v15034_v5, 0.0  ;;  %v5365_v5 = vmax.f32 %v8545_v47, 0.0 }
 0x14d   :  { %10189 = vmatmul.mubr.msk.f32.gmra.mrb[34].mxu0 %vm284_vm0, %v14981_v38  ;;  %9791 = vmatprep.mubr.msk.f32.mxu1 %vm284_vm0, %v14983_v49  ;;  %v15037_v38 = vmax.f32 %v15036_v11, 0.0  ;;  %v15039_v49 = vmax.f32 %v15038_v13, 0.0  ;;  %v8027_v11 = vld [vmem:[%s14653_s0 + $0x30] sm:$0xff]  ;;  %v15081_v13 = vld [vmem:[#allocation65_spill] sm:$0xff] }
 0x14e   :  { %10191 = vmatprep.mubr.msk.f32.mxu0 %vm284_vm0, %v14985_v10  ;;  %v15041_v10 = vmax.f32 %v15040_v19, 0.0 }
 0x150   :  { %9792 = vmatmul.mubr.msk.f32.gmra.mrb[36].mxu1 %vm284_vm0, %v14987_v37  ;;  %v15043_v37 = vmax.f32 %v15042_v21, 0.0  ;;  %v2278_v21 = vmax.f32 %v8027_v11, 0.0 }
 0x151   :  { %10192 = vmatmul.mubr.msk.f32.gmra.mrb[36].mxu0 %vm284_vm0, %v14989_v22  ;;  %9794 = vmatprep.mubr.msk.f32.mxu1 %vm284_vm0, %v14991_v15  ;;  %v15045_v22 = vmax.f32 %v15044_v30, 0.0  ;;  %v15047_v15 = vmax.f32 %v15046_v32, 0.0  ;;  %v8029_v32 = vld [vmem:[%s14653_s0 + $0x48] sm:$0xff] }
 0x152   :  { %10194 = vmatprep.mubr.msk.f32.mxu0 %vm284_vm0, %v14993_v14  ;;  %v15049_v14 = vmax.f32 %v15048_v48, 0.0 }
 0x154   :  { %9795 = vmatmul.mubr.msk.f32.gmra.mrb[38].mxu1 %vm284_vm0, %v14995_v2  ;;  %v15051_v2 = vmax.f32 %v15050_v23, 0.0  ;;  %v2280_v23 = vmax.f32 %v8029_v32, 0.0  ;;  %v8043_v32 = vld [vmem:[%s14653_s0 + $0xf0] sm:$0xff] }
 0x155   :  { %10195 = vmatmul.mubr.msk.f32.gmra.mrb[38].mxu0 %vm284_vm0, %v14997_v6  ;;  %9797 = vmatprep.mubr.msk.f32.mxu1 %vm284_vm0, %v14999_v18  ;;  %v15053_v6 = vmax.f32 %v15052_v35, 0.0  ;;  %v15055_v18 = vmax.f32 %v15054_v7, 0.0  ;;  %v8031_v7 = vld [vmem:[%s14653_s0 + $0x60] sm:$0xff] }
 0x156   :  { %10197 = vmatprep.mubr.msk.f32.mxu0 %vm284_vm0, %v15001_v62  ;;  %v15057_v62 = vmax.f32 %v15056_v0, 0.0 }
 0x158   :  { %9798 = vmatmul.mubr.msk.f32.gmra.mrb[40].mxu1 %vm284_vm0, %v15003_v29  ;;  %v15059_v29 = vmax.f32 %v15058_v63, 0.0  ;;  %v8032_v63 = vld [vmem:[%s14653_s0 + $0x68] sm:$0xff] }
 0x159   :  { %10198 = vmatmul.mubr.msk.f32.gmra.mrb[40].mxu0 %vm284_vm0, %v15005_v25  ;;  %9800 = vmatprep.mubr.msk.f32.mxu1 %vm284_vm0, %v15007_v36  ;;  %v15061_v25 = vmax.f32 %v15060_v50, 0.0  ;;  %v15063_v36 = vmax.f32 %v15062_v54, 0.0  ;;  %v8552_v50 = vld [vmem:[%s14653_s0 + $0x81] sm:$0xff]  ;;  %v8553_v54 = vld [vmem:[%s14653_s0 + $0x91] sm:$0xff] }
 0x15a   :  { %10200 = vmatprep.mubr.msk.f32.mxu0 %vm284_vm0, %v15009_v55  ;;  %v15065_v55 = vmax.f32 %v15064_v27, 0.0  ;;  %v5372_v27 = vmax.f32 %v8552_v50, 0.0  ;;  %v8566_v50 = vld [vmem:[%s14653_s0 + $0x129] sm:$0xff] }
 0x15c   :  { %9801 = vmatmul.mubr.msk.f32.gmra.mrb[42].mxu1 %vm284_vm0, %v15011_v8  ;;  %v15066_v8 = vld [vmem:[#allocation54_spill] sm:$0xff] }
 0x15d   :  { %10201 = vmatmul.mubr.msk.f32.gmra.mrb[42].mxu0 %vm284_vm0, %v15013_v39  ;;  %9803 = vmatprep.mubr.msk.f32.mxu1 %vm284_vm0, %v15015_v53  ;;  %v15067_v24 = vmax.f32 %v15066_v8, 0.0  ;;  %v15068_v39 = vmax.f32 %v12544_v16, 0.0  ;;  %v15070_v53 = vmax.f32 %v15069_v52, 0.0  ;;  %v8477_v16 = vld [vmem:[%s14653_s0 + $0x348] sm:$0xff]  ;;  %v8034_v8 = vld [vmem:[%s14653_s0 + $0x80] sm:$0xff]  ;;  %v8035_v52 = vld [vmem:[%s14653_s0 + $0x90] sm:$0xff] }
 0x15e   :  { %10203 = vmatprep.mubr.msk.f32.mxu0 %vm284_vm0, %v15017_v57  ;;  %v4653_v57 = vmax.f32 %v12980_v41, 0.0  ;;  %v4655_v51 = vmax.f32 %v8477_v16, 0.0 }
 0x160   :  { %9804 = vmatmul.mubr.msk.f32.gmra.mrb[44].mxu1 %vm284_vm0, %v15019_v60  ;;  %v15072_v60 = vld [vmem:[#allocation58_spill] sm:$0xff] }
 0x161   :  { %10204 = vmatmul.mubr.msk.f32.gmra.mrb[44].mxu0 %vm284_vm0, %v15021_v1  ;;  %9806 = vmatprep.mubr.msk.f32.mxu1 %vm284_vm0, %v15023_v4  ;;  %v15073_v40 = vmax.f32 %v15072_v60, 0.0  ;;  %v15074_v1 = vmax.f32 %v12578_v34, 0.0  ;;  %v4654_v4 = vmax.f32 %v12998_v33, 0.0  ;;  %v8025_v34 = vld [vmem:[%s14653_s0 + $0x18] sm:$0xff]  ;;  %v2286_v60 = vmax.f32 %v8035_v52, 0.0 }
 0x162   :  { %10206 = vmatprep.mubr.msk.f32.mxu0 %vm284_vm0, %v15025_v9  ;;  %v8478_v9 = vld [vmem:[%s14653_s0 + $0x350] sm:$0xff]  ;;  %v2276_v3 = vmax.f32 %v8025_v34, 0.0  ;;  %v5376_v34 = vmax.f32 %v8556_v43, 0.0  ;;  %v8049_v52 = vld [vmem:[%s14653_s0 + $0x138] sm:$0xff] }
 0x163   :  { %v8570_v43 = vld [vmem:[%s14653_s0 + $0x159] sm:$0xff] }
 0x164   :  { %9807 = vmatmul.mubr.msk.f32.gmra.mrb[46].mxu1 %vm284_vm0, %v15027_v12  ;;  %v15077_v12 = vld [vmem:[#allocation62_spill] sm:$0xff] }
 0x165   :  { %10207 = vmatmul.mubr.msk.f32.gmra.mrb[46].mxu0 %vm284_vm0, %v15029_v17  ;;  %9809 = vmatprep.mubr.msk.f32.mxu1 %vm284_vm0, %v15031_v20  ;;  %v15078_v59 = vmax.f32 %v15077_v12, 0.0  ;;  %v15079_v17 = vld [vmem:[#allocation64_spill] sm:$0xff]  ;;  %v4656_v20 = vmax.f32 %v8478_v9, 0.0 }
 0x166   :  { %10209 = vmatprep.mubr.msk.f32.mxu0 %vm284_vm0, %v15033_v26  ;;  %v15080_v61 = vmax.f32 %v15079_v17, 0.0  ;;  %v8026_v26 = vld [vmem:[%s14653_s0 + $0x20] sm:$0xff]  ;;  %v8038_v12 = vld [vmem:[%s14653_s0 + $0xb0] sm:$0xff] }
 0x167   :  { %v2277_v19 = vmax.f32 %v8026_v26, 0.0  ;;  %v8558_v17 = vld [vmem:[%s14653_s0 + $0xc9] sm:$0xff] }
 0x168   :  { %9810 = vmatmul.mubr.msk.f32.gmra.mrb[48].mxu1 %vm284_vm0, %v15035_v31  ;;  %v8546_v31 = vld [vmem:[%s14653_s0 + $0x39] sm:$0xff]  ;;  %v5378_v26 = vmax.f32 %v8558_v17, 0.0  ;;  %v8572_v17 = vld [vmem:[%s14653_s0 + $0x171] sm:$0xff] }
 0x169   :  { %10210 = vmatmul.mubr.msk.f32.gmra.mrb[48].mxu0 %vm284_vm0, %v15037_v38  ;;  %9812 = vmatprep.mubr.msk.f32.mxu1 %vm284_vm0, %v15039_v49  ;;  %v8547_v38 = vld [vmem:[%s14653_s0 + $0x49] sm:$0xff]  ;;  %v15082_v49 = vmax.f32 %v15081_v13, 0.0  ;;  %v8041_v13 = vld [vmem:[%s14653_s0 + $0xd8] sm:$0xff] }
 0x16a   :  { %10212 = vmatprep.mubr.msk.f32.mxu0 %vm284_vm0, %v15041_v10  ;;  %v5366_v10 = vmax.f32 %v8546_v31, 0.0  ;;  %v5367_v30 = vmax.f32 %v8547_v38, 0.0  ;;  %v8040_v31 = vld [vmem:[%s14653_s0 + $0xc8] sm:$0xff] }
 0x16b   :  { %v8560_v38 = vld [vmem:[%s14653_s0 + $0xe1] sm:$0xff] }
 0x16c   :  { %9813 = vmatmul.mubr.msk.f32.gmra.mrb[50].mxu1 %vm284_vm0, %v15043_v37  ;;  %v8028_v37 = vld [vmem:[%s14653_s0 + $0x38] sm:$0xff] }
 0x16d   :  { %10213 = vmatmul.mubr.msk.f32.gmra.mrb[50].mxu0 %vm284_vm0, %v15045_v22  ;;  %9815 = vmatprep.mubr.msk.f32.mxu1 %vm284_vm0, %v15047_v15  ;;  %v8548_v22 = vld [vmem:[%s14653_s0 + $0x51] sm:$0xff]  ;;  %v8549_v15 = vld [vmem:[%s14653_s0 + $0x61] sm:$0xff]  ;;  %v2279_v48 = vmax.f32 %v8028_v37, 0.0 }
 0x16e   :  { %10215 = vmatprep.mubr.msk.f32.mxu0 %vm284_vm0, %v15049_v14  ;;  %v5368_v14 = vmax.f32 %v8548_v22, 0.0  ;;  %v5369_v35 = vmax.f32 %v8549_v15, 0.0  ;;  %v8042_v37 = vld [vmem:[%s14653_s0 + $0xe0] sm:$0xff]  ;;  %v8563_v15 = vld [vmem:[%s14653_s0 + $0x109] sm:$0xff] }
 0x16f   :  { %v8562_v22 = vld [vmem:[%s14653_s0 + $0xf9] sm:$0xff] }
 0x170   :  { %9816 = vmatmul.mubr.msk.f32.gmra.mrb[52].mxu1 %vm284_vm0, %v15051_v2  ;;  %v8030_v2 = vld [vmem:[%s14653_s0 + $0x50] sm:$0xff] }
 0x171   :  { %10216 = vmatmul.mubr.msk.f32.gmra.mrb[52].mxu0 %vm284_vm0, %v15053_v6  ;;  %9818 = vmatprep.mubr.msk.f32.mxu1 %vm284_vm0, %v15055_v18  ;;  %v8550_v6 = vld [vmem:[%s14653_s0 + $0x69] sm:$0xff]  ;;  %v8551_v18 = vld [vmem:[%s14653_s0 + $0x79] sm:$0xff]  ;;  %v2281_v0 = vmax.f32 %v8030_v2, 0.0 }
 0x172   :  { %10218 = vmatprep.mubr.msk.f32.mxu0 %vm284_vm0, %v15057_v62  ;;  %v2282_v62 = vmax.f32 %v8031_v7, 0.0  ;;  %v8044_v2 = vld [vmem:[%s14653_s0 + $0xf8] sm:$0xff]  ;;  %v8045_v7 = vld [vmem:[%s14653_s0 + $0x108] sm:$0xff] }
 0x174   :  { %9819 = vmatmul.mubr.msk.f32.gmra.mrb[54].mxu1 %vm284_vm0, %v15059_v29  ;;  %v5371_v29 = vmax.f32 %v8551_v18, 0.0  ;;  %v8565_v18 = vld [vmem:[%s14653_s0 + $0x121] sm:$0xff] }
 0x175   :  { %10219 = vmatmul.mubr.msk.f32.gmra.mrb[54].mxu0 %vm284_vm0, %v15061_v25  ;;  %9821 = vmatprep.mubr.msk.f32.mxu1 %vm284_vm0, %v15063_v36  ;;  %v8033_v25 = vld [vmem:[%s14653_s0 + $0x78] sm:$0xff]  ;;  %v2283_v36 = vmax.f32 %v8032_v63, 0.0  ;;  %v8046_v63 = vld [vmem:[%s14653_s0 + $0x110] sm:$0xff] }
 0x176   :  { %10221 = vmatprep.mubr.msk.f32.mxu0 %vm284_vm0, %v15065_v55  ;;  %v2284_v55 = vmax.f32 %v8033_v25, 0.0  ;;  %v8047_v25 = vld [vmem:[%s14653_s0 + $0x120] sm:$0xff] }
 0x178   :  { %9822 = vmatmul.mubr.msk.f32.gmra.mrb[56].mxu1 %vm284_vm0, %v15067_v24  ;;  %v5373_v24 = vmax.f32 %v8553_v54, 0.0  ;;  %v8567_v54 = vld [vmem:[%s14653_s0 + $0x139] sm:$0xff] }
 0x179   :  { %10222 = vmatmul.mubr.msk.f32.gmra.mrb[56].mxu0 %vm284_vm0, %v15068_v39  ;;  %9824 = vmatprep.mubr.msk.f32.mxu1 %vm284_vm0, %v15070_v53  ;;  %v8554_v39 = vld [vmem:[%s14653_s0 + $0x99] sm:$0xff]  ;;  %v8555_v53 = vld [vmem:[%s14653_s0 + $0xa9] sm:$0xff] }
 0x17a   :  { %10224 = vmatprep.mubr.msk.f32.mxu0 %vm284_vm0, %v15071_v28  ;;  %v2285_v28 = vmax.f32 %v8034_v8, 0.0  ;;  %v5374_v16 = vmax.f32 %v8554_v39, 0.0  ;;  %v8048_v8 = vld [vmem:[%s14653_s0 + $0x128] sm:$0xff] }
 0x17b   :  { %v8568_v39 = vld [vmem:[%s14653_s0 + $0x141] sm:$0xff] }
 0x17c   :  { %9825 = vmatmul.mubr.msk.f32.gmra.mrb[58].mxu1 %vm284_vm0, %v15073_v40  ;;  %v8036_v40 = vld [vmem:[%s14653_s0 + $0x98] sm:$0xff] }
 0x17d   :  { %10225 = vmatmul.mubr.msk.f32.gmra.mrb[58].mxu0 %vm284_vm0, %v15074_v1  ;;  %9827 = vmatprep.mubr.msk.f32.mxu1 %vm284_vm0, %v15076_v42  ;;  %v5375_v1 = vmax.f32 %v8555_v53, 0.0  ;;  %v8037_v42 = vld [vmem:[%s14653_s0 + $0xa8] sm:$0xff]  ;;  %v2287_v9 = vmax.f32 %v8036_v40, 0.0  ;;  %v8569_v53 = vld [vmem:[%s14653_s0 + $0x151] sm:$0xff]  ;;  %v8050_v40 = vld [vmem:[%s14653_s0 + $0x140] sm:$0xff] }
 0x17e   :  { %10227 = vmatprep.mubr.msk.f32.mxu0 %vm284_vm0, %v4653_v57  ;;  %v2288_v47 = vmax.f32 %v8037_v42, 0.0  ;;  %v8051_v42 = vld [vmem:[%s14653_s0 + $0x150] sm:$0xff] }
 0x180   :  { %9828 = vmatmul.mubr.msk.f32.gmra.mrb[60].mxu1 %vm284_vm0, %v15078_v59 }
 0x181   :  { %10228 = vmatmul.mubr.msk.f32.gmra.mrb[60].mxu0 %vm284_vm0, %v4654_v4  ;;  %9830 = vmatprep.mubr.msk.f32.mxu1 %vm284_vm0, %v15080_v61  ;;  %v8039_v61 = vld [vmem:[%s14653_s0 + $0xc0] sm:$0xff] }
 0x182   :  { %10230 = vmatprep.mubr.msk.f32.mxu0 %vm284_vm0, %v4655_v51  ;;  %v8557_v51 = vld [vmem:[%s14653_s0 + $0xc1] sm:$0xff] }
 0x183   :  { %v5377_v59 = vmax.f32 %v8557_v51, 0.0  ;;  %v8571_v51 = vld [vmem:[%s14653_s0 + $0x169] sm:$0xff] }
 0x184   :  { %9831 = vmatmul.mubr.msk.f32.gmra.mrb[62].mxu1 %vm284_vm0, %v15082_v49  ;;  %v8561_v49 = vld [vmem:[%s14653_s0 + $0xf1] sm:$0xff] }
 0x185   :  { %10231 = vmatmul.mubr.msk.f32.gmra.mrb[62].mxu0 %vm284_vm0, %v4656_v20  ;;  %9837 = vmatprep.mubr.msk.f32.mxu1 %vm284_vm0, %v2276_v3  ;;  %v8559_v20 = vld [vmem:[%s14653_s0 + $0xd9] sm:$0xff]  ;;  %v2289_v3 = vmax.f32 %v8038_v12, 0.0 }
 0x186   :  { %10237 = vmatprep.mubr.msk.f32.mxu0 %vm284_vm0, %v5365_v5  ;;  %v2290_v5 = vmax.f32 %v8039_v61, 0.0  ;;  %v5379_v11 = vmax.f32 %v8559_v20, 0.0  ;;  %v8052_v12 = vld [vmem:[%s14653_s0 + $0x158] sm:$0xff]  ;;  %v8053_v61 = vld [vmem:[%s14653_s0 + $0x168] sm:$0xff] }
 0x187   :  { %v8573_v20 = vld [vmem:[%s14653_s0 + $0x181] sm:$0xff] }
 0x188   :  { %9838 = vmatmul.mubr.msk.f32.vlgmr.msra.gmra.mrb[0].mxu1 %vm284_vm0, %v2277_v19  ;;  %v2291_v19 = vmax.f32 %v8040_v31, 0.0  ;;  %v8054_v31 = vld [vmem:[%s14653_s0 + $0x170] sm:$0xff] }
 0x189   :  { %10238 = vmatmul.mubr.msk.f32.vlgmr.msra.gmra.mrb[0].mxu0 %vm284_vm0, %v5366_v10  ;;  %9840 = vmatprep.mubr.msk.f32.mxu1 %vm284_vm0, %v2278_v21  ;;  %v5380_v10 = vmax.f32 %v8560_v38, 0.0  ;;  %v2292_v21 = vmax.f32 %v8041_v13, 0.0  ;;  %v8574_v38 = vld [vmem:[%s14653_s0 + $0x189] sm:$0xff]  ;;  %v8575_v13 = vld [vmem:[%s14653_s0 + $0x199] sm:$0xff] }
 0x18a   :  { %10572 = vmatpush3.bf16.msra.mxu0 %v12634_v46  ;;  %10240 = vmatprep.mubr.msk.f32.mxu0 %vm284_vm0, %v5367_v30  ;;  %v5370_v46 = vmax.f32 %v8550_v6, 0.0  ;;  %v5381_v30 = vmax.f32 %v8561_v49, 0.0  ;;  %v8564_v6 = vld [vmem:[%s14653_s0 + $0x111] sm:$0xff]  ;;  %v2305_v49 = vmax.f32 %v8054_v31, 0.0  ;;  %v8070_v31 = vld [vmem:[%s14653_s0 + $0x260] sm:$0xff] }
 0x18c   :  { %9841 = vmatmul.mubr.msk.f32.gmra.mrb[2].mxu1 %vm284_vm0, %v2279_v48  ;;  %v2293_v48 = vmax.f32 %v8042_v37, 0.0  ;;  %v8057_v37 = vld [vmem:[%s14653_s0 + $0x1c8] sm:$0xff] }
 0x18d   :  { %10241 = vmatmul.mubr.msk.f32.gmra.mrb[2].mxu0 %vm284_vm0, %v5368_v14  ;;  %9843 = vmatprep.mubr.msk.f32.mxu1 %vm284_vm0, %v2280_v23  ;;  %v5382_v14 = vmax.f32 %v8562_v22, 0.0  ;;  %v2294_v23 = vmax.f32 %v8043_v32, 0.0  ;;  %v2308_v32 = vmax.f32 %v8057_v37, 0.0  ;;  %v8072_v37 = vld [vmem:[%s14653_s0 + $0x278] sm:$0xff] }
 0x18e   :  { %10243 = vmatprep.mubr.msk.f32.mxu0 %vm284_vm0, %v5369_v35  ;;  %v5383_v35 = vmax.f32 %v8563_v15, 0.0  ;;  %v8058_v15 = vld [vmem:[%s14653_s0 + $0x1d0] sm:$0xff] }
 0x190   :  { %9844 = vmatmul.mubr.msk.f32.gmra.mrb[4].mxu1 %vm284_vm0, %v2281_v0  ;;  %v2295_v0 = vmax.f32 %v8044_v2, 0.0 }
 0x191   :  { %10244 = vmatmul.mubr.msk.f32.gmra.mrb[4].mxu0 %vm284_vm0, %v5370_v46  ;;  %9846 = vmatprep.mubr.msk.f32.mxu1 %vm284_vm0, %v2282_v62  ;;  %v5384_v46 = vmax.f32 %v8564_v6, 0.0  ;;  %v2296_v62 = vmax.f32 %v8045_v7, 0.0  ;;  %v8060_v6 = vld [vmem:[%s14653_s0 + $0x1e8] sm:$0xff]  ;;  %v5399_v7 = vmax.f32 %v8579_v58, 0.0  ;;  %v8074_v58 = vld [vmem:[%s14653_s0 + $0x290] sm:$0xff] }
 0x192   :  { %10246 = vmatprep.mubr.msk.f32.mxu0 %vm284_vm0, %v5371_v29  ;;  %v5385_v29 = vmax.f32 %v8565_v18, 0.0  ;;  %v8581_v18 = vld [vmem:[%s14653_s0 + $0x211] sm:$0xff] }
 0x194   :  { %9847 = vmatmul.mubr.msk.f32.gmra.mrb[6].mxu1 %vm284_vm0, %v2283_v36  ;;  %v2297_v36 = vmax.f32 %v8046_v63, 0.0  ;;  %v8062_v63 = vld [vmem:[%s14653_s0 + $0x200] sm:$0xff] }
 0x195   :  { %10247 = vmatmul.mubr.msk.f32.gmra.mrb[6].mxu0 %vm284_vm0, %v5372_v27  ;;  %9849 = vmatprep.mubr.msk.f32.mxu1 %vm284_vm0, %v2284_v55  ;;  %v5386_v27 = vmax.f32 %v8566_v50, 0.0  ;;  %v2298_v55 = vmax.f32 %v8047_v25, 0.0  ;;  %v8582_v50 = vld [vmem:[%s14653_s0 + $0x219] sm:$0xff]  ;;  %v8063_v25 = vld [vmem:[%s14653_s0 + $0x210] sm:$0xff] }
 0x196   :  { %10249 = vmatprep.mubr.msk.f32.mxu0 %vm284_vm0, %v5373_v24  ;;  %v5387_v24 = vmax.f32 %v8567_v54, 0.0  ;;  %v8583_v54 = vld [vmem:[%s14653_s0 + $0x229] sm:$0xff] }
 0x198   :  { %9850 = vmatmul.mubr.msk.f32.gmra.mrb[8].mxu1 %vm284_vm0, %v2285_v28  ;;  %v2299_v28 = vmax.f32 %v8048_v8, 0.0  ;;  %v8064_v8 = vld [vmem:[%s14653_s0 + $0x218] sm:$0xff] }
 0x199   :  { %10250 = vmatmul.mubr.msk.f32.gmra.mrb[8].mxu0 %vm284_vm0, %v5374_v16  ;;  %9852 = vmatprep.mubr.msk.f32.mxu1 %vm284_vm0, %v2286_v60  ;;  %v5388_v16 = vmax.f32 %v8568_v39, 0.0  ;;  %v2300_v60 = vmax.f32 %v8049_v52, 0.0  ;;  %v8584_v39 = vld [vmem:[%s14653_s0 + $0x231] sm:$0xff]  ;;  %v8065_v52 = vld [vmem:[%s14653_s0 + $0x228] sm:$0xff] }
 0x19a   :  { %10252 = vmatprep.mubr.msk.f32.mxu0 %vm284_vm0, %v5375_v1  ;;  %v5389_v1 = vmax.f32 %v8569_v53, 0.0  ;;  %v8585_v53 = vld [vmem:[%s14653_s0 + $0x241] sm:$0xff] }
 0x19c   :  { %9853 = vmatmul.mubr.msk.f32.gmra.mrb[10].mxu1 %vm284_vm0, %v2287_v9  ;;  %v2301_v9 = vmax.f32 %v8050_v40, 0.0  ;;  %v8066_v40 = vld [vmem:[%s14653_s0 + $0x230] sm:$0xff] }
 0x19d   :  { %10253 = vmatmul.mubr.msk.f32.gmra.mrb[10].mxu0 %vm284_vm0, %v5376_v34  ;;  %9855 = vmatprep.mubr.msk.f32.mxu1 %vm284_vm0, %v2288_v47  ;;  %v5390_v34 = vmax.f32 %v8570_v43, 0.0  ;;  %v2302_v47 = vmax.f32 %v8051_v42, 0.0  ;;  %v8586_v43 = vld [vmem:[%s14653_s0 + $0x249] sm:$0xff]  ;;  %v8067_v42 = vld [vmem:[%s14653_s0 + $0x240] sm:$0xff] }
 0x19e   :  { %10255 = vmatprep.mubr.msk.f32.mxu0 %vm284_vm0, %v5377_v59  ;;  %v5391_v59 = vmax.f32 %v8571_v51, 0.0  ;;  %v8587_v51 = vld [vmem:[%s14653_s0 + $0x259] sm:$0xff] }
 0x1a0   :  { %9856 = vmatmul.mubr.msk.f32.gmra.mrb[12].mxu1 %vm284_vm0, %v2289_v3  ;;  %v2303_v3 = vmax.f32 %v8052_v12, 0.0  ;;  %v8068_v12 = vld [vmem:[%s14653_s0 + $0x248] sm:$0xff] }
 0x1a1   :  { %10256 = vmatmul.mubr.msk.f32.gmra.mrb[12].mxu0 %vm284_vm0, %v5378_v26  ;;  %9858 = vmatprep.mubr.msk.f32.mxu1 %vm284_vm0, %v2290_v5  ;;  %v5392_v26 = vmax.f32 %v8572_v17, 0.0  ;;  %v2304_v5 = vmax.f32 %v8053_v61, 0.0  ;;  %v8588_v17 = vld [vmem:[%s14653_s0 + $0x261] sm:$0xff]  ;;  %v8069_v61 = vld [vmem:[%s14653_s0 + $0x258] sm:$0xff] }
 0x1a2   :  { %10258 = vmatprep.mubr.msk.f32.mxu0 %vm284_vm0, %v5379_v11  ;;  %v5393_v11 = vmax.f32 %v8573_v20, 0.0  ;;  %v8589_v20 = vld [vmem:[%s14653_s0 + $0x271] sm:$0xff] }
 0x1a4   :  { %9859 = vmatmul.mubr.msk.f32.gmra.mrb[14].mxu1 %vm284_vm0, %v2291_v19  ;;  %v5394_v19 = vmax.f32 %v8574_v38, 0.0  ;;  %v8590_v38 = vld [vmem:[%s14653_s0 + $0x279] sm:$0xff] }
 0x1a5   :  { %10259 = vmatmul.mubr.msk.f32.gmra.mrb[14].mxu0 %vm284_vm0, %v5380_v10  ;;  %9861 = vmatprep.mubr.msk.f32.mxu1 %vm284_vm0, %v2292_v21  ;;  %v5395_v10 = vmax.f32 %v8575_v13, 0.0  ;;  %v8576_v21 = vld [vmem:[%s14653_s0 + $0x1a1] sm:$0xff]  ;;  %v8071_v13 = vld [vmem:[%s14653_s0 + $0x270] sm:$0xff] }
 0x1a6   :  { %10261 = vmatprep.mubr.msk.f32.mxu0 %vm284_vm0, %v5381_v30  ;;  %v8577_v30 = vld [vmem:[%s14653_s0 + $0x1e1] sm:$0xff]  ;;  %v5396_v22 = vmax.f32 %v8576_v21, 0.0  ;;  %v2322_v21 = vmax.f32 %v8071_v13, 0.0  ;;  %v8605_v13 = vld [vmem:[%s14653_s0 + $0x331] sm:$0xff] }
 0x1a8   :  { %9862 = vmatmul.mubr.msk.f32.gmra.mrb[16].mxu1 %vm284_vm0, %v2293_v48  ;;  %v5397_v48 = vmax.f32 %v8577_v30, 0.0 }
 0x1a9   :  { %10262 = vmatmul.mubr.msk.f32.gmra.mrb[16].mxu0 %vm284_vm0, %v5382_v14  ;;  %9864 = vmatprep.mubr.msk.f32.mxu1 %vm284_vm0, %v2294_v23  ;;  %v8578_v14 = vld [vmem:[%s14653_s0 + $0x1e9] sm:$0xff]  ;;  %v8059_v23 = vld [vmem:[%s14653_s0 + $0x1e0] sm:$0xff] }
 0x1aa   :  { %10264 = vmatprep.mubr.msk.f32.mxu0 %vm284_vm0, %v5383_v35  ;;  %v5398_v2 = vmax.f32 %v8578_v14, 0.0  ;;  %v2310_v35 = vmax.f32 %v8059_v23, 0.0 }
 0x1ac   :  { %9865 = vmatmul.mubr.msk.f32.gmra.mrb[18].mxu1 %vm284_vm0, %v2295_v0  ;;  %v2311_v0 = vmax.f32 %v8060_v6, 0.0  ;;  %v8595_v6 = vld [vmem:[%s14653_s0 + $0x2b9] sm:$0xff] }
 0x1ad   :  { %10265 = vmatmul.mubr.msk.f32.gmra.mrb[18].mxu0 %vm284_vm0, %v5384_v46  ;;  %9867 = vmatprep.mubr.msk.f32.mxu1 %vm284_vm0, %v2296_v62  ;;  %v5400_v46 = vmax.f32 %v8580_v44, 0.0 }
 0x1ae   :  { %10267 = vmatprep.mubr.msk.f32.mxu0 %vm284_vm0, %v5385_v29  ;;  %v5401_v29 = vmax.f32 %v8581_v18, 0.0  ;;  %v8076_v18 = vld [vmem:[%s14653_s0 + $0x2a8] sm:$0xff] }
 0x1b0   :  { %9868 = vmatmul.mubr.msk.f32.gmra.mrb[20].mxu1 %vm284_vm0, %v2297_v36  ;;  %v2313_v36 = vmax.f32 %v8062_v63, 0.0  ;;  %v6980_v63 = vld [vmem:[%s14654_s4] sm:$0xff] }
 0x1b1   :  { %10268 = vmatmul.mubr.msk.f32.gmra.mrb[20].mxu0 %vm284_vm0, %v5386_v27  ;;  %9870 = vmatprep.mubr.msk.f32.mxu1 %vm284_vm0, %v2298_v55  ;;  %v5402_v27 = vmax.f32 %v8582_v50, 0.0  ;;  %v2314_v55 = vmax.f32 %v8063_v25, 0.0  ;;  %v8597_v50 = vld [vmem:[%s14653_s0 + $0x2d1] sm:$0xff] }
 0x1b2   :  { %10270 = vmatprep.mubr.msk.f32.mxu0 %vm284_vm0, %v5387_v24  ;;  %v5403_v24 = vmax.f32 %v8583_v54, 0.0  ;;  %v2327_v54 = vmax.f32 %v8076_v18, 0.0 }
 0x1b4   :  { %9871 = vmatmul.mubr.msk.f32.gmra.mrb[22].mxu1 %vm284_vm0, %v2299_v28  ;;  %v2315_v28 = vmax.f32 %v8064_v8, 0.0  ;;  %v5417_v8 = vmax.f32 %v8597_v50, 0.0  ;;  %v8684_v50 = vld [vmem:[%s14653_s0 + $0x9a] sm:$0xff] }
 0x1b5   :  { %10271 = vmatmul.mubr.msk.f32.gmra.mrb[22].mxu0 %vm284_vm0, %v5388_v16  ;;  %9873 = vmatprep.mubr.msk.f32.mxu1 %vm284_vm0, %v2300_v60  ;;  %v5404_v16 = vmax.f32 %v8584_v39, 0.0  ;;  %v2316_v60 = vmax.f32 %v8065_v52, 0.0  ;;  %v8079_v39 = vld [vmem:[%s14653_s0 + $0x2d0] sm:$0xff] }
 0x1b6   :  { %10273 = vmatprep.mubr.msk.f32.mxu0 %vm284_vm0, %v5389_v1  ;;  %v5405_v1 = vmax.f32 %v8585_v53, 0.0  ;;  %v8599_v52 = vld [vmem:[%s14653_s0 + $0x2e9] sm:$0xff] }
 0x1b8   :  { %9874 = vmatmul.mubr.msk.f32.gmra.mrb[24].mxu1 %vm284_vm0, %v2301_v9  ;;  %v2317_v9 = vmax.f32 %v8066_v40, 0.0  ;;  %v5419_v40 = vmax.f32 %v8599_v52, 0.0  ;;  %v8689_v52 = vld [vmem:[%s14653_s0 + $0xda] sm:$0xff] }
 0x1b9   :  { %10274 = vmatmul.mubr.msk.f32.gmra.mrb[24].mxu0 %vm284_vm0, %v5390_v34  ;;  %9876 = vmatprep.mubr.msk.f32.mxu1 %vm284_vm0, %v2302_v47  ;;  %v5406_v34 = vmax.f32 %v8586_v43, 0.0  ;;  %v2318_v47 = vmax.f32 %v8067_v42, 0.0  ;;  %v8081_v43 = vld [vmem:[%s14653_s0 + $0x2e8] sm:$0xff] }
 0x1ba   :  { %10276 = vmatprep.mubr.msk.f32.mxu0 %vm284_vm0, %v5391_v59  ;;  %v5407_v59 = vmax.f32 %v8587_v51, 0.0  ;;  %v8601_v42 = vld [vmem:[%s14653_s0 + $0x301] sm:$0xff] }
 0x1bc   :  { %9877 = vmatmul.mubr.msk.f32.gmra.mrb[26].mxu1 %vm284_vm0, %v2303_v3  ;;  %v2319_v3 = vmax.f32 %v8068_v12, 0.0  ;;  %v5421_v12 = vmax.f32 %v8601_v42, 0.0  ;;  %v8693_v42 = vld [vmem:[%s14653_s0 + $0x10a] sm:$0xff] }
 0x1bd   :  { %10277 = vmatmul.mubr.msk.f32.gmra.mrb[26].mxu0 %vm284_vm0, %v5392_v26  ;;  %9879 = vmatprep.mubr.msk.f32.mxu1 %vm284_vm0, %v2304_v5  ;;  %v5408_v26 = vmax.f32 %v8588_v17, 0.0  ;;  %v2320_v5 = vmax.f32 %v8069_v61, 0.0  ;;  %v8083_v17 = vld [vmem:[%s14653_s0 + $0x300] sm:$0xff] }
 0x1be   :  { %10279 = vmatprep.mubr.msk.f32.mxu0 %vm284_vm0, %v5393_v11  ;;  %v5409_v11 = vmax.f32 %v8589_v20, 0.0  ;;  %v8603_v61 = vld [vmem:[%s14653_s0 + $0x319] sm:$0xff] }
 0x1c0   :  { %9880 = vmatmul.mubr.msk.f32.gmra.mrb[28].mxu1 %vm284_vm0, %v2305_v49  ;;  %v8591_v49 = vld [vmem:[%s14653_s0 + $0x289] sm:$0xff] }
 0x1c1   :  { %10280 = vmatmul.mubr.msk.f32.gmra.mrb[28].mxu0 %vm284_vm0, %v5394_v19  ;;  %9882 = vmatprep.mubr.msk.f32.mxu1 %vm284_vm0, %v4621_v45  ;;  %v2309_v45 = vmax.f32 %v8058_v15, 0.0  ;;  %v2321_v19 = vmax.f32 %v8070_v31, 0.0  ;;  %v5411_v30 = vmax.f32 %v8591_v49, 0.0  ;;  %v8593_v15 = vld [vmem:[%s14653_s0 + $0x2a1] sm:$0xff]  ;;  %v5423_v31 = vmax.f32 %v8603_v61, 0.0 }
 0x1c2   :  { %10282 = vmatprep.mubr.msk.f32.mxu0 %vm284_vm0, %v5395_v10  ;;  %v5410_v10 = vmax.f32 %v8590_v38, 0.0  ;;  %v8085_v38 = vld [vmem:[%s14653_s0 + $0x318] sm:$0xff] }
 0x1c4   :  { %9883 = vmatmul.mubr.msk.f32.gmra.mrb[30].mxu1 %vm284_vm0, %v4622_v56  ;;  %v8061_v56 = vld [vmem:[%s14653_s0 + $0x1f8] sm:$0xff] }
 0x1c5   :  { %10283 = vmatmul.mubr.msk.f32.gmra.mrb[30].mxu0 %vm284_vm0, %v5396_v22  ;;  %9885 = vmatprep.mubr.msk.f32.mxu1 %vm284_vm0, %v2308_v32  ;;  %v2312_v62 = vmax.f32 %v8061_v56, 0.0  ;;  %v8592_v22 = vld [vmem:[%s14653_s0 + $0x291] sm:$0xff]  ;;  %v8073_v32 = vld [vmem:[%s14653_s0 + $0x288] sm:$0xff] }
 0x1c6   :  { %10285 = vmatprep.mubr.msk.f32.mxu0 %vm284_vm0, %v5397_v48  ;;  %v2323_v48 = vmax.f32 %v8072_v37, 0.0  ;;  %v5412_v14 = vmax.f32 %v8592_v22, 0.0  ;;  %v2324_v23 = vmax.f32 %v8073_v32, 0.0  ;;  %v5425_v37 = vmax.f32 %v8605_v13, 0.0  ;;  %v8607_v22 = vld [vmem:[%s14653_s0 + $0x349] sm:$0xff] }
 0x1c8   :  { %9886 = vmatmul.mubr.msk.f32.gmra.mrb[32].mxu1 %vm284_vm0, %v2309_v45  ;;  %v5413_v45 = vmax.f32 %v8593_v15, 0.0 }
 0x1c9   :  { %10286 = vmatmul.mubr.msk.f32.gmra.mrb[32].mxu0 %vm284_vm0, %v5398_v2  ;;  %9888 = vmatprep.mubr.msk.f32.mxu1 %vm284_vm0, %v2310_v35  ;;  %v8594_v2 = vld [vmem:[%s14653_s0 + $0x2a9] sm:$0xff]  ;;  %v8075_v35 = vld [vmem:[%s14653_s0 + $0x2a0] sm:$0xff] }
 0x1ca   :  { %10288 = vmatprep.mubr.msk.f32.mxu0 %vm284_vm0, %v5399_v7  ;;  %v2325_v7 = vmax.f32 %v8074_v58, 0.0  ;;  %v5414_v44 = vmax.f32 %v8594_v2, 0.0  ;;  %v2326_v56 = vmax.f32 %v8075_v35, 0.0  ;;  %v8676_v2 = vld [vmem:[%s14653_s0 + $0x3a] sm:$0xff]  ;;  %v8677_v35 = vld [vmem:[%s14653_s0 + $0x4a] sm:$0xff] }
 0x1cb   :  { %v6138_v41 = vmax.f32 %v8676_v2, 0.0  ;;  %v8707_v2 = vld [vmem:[%s14653_s0 + $0x1e2] sm:$0xff] }
 0x1cc   :  { %9889 = vmatmul.mubr.msk.f32.gmra.mrb[34].mxu1 %vm284_vm0, %v2311_v0  ;;  %v8596_v0 = vld [vmem:[%s14653_s0 + $0x2c1] sm:$0xff] }
 0x1cd   :  { %10289 = vmatmul.mubr.msk.f32.gmra.mrb[34].mxu0 %vm284_vm0, %v5400_v46  ;;  %9891 = vmatprep.mubr.msk.f32.mxu1 %vm284_vm0, %v2312_v62  ;;  %v5415_v46 = vmax.f32 %v8595_v6, 0.0  ;;  %v8077_v62 = vld [vmem:[%s14653_s0 + $0x2b8] sm:$0xff] }
 0x1ce   :  { %10291 = vmatprep.mubr.msk.f32.mxu0 %vm284_vm0, %v5401_v29  ;;  %v6981_v29 = vld [vmem:[%s14654_s4 + $0x8] sm:$0xff]  ;;  %v8678_v6 = vld [vmem:[%s14653_s0 + $0x52] sm:$0xff] }
 0x1cf   :  { %v10573_v25 = vpack.c.bf16 %v6981_v29, %v6980_v63 }
 0x1d0   :  { %9892 = vmatmul.mubr.msk.f32.gmra.mrb[36].mxu1 %vm284_vm0, %v2313_v36  ;;  %v5416_v36 = vmax.f32 %v8596_v0, 0.0 }
 0x1d1   :  { %10292 = vmatmul.mubr.msk.f32.gmra.mrb[36].mxu0 %vm284_vm0, %v5402_v27  ;;  %9894 = vmatprep.mubr.msk.f32.mxu1 %vm284_vm0, %v2314_v55  ;;  %v2328_v27 = vmax.f32 %v8077_v62, 0.0  ;;  %v8078_v55 = vld [vmem:[%s14653_s0 + $0x2c0] sm:$0xff]  ;;  %v8683_v62 = vld [vmem:[%s14653_s0 + $0x92] sm:$0xff] }
 0x1d2   :  { %10294 = vmatprep.mubr.msk.f32.mxu0 %vm284_vm0, %v5403_v24  ;;  %v8598_v24 = vld [vmem:[%s14653_s0 + $0x2d9] sm:$0xff]  ;;  %10574 = vmatprep.subr.bf16.mxu1 %v10573_v25  ;;  %v2329_v53 = vmax.f32 %v8078_v55, 0.0  ;;  %v6145_v29 = vmax.f32 %v8683_v62, 0.0  ;;  %v8687_v55 = vld [vmem:[%s14653_s0 + $0xc2] sm:$0xff] }
 0x1d3   :  { %10576 = vmatpush3.bf16.msra.mxu1 %v10573_v25  ;;  %v8685_v25 = vld [vmem:[%s14653_s0 + $0xaa] sm:$0xff] }
 0x1d4   :  { %9895 = vmatmul.mubr.msk.f32.gmra.mrb[38].mxu1 %vm284_vm0, %v2315_v28  ;;  %v5418_v28 = vmax.f32 %v8598_v24, 0.0  ;;  %v6149_v24 = vmax.f32 %v8687_v55, 0.0 }
 0x1d5   :  { %10295 = vmatmul.mubr.msk.f32.gmra.mrb[38].mxu0 %vm284_vm0, %v5404_v16  ;;  %9897 = vmatprep.mubr.msk.f32.mxu1 %vm284_vm0, %v2316_v60  ;;  %v2330_v16 = vmax.f32 %v8079_v39, 0.0  ;;  %v8080_v60 = vld [vmem:[%s14653_s0 + $0x2d8] sm:$0xff]  ;;  %v8688_v39 = vld [vmem:[%s14653_s0 + $0xca] sm:$0xff] }
 0x1d6   :  { %10297 = vmatprep.mubr.msk.f32.mxu0 %vm284_vm0, %v5405_v1  ;;  %v8600_v1 = vld [vmem:[%s14653_s0 + $0x2f1] sm:$0xff]  ;;  %v2331_v51 = vmax.f32 %v8080_v60, 0.0 }
 0x1d7   :  { %v8691_v60 = vld [vmem:[%s14653_s0 + $0xf2] sm:$0xff] }
 0x1d8   :  { %9898 = vmatmul.mubr.msk.f32.gmra.mrb[40].mxu1 %vm284_vm0, %v2317_v9  ;;  %v5420_v9 = vmax.f32 %v8600_v1, 0.0  ;;  %v6153_v1 = vmax.f32 %v8691_v60, 0.0  ;;  %v8721_v60 = vld [vmem:[%s14653_s0 + $0x28a] sm:$0xff] }
 0x1d9   :  { %10298 = vmatmul.mubr.msk.f32.gmra.mrb[40].mxu0 %vm284_vm0, %v5406_v34  ;;  %9900 = vmatprep.mubr.msk.f32.mxu1 %vm284_vm0, %v2318_v47  ;;  %v2332_v34 = vmax.f32 %v8081_v43, 0.0  ;;  %v8082_v47 = vld [vmem:[%s14653_s0 + $0x2f0] sm:$0xff]  ;;  %v8692_v43 = vld [vmem:[%s14653_s0 + $0xfa] sm:$0xff] }
 0x1da   :  { %10300 = vmatprep.mubr.msk.f32.mxu0 %vm284_vm0, %v5407_v59  ;;  %v8602_v59 = vld [vmem:[%s14653_s0 + $0x309] sm:$0xff]  ;;  %v2333_v20 = vmax.f32 %v8082_v47, 0.0 }
 0x1dc   :  { %9901 = vmatmul.mubr.msk.f32.gmra.mrb[42].mxu1 %vm284_vm0, %v2319_v3  ;;  %v5422_v3 = vmax.f32 %v8602_v59, 0.0  ;;  %v8694_v59 = vld [vmem:[%s14653_s0 + $0x112] sm:$0xff] }
 0x1dd   :  { %10301 = vmatmul.mubr.msk.f32.gmra.mrb[42].mxu0 %vm284_vm0, %v5408_v26  ;;  %9903 = vmatprep.mubr.msk.f32.mxu1 %vm284_vm0, %v2320_v5  ;;  %v2334_v26 = vmax.f32 %v8083_v17, 0.0  ;;  %v8084_v5 = vld [vmem:[%s14653_s0 + $0x308] sm:$0xff]  ;;  %v6156_v61 = vmax.f32 %v8694_v59, 0.0 }
 0x1de   :  { %10303 = vmatprep.mubr.msk.f32.mxu0 %vm284_vm0, %v5409_v11  ;;  %v8604_v11 = vld [vmem:[%s14653_s0 + $0x321] sm:$0xff]  ;;  %v2335_v49 = vmax.f32 %v8084_v5, 0.0  ;;  %v8724_v59 = vld [vmem:[%s14653_s0 + $0x2aa] sm:$0xff] }
 0x1df   :  { %v8695_v17 = vld [vmem:[%s14653_s0 + $0x122] sm:$0xff] }
 0x1e0   :  { %9904 = vmatmul.mubr.msk.f32.gmra.mrb[44].mxu1 %vm284_vm0, %v2321_v19  ;;  %v5424_v19 = vmax.f32 %v8604_v11, 0.0  ;;  %v8698_v11 = vld [vmem:[%s14653_s0 + $0x142] sm:$0xff] }
 0x1e1   :  { %10304 = vmatmul.mubr.msk.f32.gmra.mrb[44].mxu0 %vm284_vm0, %v5410_v10  ;;  %9906 = vmatprep.mubr.msk.f32.mxu1 %vm284_vm0, %v2322_v21  ;;  %v2336_v10 = vmax.f32 %v8085_v38, 0.0  ;;  %v8086_v21 = vld [vmem:[%s14653_s0 + $0x320] sm:$0xff]  ;;  %v8699_v38 = vld [vmem:[%s14653_s0 + $0x152] sm:$0xff]  ;;  %v6160_v13 = vmax.f32 %v8698_v11, 0.0 }
 0x1e2   :  { %10306 = vmatprep.mubr.msk.f32.mxu0 %vm284_vm0, %v5411_v30  ;;  %v8606_v30 = vld [vmem:[%s14653_s0 + $0x339] sm:$0xff]  ;;  %v2337_v32 = vmax.f32 %v8086_v21, 0.0 }
 0x1e3   :  { %v5426_v15 = vmax.f32 %v8606_v30, 0.0  ;;  %v8702_v30 = vld [vmem:[%s14653_s0 + $0x172] sm:$0xff] }
 0x1e4   :  { %9907 = vmatmul.mubr.msk.f32.gmra.mrb[46].mxu1 %vm284_vm0, %v2323_v48  ;;  %v5427_v48 = vmax.f32 %v8607_v22, 0.0  ;;  %v8703_v22 = vld [vmem:[%s14653_s0 + $0x182] sm:$0xff]  ;;  %v8727_v11 = vld [vmem:[%s14653_s0 + $0x2d2] sm:$0xff] }
 0x1e5   :  { %10307 = vmatmul.mubr.msk.f32.gmra.mrb[46].mxu0 %vm284_vm0, %v5412_v14  ;;  %9909 = vmatprep.mubr.msk.f32.mxu1 %vm284_vm0, %v2324_v23  ;;  %v8608_v14 = vld [vmem:[%s14653_s0 + $0x351] sm:$0xff] }
 0x1e6   :  { %10309 = vmatprep.mubr.msk.f32.mxu0 %vm284_vm0, %v5413_v45  ;;  %v8675_v23 = vld [vmem:[%s14653_s0 + $0x32] sm:$0xff]  ;;  %v5428_v58 = vmax.f32 %v8608_v14, 0.0  ;;  %v8705_v14 = vld [vmem:[%s14653_s0 + $0x19a] sm:$0xff] }
 0x1e7   :  { %v6137_v45 = vmax.f32 %v8675_v23, 0.0 }
 0x1e8   :  { %9910 = vmatmul.mubr.msk.f32.gmra.mrb[48].mxu1 %vm284_vm0, %v2325_v7  ;;  %v8679_v7 = vld [vmem:[%s14653_s0 + $0x62] sm:$0xff] }
 0x1e9   :  { %10310 = vmatmul.mubr.msk.f32.gmra.mrb[48].mxu0 %vm284_vm0, %v5414_v44  ;;  %9912 = vmatprep.mubr.msk.f32.mxu1 %vm284_vm0, %v2326_v56  ;;  %v6140_v44 = vmax.f32 %v8678_v6, 0.0  ;;  %v6141_v33 = vmax.f32 %v8679_v7, 0.0  ;;  %v8681_v56 = vld [vmem:[%s14653_s0 + $0x7a] sm:$0xff] }
 0x1ea   :  { %10312 = vmatprep.mubr.msk.f32.mxu0 %vm284_vm0, %v5415_v46  ;;  %v6143_v0 = vmax.f32 %v8681_v56, 0.0  ;;  %v8682_v46 = vld [vmem:[%s14653_s0 + $0x82] sm:$0xff]  ;;  %v8709_v6 = vld [vmem:[%s14653_s0 + $0x1fa] sm:$0xff] }
 0x1eb   :  { %v6144_v63 = vmax.f32 %v8682_v46, 0.0  ;;  %v8713_v46 = vld [vmem:[%s14653_s0 + $0x22a] sm:$0xff] }
 0x1ec   :  { %9913 = vmatmul.mubr.msk.f32.gmra.mrb[50].mxu1 %vm284_vm0, %v2327_v54  ;;  %v6146_v54 = vmax.f32 %v8684_v50, 0.0  ;;  %v8715_v50 = vld [vmem:[%s14653_s0 + $0x242] sm:$0xff] }
 0x1ed   :  { %10313 = vmatmul.mubr.msk.f32.gmra.mrb[50].mxu0 %vm284_vm0, %v5416_v36  ;;  %9915 = vmatprep.mubr.msk.f32.mxu1 %vm284_vm0, %v2328_v27  ;;  %v6147_v36 = vmax.f32 %v8685_v25, 0.0  ;;  %v8686_v27 = vld [vmem:[%s14653_s0 + $0xb2] sm:$0xff] }
 0x1ee   :  { %10315 = vmatprep.mubr.msk.f32.mxu0 %vm284_vm0, %v5417_v8  ;;  %v6148_v8 = vmax.f32 %v8686_v27, 0.0  ;;  %v8717_v27 = vld [vmem:[%s14653_s0 + $0x25a] sm:$0xff] }
 0x1f0   :  { %9916 = vmatmul.mubr.msk.f32.gmra.mrb[52].mxu1 %vm284_vm0, %v2329_v53  ;;  %v6150_v53 = vmax.f32 %v8688_v39, 0.0  ;;  %v8719_v39 = vld [vmem:[%s14653_s0 + $0x272] sm:$0xff] }
 0x1f1   :  { %10316 = vmatmul.mubr.msk.f32.gmra.mrb[52].mxu0 %vm284_vm0, %v5418_v28  ;;  %9918 = vmatprep.mubr.msk.f32.mxu1 %vm284_vm0, %v2330_v16  ;;  %v6151_v28 = vmax.f32 %v8689_v52, 0.0  ;;  %v8690_v16 = vld [vmem:[%s14653_s0 + $0xe2] sm:$0xff] }
 0x1f2   :  { %10318 = vmatprep.mubr.msk.f32.mxu0 %vm284_vm0, %v5419_v40  ;;  %v6152_v40 = vmax.f32 %v8690_v16, 0.0 }
 0x1f4   :  { %9919 = vmatmul.mubr.msk.f32.gmra.mrb[54].mxu1 %vm284_vm0, %v2331_v51  ;;  %v6982_v51 = vld [vmem:[%s14654_s4 + $0x10] sm:$0xff] }
 0x1f5   :  { %10319 = vmatmul.mubr.msk.f32.gmra.mrb[54].mxu0 %vm284_vm0, %v5420_v9  ;;  %9921 = vmatprep.mubr.msk.f32.mxu1 %vm284_vm0, %v2332_v34  ;;  %v6983_v9 = vld [vmem:[%s14654_s4 + $0x18] sm:$0xff]  ;;  %v6154_v34 = vmax.f32 %v8692_v43, 0.0  ;;  %v6183_v43 = vmax.f32 %v8721_v60, 0.0 }
 0x1f6   :  { %10321 = vmatprep.mubr.msk.f32.mxu0 %vm284_vm0, %v5421_v12  ;;  %v10577_v47 = vpack.c.bf16 %v6983_v9, %v6982_v51  ;;  %v6155_v12 = vmax.f32 %v8693_v42, 0.0  ;;  %v8722_v42 = vld [vmem:[%s14653_s0 + $0x292] sm:$0xff]  ;;  %v8723_v9 = vld [vmem:[%s14653_s0 + $0x2a2] sm:$0xff] }
 0x1f8   :  { %9922 = vmatmul.mubr.msk.f32.gmra.mrb[56].mxu1 %vm284_vm0, %v2333_v20  ;;  %10578 = vmatprep.subr.bf16.mxu1 %v10577_v47  ;;  %v6157_v20 = vmax.f32 %v8695_v17, 0.0 }
 0x1f9   :  { %10322 = vmatmul.mubr.msk.f32.gmra.mrb[56].mxu0 %vm284_vm0, %v5422_v3  ;;  %9924 = vmatprep.mubr.msk.f32.mxu1 %vm284_vm0, %v2334_v26  ;;  %v8696_v3 = vld [vmem:[%s14653_s0 + $0x12a] sm:$0xff]  ;;  %v8697_v26 = vld [vmem:[%s14653_s0 + $0x13a] sm:$0xff] }
 0x1fa   :  { %10324 = vmatprep.mubr.msk.f32.mxu0 %vm284_vm0, %v5423_v31  ;;  %10580 = vmatpush3.bf16.msra.mxu1 %v10577_v47  ;;  %v6158_v5 = vmax.f32 %v8696_v3, 0.0  ;;  %v6159_v31 = vmax.f32 %v8697_v26, 0.0  ;;  %v6184_v47 = vmax.f32 %v8722_v42, 0.0  ;;  %v6186_v3 = vmax.f32 %v8724_v59, 0.0 }
 0x1fc   :  { %9925 = vmatmul.mubr.msk.f32.gmra.mrb[58].mxu1 %vm284_vm0, %v2335_v49  ;;  %v6161_v49 = vmax.f32 %v8699_v38, 0.0 }
 0x1fd   :  { %10325 = vmatmul.mubr.msk.f32.gmra.mrb[58].mxu0 %vm284_vm0, %v5424_v19  ;;  %9927 = vmatprep.mubr.msk.f32.mxu1 %vm284_vm0, %v2336_v10  ;;  %v8700_v19 = vld [vmem:[%s14653_s0 + $0x15a] sm:$0xff]  ;;  %v8701_v10 = vld [vmem:[%s14653_s0 + $0x16a] sm:$0xff] }
 0x1fe   :  { %10327 = vmatprep.mubr.msk.f32.mxu0 %vm284_vm0, %v5425_v37  ;;  %v6162_v21 = vmax.f32 %v8700_v19, 0.0  ;;  %v6163_v37 = vmax.f32 %v8701_v10, 0.0  ;;  %v8728_v19 = vld [vmem:[%s14653_s0 + $0x2da] sm:$0xff] }
 0x200   :  { %9928 = vmatmul.mubr.msk.f32.gmra.mrb[60].mxu1 %vm284_vm0, %v2337_v32  ;;  %v6164_v32 = vmax.f32 %v8702_v30, 0.0  ;;  %v6190_v30 = vmax.f32 %v8728_v19, 0.0 }
 0x201   :  { %10328 = vmatmul.mubr.msk.f32.gmra.mrb[60].mxu0 %vm284_vm0, %v5426_v15  ;;  %9930 = vmatprep.mubr.msk.f32.mxu1 %vm284_vm0, %v4653_v57  ;;  %v6139_v57 = vmax.f32 %v8677_v35, 0.0  ;;  %v6165_v15 = vmax.f32 %v8703_v22, 0.0 }
 0x202   :  { %10330 = vmatprep.mubr.msk.f32.mxu0 %vm284_vm0, %v5427_v48  ;;  %v8704_v48 = vld [vmem:[%s14653_s0 + $0x18a] sm:$0xff] }
 0x203   :  { %v6166_v23 = vmax.f32 %v8704_v48, 0.0  ;;  %v8731_v48 = vld [vmem:[%s14653_s0 + $0x302] sm:$0xff] }
 0x204   :  { %9931 = vmatmul.mubr.msk.f32.gmra.mrb[62].mxu1 %vm284_vm0, %v4654_v4  ;;  %v8680_v4 = vld [vmem:[%s14653_s0 + $0x6a] sm:$0xff] }
 0x205   :  { %10331 = vmatmul.mubr.msk.f32.gmra.mrb[62].mxu0 %vm284_vm0, %v5428_v58  ;;  %v6142_v18 = vmax.f32 %v8680_v4, 0.0  ;;  %v6167_v58 = vmax.f32 %v8705_v14, 0.0  ;;  %v8711_v4 = vld [vmem:[%s14653_s0 + $0x212] sm:$0xff] }
 0x206   :  { %10337 = vmatprep.mubr.msk.f32.mxu0 %vm284_vm0, %v6137_v45  ;;  %v8706_v45 = vld [vmem:[%s14653_s0 + $0x1a2] sm:$0xff] }
 0x207   :  { %v6168_v35 = vmax.f32 %v8706_v45, 0.0  ;;  %v8732_v45 = vld [vmem:[%s14653_s0 + $0x30a] sm:$0xff] }
 0x209   :  { %10338 = vmatmul.mubr.msk.f32.vlgmr.msra.gmra.mrb[0].mxu0 %vm284_vm0, %v6138_v41  ;;  %v6169_v41 = vmax.f32 %v8707_v2, 0.0 }
 0x20a   :  { %10340 = vmatprep.mubr.msk.f32.mxu0 %vm284_vm0, %v6139_v57  ;;  %v8708_v57 = vld [vmem:[%s14653_s0 + $0x1ea] sm:$0xff] }
 0x20b   :  { %v6170_v7 = vmax.f32 %v8708_v57, 0.0  ;;  %v6194_v57 = vmax.f32 %v8732_v45, 0.0 }
 0x20d   :  { %10341 = vmatmul.mubr.msk.f32.gmra.mrb[2].mxu0 %vm284_vm0, %v6140_v44  ;;  %v6171_v44 = vmax.f32 %v8709_v6, 0.0 }
 0x20e   :  { %10343 = vmatprep.mubr.msk.f32.mxu0 %vm284_vm0, %v6141_v33  ;;  %v8710_v33 = vld [vmem:[%s14653_s0 + $0x202] sm:$0xff] }
 0x20f   :  { %v6172_v56 = vmax.f32 %v8710_v33, 0.0  ;;  %v8735_v33 = vld [vmem:[%s14653_s0 + $0x332] sm:$0xff] }
 0x211   :  { %10344 = vmatmul.mubr.msk.f32.gmra.mrb[4].mxu0 %vm284_vm0, %v6142_v18  ;;  %v6173_v18 = vmax.f32 %v8711_v4, 0.0 }
 0x212   :  { %10346 = vmatprep.mubr.msk.f32.mxu0 %vm284_vm0, %v6143_v0  ;;  %v8712_v0 = vld [vmem:[%s14653_s0 + $0x21a] sm:$0xff] }
 0x213   :  { %v6174_v62 = vmax.f32 %v8712_v0, 0.0  ;;  %v8736_v0 = vld [vmem:[%s14653_s0 + $0x33a] sm:$0xff] }
 0x215   :  { %10347 = vmatmul.mubr.msk.f32.gmra.mrb[6].mxu0 %vm284_vm0, %v6144_v63  ;;  %v6175_v63 = vmax.f32 %v8713_v46, 0.0 }
 0x216   :  { %10349 = vmatprep.mubr.msk.f32.mxu0 %vm284_vm0, %v6145_v29  ;;  %v8714_v29 = vld [vmem:[%s14653_s0 + $0x232] sm:$0xff] }
 0x217   :  { %v6176_v25 = vmax.f32 %v8714_v29, 0.0  ;;  %v6198_v29 = vmax.f32 %v8736_v0, 0.0 }
 0x219   :  { %10350 = vmatmul.mubr.msk.f32.gmra.mrb[8].mxu0 %vm284_vm0, %v6146_v54  ;;  %v6177_v54 = vmax.f32 %v8715_v50, 0.0 }
 0x21a   :  { %10352 = vmatprep.mubr.msk.f32.mxu0 %vm284_vm0, %v6147_v36  ;;  %v8716_v36 = vld [vmem:[%s14653_s0 + $0x24a] sm:$0xff] }
 0x21b   :  { %v6178_v55 = vmax.f32 %v8716_v36, 0.0 }
 0x21d   :  { %10353 = vmatmul.mubr.msk.f32.gmra.mrb[10].mxu0 %vm284_vm0, %v6148_v8  ;;  %v6179_v8 = vmax.f32 %v8717_v27, 0.0 }
 0x21e   :  { %10355 = vmatprep.mubr.msk.f32.mxu0 %vm284_vm0, %v6149_v24  ;;  %v8718_v24 = vld [vmem:[%s14653_s0 + $0x262] sm:$0xff] }
 0x21f   :  { %v6180_v52 = vmax.f32 %v8718_v24, 0.0 }
 0x221   :  { %10356 = vmatmul.mubr.msk.f32.gmra.mrb[12].mxu0 %vm284_vm0, %v6150_v53  ;;  %v6181_v53 = vmax.f32 %v8719_v39, 0.0 }
 0x222   :  { %10358 = vmatprep.mubr.msk.f32.mxu0 %vm284_vm0, %v6151_v28  ;;  %v8720_v28 = vld [vmem:[%s14653_s0 + $0x27a] sm:$0xff] }
 0x225   :  { %10359 = vmatmul.mubr.msk.f32.gmra.mrb[14].mxu0 %vm284_vm0, %v6152_v40 }
 0x226   :  { %10361 = vmatprep.mubr.msk.f32.mxu0 %vm284_vm0, %v6153_v1  ;;  %v6182_v1 = vmax.f32 %v8720_v28, 0.0 }
 0x229   :  { %10362 = vmatmul.mubr.msk.f32.gmra.mrb[16].mxu0 %vm284_vm0, %v6154_v34 }
 0x22a   :  { %10364 = vmatprep.mubr.msk.f32.mxu0 %vm284_vm0, %v6155_v12  ;;  %v6185_v12 = vmax.f32 %v8723_v9, 0.0 }
 0x22d   :  { %10365 = vmatmul.mubr.msk.f32.gmra.mrb[18].mxu0 %vm284_vm0, %v6156_v61  ;;  %v8725_v61 = vld [vmem:[%s14653_s0 + $0x2ba] sm:$0xff] }
 0x22e   :  { %10367 = vmatprep.mubr.msk.f32.mxu0 %vm284_vm0, %v6157_v20  ;;  %v6187_v26 = vmax.f32 %v8725_v61, 0.0 }
 0x231   :  { %10368 = vmatmul.mubr.msk.f32.gmra.mrb[20].mxu0 %vm284_vm0, %v6158_v5  ;;  %v8726_v5 = vld [vmem:[%s14653_s0 + $0x2c2] sm:$0xff] }
 0x232   :  { %10370 = vmatprep.mubr.msk.f32.mxu0 %vm284_vm0, %v6159_v31 }
 0x235   :  { %10371 = vmatmul.mubr.msk.f32.gmra.mrb[22].mxu0 %vm284_vm0, %v6160_v13  ;;  %v6188_v13 = vmax.f32 %v8726_v5, 0.0 }
 0x236   :  { %10373 = vmatprep.mubr.msk.f32.mxu0 %vm284_vm0, %v6161_v49  ;;  %v6189_v49 = vmax.f32 %v8727_v11, 0.0 }
 0x239   :  { %10374 = vmatmul.mubr.msk.f32.gmra.mrb[24].mxu0 %vm284_vm0, %v6162_v21  ;;  %v8729_v21 = vld [vmem:[%s14653_s0 + $0x2ea] sm:$0xff] }
 0x23a   :  { %10376 = vmatprep.mubr.msk.f32.mxu0 %vm284_vm0, %v6163_v37  ;;  %v6191_v22 = vmax.f32 %v8729_v21, 0.0 }
 0x23d   :  { %10377 = vmatmul.mubr.msk.f32.gmra.mrb[26].mxu0 %vm284_vm0, %v6164_v32  ;;  %v8730_v32 = vld [vmem:[%s14653_s0 + $0x2f2] sm:$0xff] }
 0x23e   :  { %10379 = vmatprep.mubr.msk.f32.mxu0 %vm284_vm0, %v6165_v15 }
 0x241   :  { %10380 = vmatmul.mubr.msk.f32.gmra.mrb[28].mxu0 %vm284_vm0, %v6166_v23  ;;  %v6192_v23 = vmax.f32 %v8730_v32, 0.0 }
 0x242   :  { %10382 = vmatprep.mubr.msk.f32.mxu0 %vm284_vm0, %v6167_v58  ;;  %v6193_v58 = vmax.f32 %v8731_v48, 0.0 }
 0x245   :  { %10383 = vmatmul.mubr.msk.f32.gmra.mrb[30].mxu0 %vm284_vm0, %v6168_v35  ;;  %v8733_v35 = vld [vmem:[%s14653_s0 + $0x31a] sm:$0xff] }
 0x246   :  { %10385 = vmatprep.mubr.msk.f32.mxu0 %vm284_vm0, %v6169_v41  ;;  %v6195_v6 = vmax.f32 %v8733_v35, 0.0 }
 0x249   :  { %10386 = vmatmul.mubr.msk.f32.gmra.mrb[32].mxu0 %vm284_vm0, %v6170_v7  ;;  %v8734_v7 = vld [vmem:[%s14653_s0 + $0x322] sm:$0xff] }
 0x24a   :  { %10388 = vmatprep.mubr.msk.f32.mxu0 %vm284_vm0, %v6171_v44 }
 0x24d   :  { %10389 = vmatmul.mubr.msk.f32.gmra.mrb[34].mxu0 %vm284_vm0, %v6172_v56  ;;  %v6196_v56 = vmax.f32 %v8734_v7, 0.0 }
 0x24e   :  { %10391 = vmatprep.mubr.msk.f32.mxu0 %vm284_vm0, %v6173_v18  ;;  %v6197_v18 = vmax.f32 %v8735_v33, 0.0 }
 0x251   :  { %10392 = vmatmul.mubr.msk.f32.gmra.mrb[36].mxu0 %vm284_vm0, %v6174_v62  ;;  %v8737_v62 = vld [vmem:[%s14653_s0 + $0x34a] sm:$0xff] }
 0x252   :  { %10394 = vmatprep.mubr.msk.f32.mxu0 %vm284_vm0, %v6175_v63  ;;  %v6199_v50 = vmax.f32 %v8737_v62, 0.0 }
 0x255   :  { %10395 = vmatmul.mubr.msk.f32.gmra.mrb[38].mxu0 %vm284_vm0, %v6176_v25  ;;  %v8738_v25 = vld [vmem:[%s14653_s0 + $0x352] sm:$0xff] }
 0x256   :  { %10397 = vmatprep.mubr.msk.f32.mxu0 %vm284_vm0, %v6177_v54  ;;  %v6200_v27 = vmax.f32 %v8738_v25, 0.0 }
 0x259   :  { %10398 = vmatmul.mubr.msk.f32.gmra.mrb[40].mxu0 %vm284_vm0, %v6178_v55 }
 0x25a   :  { %10400 = vmatprep.mubr.msk.f32.mxu0 %vm284_vm0, %v6179_v8 }
 0x25b   :  { %v13735_v16 = vpop.f32.mrb[0].mxu1 }
 0x25c   :  { %v13740_v40 = vpop.f32.mrb[1].mxu1 }
 0x25d   :  { %10401 = vmatmul.mubr.msk.f32.gmra.mrb[42].mxu0 %vm284_vm0, %v6180_v52 }
 0x25e   :  { %10403 = vmatprep.mubr.msk.f32.mxu0 %vm284_vm0, %v6181_v53 }
 0x25f   :  { %v13747_v51 = vpop.f32.mrb[2].mxu1 }
 0x260   :  { %v13752_v34 = vpop.f32.mrb[3].mxu1 }
 0x261   :  { %10404 = vmatmul.mubr.msk.f32.gmra.mrb[44].mxu0 %vm284_vm0, %v6182_v1 }
 0x262   :  { %10406 = vmatprep.mubr.msk.f32.mxu0 %vm284_vm0, %v6183_v43 }
 0x263   :  { %v13759_v17 = vpop.f32.mrb[4].mxu1 }
 0x264   :  { %v13764_v20 = vpop.f32.mrb[5].mxu1 }
 0x265   :  { %10407 = vmatmul.mubr.msk.f32.gmra.mrb[46].mxu0 %vm284_vm0, %v6184_v47 }
 0x266   :  { %10409 = vmatprep.mubr.msk.f32.mxu0 %vm284_vm0, %v6185_v12 }
 0x267   :  { %v13771_v31 = vpop.f32.mrb[6].mxu1 }
 0x268   :  { %v13776_v38 = vpop.f32.mrb[7].mxu1 }
 0x269   :  { %10410 = vmatmul.mubr.msk.f32.gmra.mrb[48].mxu0 %vm284_vm0, %v6186_v3 }
 0x26a   :  { %10412 = vmatprep.mubr.msk.f32.mxu0 %vm284_vm0, %v6187_v26 }
 0x26b   :  { %v13783_v10 = vpop.f32.mrb[8].mxu1 }
 0x26c   :  { %v13788_v37 = vpop.f32.mrb[9].mxu1 }
 0x26d   :  { %10413 = vmatmul.mubr.msk.f32.gmra.mrb[50].mxu0 %vm284_vm0, %v6188_v13 }
 0x26e   :  { %10415 = vmatprep.mubr.msk.f32.mxu0 %vm284_vm0, %v6189_v49 }
 0x26f   :  { %v13795_v15 = vpop.f32.mrb[10].mxu1 }
 0x270   :  { %v13800_v14 = vpop.f32.mrb[11].mxu1 }
 0x271   :  { %10416 = vmatmul.mubr.msk.f32.gmra.mrb[52].mxu0 %vm284_vm0, %v6190_v30 }
 0x272   :  { %10418 = vmatprep.mubr.msk.f32.mxu0 %vm284_vm0, %v6191_v22 }
 0x273   :  { %v13807_v2 = vpop.f32.mrb[12].mxu1 }
 0x274   :  { %v13812_v41 = vpop.f32.mrb[13].mxu1 }
 0x275   :  { %10419 = vmatmul.mubr.msk.f32.gmra.mrb[54].mxu0 %vm284_vm0, %v6192_v23 }
 0x276   :  { %10421 = vmatprep.mubr.msk.f32.mxu0 %vm284_vm0, %v6193_v58 }
 0x277   :  { %v13819_v44 = vpop.f32.mrb[14].mxu1 }
 0x278   :  { %v13824_v4 = vpop.f32.mrb[15].mxu1 }
 0x279   :  { %10422 = vmatmul.mubr.msk.f32.gmra.mrb[56].mxu0 %vm284_vm0, %v6194_v57 }
 0x27a   :  { %10424 = vmatprep.mubr.msk.f32.mxu0 %vm284_vm0, %v6195_v6 }
 0x27b   :  { %v13831_v46 = vpop.f32.mrb[16].mxu1 }
 0x27c   :  { %v13836_v63 = vpop.f32.mrb[17].mxu1 }
 0x27d   :  { %10425 = vmatmul.mubr.msk.f32.gmra.mrb[58].mxu0 %vm284_vm0, %v6196_v56 }
 0x27e   :  { %10427 = vmatprep.mubr.msk.f32.mxu0 %vm284_vm0, %v6197_v18 }
 0x27f   :  { %v13843_v54 = vpop.f32.mrb[18].mxu1 }
 0x280   :  { %v13845_v36 = vpop.f32.mrb[19].mxu1 }
 0x281   :  { %10428 = vmatmul.mubr.msk.f32.gmra.mrb[60].mxu0 %vm284_vm0, %v6198_v29 }
 0x282   :  { %10430 = vmatprep.mubr.msk.f32.mxu0 %vm284_vm0, %v6199_v50 }
 0x283   :  { %v13849_v55 = vpop.f32.mrb[20].mxu1 }
 0x284   :  { %v13851_v8 = vpop.f32.mrb[21].mxu1 }
 0x285   :  { %10431 = vmatmul.mubr.msk.f32.gmra.mrb[62].mxu0 %vm284_vm0, %v6200_v27 }
 0x287   :  { %v13854_v24 = vpop.f32.mrb[22].mxu1 }
 0x288   :  { %v13856_v39 = vpop.f32.mrb[23].mxu1 }
 0x28b   :  { %v13858_v52 = vpop.f32.mrb[24].mxu1 }
 0x28c   :  { %v13860_v53 = vpop.f32.mrb[25].mxu1 }
 0x28f   :  { %v13862_v28 = vpop.f32.mrb[26].mxu1 }
 0x290   :  { %v13864_v60 = vpop.f32.mrb[27].mxu1 }
 0x293   :  { %v13866_v1 = vpop.f32.mrb[28].mxu1 }
 0x294   :  { %v13868_v43 = vpop.f32.mrb[29].mxu1 }
 0x297   :  { %v13870_v42 = vpop.f32.mrb[30].mxu1 }
 0x298   :  { %v13872_v9 = vpop.f32.mrb[31].mxu1 }
 0x29b   :  { %v13874_v47 = vpop.f32.mrb[32].mxu1 }
 0x29c   :  { %v13876_v12 = vpop.f32.mrb[33].mxu1 }
 0x29f   :  { %v13878_v59 = vpop.f32.mrb[34].mxu1 }
 0x2a0   :  { %v13880_v61 = vpop.f32.mrb[35].mxu1 }
 0x2a3   :  { %v13882_v3 = vpop.f32.mrb[36].mxu1 }
 0x2a4   :  { %v13884_v26 = vpop.f32.mrb[37].mxu1 }
 0x2a7   :  { %v13886_v5 = vpop.f32.mrb[38].mxu1 }
 0x2a8   :  { %v13888_v11 = vpop.f32.mrb[39].mxu1 }
 0x2ab   :  { %v13890_v13 = vpop.f32.mrb[40].mxu1 }
 0x2ac   :  { %v13892_v49 = vpop.f32.mrb[41].mxu1 }
 0x2af   :  { %v13894_v19 = vpop.f32.mrb[42].mxu1 }
 0x2b0   :  { %v13896_v21 = vpop.f32.mrb[43].mxu1 }
 0x2b3   :  { %v13898_v30 = vpop.f32.mrb[44].mxu1 }
 0x2b4   :  { %v13900_v22 = vpop.f32.mrb[45].mxu1 }
 0x2b7   :  { %v13902_v32 = vpop.f32.mrb[46].mxu1 }
 0x2b8   :  { %v13904_v48 = vpop.f32.mrb[47].mxu1 }
 0x2bb   :  { %v13906_v23 = vpop.f32.mrb[48].mxu1 }
 0x2bc   :  { %v13908_v58 = vpop.f32.mrb[49].mxu1 }
 0x2bf   :  { %v13910_v45 = vpop.f32.mrb[50].mxu1 }
 0x2c0   :  { %15083 = vst [vmem:[#allocation2_spill] sm:$0xff] %v13910_v45  ;;  %v13912_v35 = vpop.f32.mrb[51].mxu1 }
 0x2c1   :  { %15084 = vst [vmem:[#allocation3_spill] sm:$0xff] %v13912_v35 }
 0x2c3   :  { %v13914_v57 = vpop.f32.mrb[52].mxu1 }
 0x2c4   :  { %15085 = vst [vmem:[#allocation9_spill] sm:$0xff] %v13914_v57  ;;  %v13916_v6 = vpop.f32.mrb[53].mxu1 }
 0x2c5   :  { %15086 = vst [vmem:[#allocation4_spill] sm:$0xff] %v13916_v6 }
 0x2c7   :  { %v13918_v7 = vpop.f32.mrb[54].mxu1 }
 0x2c8   :  { %15087 = vst [vmem:[#allocation10_spill] sm:$0xff] %v13918_v7  ;;  %v13920_v33 = vpop.f32.mrb[55].mxu1 }
 0x2c9   :  { %15088 = vst [vmem:[#allocation5_spill] sm:$0xff] %v13920_v33  ;;  %v13941_v33 = vld [vmem:[%s14655_s3] ss:$0 sm:$0xff] }
 0x2cb   :  { %v13922_v56 = vpop.f32.mrb[56].mxu1 }
 0x2cc   :  { %15089 = vst [vmem:[#allocation6_spill] sm:$0xff] %v13922_v56  ;;  %v13924_v18 = vpop.f32.mrb[57].mxu1 }
 0x2cd   :  { %15090 = vst [vmem:[#allocation7_spill] sm:$0xff] %v13924_v18 }
 0x2cf   :  { %v13926_v0 = vpop.f32.mrb[58].mxu1 }
 0x2d0   :  { %15091 = vst [vmem:[#allocation8_spill] sm:$0xff] %v13926_v0  ;;  %v13928_v62 = vpop.f32.mrb[59].mxu1 }
 0x2d1   :  { %15092 = vst [vmem:[#allocation15_spill] sm:$0xff] %v13928_v62 }
 0x2d3   :  { %v13930_v29 = vpop.f32.mrb[60].mxu1 }
 0x2d4   :  { %15093 = vst [vmem:[#allocation17_spill] sm:$0xff] %v13930_v29  ;;  %v13932_v50 = vpop.f32.mrb[61].mxu1 }
 0x2d5   :  { %15094 = vst [vmem:[#allocation11_spill] sm:$0xff] %v13932_v50 }
 0x2d7   :  { %v13934_v25 = vpop.f32.mrb[62].mxu1 }
 0x2d8   :  { %15095 = vst [vmem:[#allocation19_spill] sm:$0xff] %v13934_v25  ;;  %v13936_v27 = vpop.f32.mrb[63].mxu1 }
 0x2d9   :  { %15096 = vst [vmem:[#allocation12_spill] sm:$0xff] %v13936_v27 }
 0x2dc   :  { %v10339_v6 = vpop.f32.mrb[0].mxu0 }
 0x2dd   :  { %v10581_v18 = vadd.f32 %v10339_v6, %v13735_v16  ;;  %v6462_v56 = vpop.f32.mrb[1].mxu0 }
 0x2de   :  { %v10582_v0 = vadd.f32 %v6462_v56, %v13740_v40 }
 0x2df   :  { %v6853_v62 = vadd.f32 %v10581_v18, %v13941_v33 }
 0x2e0   :  { %v6852_v29 = vadd.f32 %v10582_v0, %v13941_v33  ;;  %v10342_v50 = vpop.f32.mrb[2].mxu0 }
 0x2e1   :  { %v10583_v25 = vadd.f32 %v10342_v50, %v13747_v51  ;;  %v6472_v7 = vpop.f32.mrb[3].mxu0  ;;  %v6917_v35 = vmax.f32 %v6853_v62, 0.0 }
 0x2e2   :  { %v6916_v27 = vmax.f32 %v6852_v29, 0.0  ;;  %v10584_v57 = vadd.f32 %v6472_v7, %v13752_v34 }
 0x2e3   :  { %v6855_v45 = vadd.f32 %v10583_v25, %v13941_v33 }
 0x2e4   :  { %v6854_v16 = vadd.f32 %v10584_v57, %v13941_v33  ;;  %v10345_v6 = vpop.f32.mrb[4].mxu0  ;;  %10441 = vmatprep.mubr.msk.f32.mxu1 %vm6991_vm1, %v6916_v27 }
 0x2e5   :  { %v10585_v40 = vadd.f32 %v10345_v6, %v13759_v17  ;;  %v6482_v56 = vpop.f32.mrb[5].mxu0  ;;  %10442 = vmatmul.mubr.msk.f32.vlgmr.msra.gmra.mrb[64].mxu1 %vm6991_vm1, %v6917_v35  ;;  %v6919_v0 = vmax.f32 %v6855_v45, 0.0 }
 0x2e6   :  { %v6918_v18 = vmax.f32 %v6854_v16, 0.0  ;;  %v10586_v51 = vadd.f32 %v6482_v56, %v13764_v20 }
 0x2e7   :  { %v6857_v29 = vadd.f32 %v10585_v40, %v13941_v33 }
 0x2e8   :  { %v6856_v34 = vadd.f32 %v10586_v51, %v13941_v33  ;;  %v10348_v7 = vpop.f32.mrb[6].mxu0  ;;  %10444 = vmatprep.mubr.msk.f32.mxu1 %vm6991_vm1, %v6918_v18 }
 0x2e9   :  { %v10587_v57 = vadd.f32 %v10348_v7, %v13771_v31  ;;  %v6492_v62 = vpop.f32.mrb[7].mxu0  ;;  %10445 = vmatmul.mubr.msk.f32.gmra.mrb[66].mxu1 %vm6991_vm1, %v6919_v0  ;;  %v6921_v35 = vmax.f32 %v6857_v29, 0.0 }
 0x2ea   :  { %v6920_v17 = vmax.f32 %v6856_v34, 0.0  ;;  %v10588_v50 = vadd.f32 %v6492_v62, %v13776_v38 }
 0x2eb   :  { %v6859_v25 = vadd.f32 %v10587_v57, %v13941_v33 }
 0x2ec   :  { %v6858_v20 = vadd.f32 %v10588_v50, %v13941_v33  ;;  %v10351_v45 = vpop.f32.mrb[8].mxu0  ;;  %10447 = vmatprep.mubr.msk.f32.mxu1 %vm6991_vm1, %v6920_v17 }
 0x2ed   :  { %v10589_v27 = vadd.f32 %v10351_v45, %v13783_v10  ;;  %v6502_v16 = vpop.f32.mrb[9].mxu0  ;;  %10448 = vmatmul.mubr.msk.f32.gmra.mrb[68].mxu1 %vm6991_vm1, %v6921_v35  ;;  %v6923_v40 = vmax.f32 %v6859_v25, 0.0 }
 0x2ee   :  { %v6922_v31 = vmax.f32 %v6858_v20, 0.0  ;;  %v10590_v6 = vadd.f32 %v6502_v16, %v13788_v37 }
 0x2ef   :  { %v6861_v56 = vadd.f32 %v10589_v27, %v13941_v33 }
 0x2f0   :  { %v6860_v38 = vadd.f32 %v10590_v6, %v13941_v33  ;;  %v10354_v18 = vpop.f32.mrb[10].mxu0  ;;  %10450 = vmatprep.mubr.msk.f32.mxu1 %vm6991_vm1, %v6922_v31 }
 0x2f1   :  { %v10591_v51 = vadd.f32 %v10354_v18, %v13795_v15  ;;  %v6512_v0 = vpop.f32.mrb[11].mxu0  ;;  %10451 = vmatmul.mubr.msk.f32.gmra.mrb[70].mxu1 %vm6991_vm1, %v6923_v40  ;;  %v6925_v34 = vmax.f32 %v6861_v56, 0.0 }
 0x2f2   :  { %v6924_v10 = vmax.f32 %v6860_v38, 0.0  ;;  %v10592_v29 = vadd.f32 %v6512_v0, %v13800_v14 }
 0x2f3   :  { %v6863_v7 = vadd.f32 %v10591_v51, %v13941_v33 }
 0x2f4   :  { %v6862_v37 = vadd.f32 %v10592_v29, %v13941_v33  ;;  %v10357_v57 = vpop.f32.mrb[12].mxu0  ;;  %10453 = vmatprep.mubr.msk.f32.mxu1 %vm6991_vm1, %v6924_v10 }
 0x2f5   :  { %v10593_v62 = vadd.f32 %v10357_v57, %v13807_v2  ;;  %v6522_v17 = vpop.f32.mrb[13].mxu0  ;;  %10454 = vmatmul.mubr.msk.f32.gmra.mrb[72].mxu1 %vm6991_vm1, %v6925_v34  ;;  %v6927_v35 = vmax.f32 %v6863_v7, 0.0 }
 0x2f6   :  { %v6926_v15 = vmax.f32 %v6862_v37, 0.0  ;;  %v10594_v50 = vadd.f32 %v6522_v17, %v13812_v41 }
 0x2f7   :  { %v6865_v25 = vadd.f32 %v10593_v62, %v13941_v33 }
 0x2f8   :  { %v6864_v14 = vadd.f32 %v10594_v50, %v13941_v33  ;;  %v10360_v20 = vpop.f32.mrb[14].mxu0  ;;  %10456 = vmatprep.mubr.msk.f32.mxu1 %vm6991_vm1, %v6926_v15 }
 0x2f9   :  { %v10595_v45 = vadd.f32 %v10360_v20, %v13819_v44  ;;  %v6532_v27 = vpop.f32.mrb[15].mxu0  ;;  %10457 = vmatmul.mubr.msk.f32.gmra.mrb[74].mxu1 %vm6991_vm1, %v6927_v35  ;;  %v6929_v31 = vmax.f32 %v6865_v25, 0.0 }
 0x2fa   :  { %v6928_v2 = vmax.f32 %v6864_v14, 0.0  ;;  %v10596_v16 = vadd.f32 %v6532_v27, %v13824_v4 }
 0x2fb   :  { %v6867_v6 = vadd.f32 %v10595_v45, %v13941_v33 }
 0x2fc   :  { %v6866_v41 = vadd.f32 %v10596_v16, %v13941_v33  ;;  %v10363_v40 = vpop.f32.mrb[16].mxu0  ;;  %10459 = vmatprep.mubr.msk.f32.mxu1 %vm6991_vm1, %v6928_v2 }
 0x2fd   :  { %v10597_v56 = vadd.f32 %v10363_v40, %v13831_v46  ;;  %v6542_v38 = vpop.f32.mrb[17].mxu0  ;;  %10460 = vmatmul.mubr.msk.f32.gmra.mrb[76].mxu1 %vm6991_vm1, %v6929_v31  ;;  %v6931_v51 = vmax.f32 %v6867_v6, 0.0 }
 0x2fe   :  { %v6930_v44 = vmax.f32 %v6866_v41, 0.0  ;;  %v10598_v18 = vadd.f32 %v6542_v38, %v13836_v63 }
 0x2ff   :  { %v6869_v0 = vadd.f32 %v10597_v56, %v13941_v33 }
 0x300   :  { %v6868_v4 = vadd.f32 %v10598_v18, %v13941_v33  ;;  %v10366_v10 = vpop.f32.mrb[18].mxu0  ;;  %10462 = vmatprep.mubr.msk.f32.mxu1 %vm6991_vm1, %v6930_v44 }
 0x301   :  { %v10599_v29 = vadd.f32 %v10366_v10, %v13843_v54  ;;  %v6552_v34 = vpop.f32.mrb[19].mxu0  ;;  %10463 = vmatmul.mubr.msk.f32.gmra.mrb[78].mxu1 %vm6991_vm1, %v6931_v51  ;;  %v6933_v37 = vmax.f32 %v6869_v0, 0.0 }
 0x302   :  { %v6932_v46 = vmax.f32 %v6868_v4, 0.0  ;;  %v10600_v7 = vadd.f32 %v6552_v34, %v13845_v36 }
 0x303   :  { %v6871_v57 = vadd.f32 %v10599_v29, %v13941_v33 }
 0x304   :  { %v6870_v63 = vadd.f32 %v10600_v7, %v13941_v33  ;;  %v10369_v62 = vpop.f32.mrb[20].mxu0  ;;  %10465 = vmatprep.mubr.msk.f32.mxu1 %vm6991_vm1, %v6932_v46 }
 0x305   :  { %v10601_v17 = vadd.f32 %v10369_v62, %v13849_v55  ;;  %v6562_v15 = vpop.f32.mrb[21].mxu0  ;;  %10466 = vmatmul.mubr.msk.f32.gmra.mrb[80].mxu1 %vm6991_vm1, %v6933_v37  ;;  %v6935_v35 = vmax.f32 %v6871_v57, 0.0 }
 0x306   :  { %v6934_v54 = vmax.f32 %v6870_v63, 0.0  ;;  %v10602_v50 = vadd.f32 %v6562_v15, %v13851_v8 }
 0x307   :  { %v6873_v25 = vadd.f32 %v10601_v17, %v13941_v33 }
 0x308   :  { %v6872_v36 = vadd.f32 %v10602_v50, %v13941_v33  ;;  %v10372_v14 = vpop.f32.mrb[22].mxu0  ;;  %10468 = vmatprep.mubr.msk.f32.mxu1 %vm6991_vm1, %v6934_v54 }
 0x309   :  { %v10603_v20 = vadd.f32 %v10372_v14, %v13854_v24  ;;  %v6572_v45 = vpop.f32.mrb[23].mxu0  ;;  %10469 = vmatmul.mubr.msk.f32.gmra.mrb[82].mxu1 %vm6991_vm1, %v6935_v35  ;;  %v6937_v2 = vmax.f32 %v6873_v25, 0.0 }
 0x30a   :  { %v6936_v55 = vmax.f32 %v6872_v36, 0.0  ;;  %v10604_v27 = vadd.f32 %v6572_v45, %v13856_v39 }
 0x30b   :  { %v6875_v16 = vadd.f32 %v10603_v20, %v13941_v33 }
 0x30c   :  { %v6874_v8 = vadd.f32 %v10604_v27, %v13941_v33  ;;  %v10375_v31 = vpop.f32.mrb[24].mxu0  ;;  %10471 = vmatprep.mubr.msk.f32.mxu1 %vm6991_vm1, %v6936_v55 }
 0x30d   :  { %v10605_v6 = vadd.f32 %v10375_v31, %v13858_v52  ;;  %v6582_v41 = vpop.f32.mrb[25].mxu0  ;;  %10472 = vmatmul.mubr.msk.f32.gmra.mrb[84].mxu1 %vm6991_vm1, %v6937_v2  ;;  %v6939_v56 = vmax.f32 %v6875_v16, 0.0 }
 0x30e   :  { %v6938_v24 = vmax.f32 %v6874_v8, 0.0  ;;  %v10606_v40 = vadd.f32 %v6582_v41, %v13860_v53 }
 0x30f   :  { %v6877_v38 = vadd.f32 %v10605_v6, %v13941_v33 }
 0x310   :  { %v6876_v39 = vadd.f32 %v10606_v40, %v13941_v33  ;;  %v10378_v44 = vpop.f32.mrb[26].mxu0  ;;  %10474 = vmatprep.mubr.msk.f32.mxu1 %vm6991_vm1, %v6938_v24 }
 0x311   :  { %v10607_v18 = vadd.f32 %v10378_v44, %v13862_v28  ;;  %v6592_v51 = vpop.f32.mrb[27].mxu0  ;;  %10475 = vmatmul.mubr.msk.f32.gmra.mrb[86].mxu1 %vm6991_vm1, %v6939_v56  ;;  %v6941_v4 = vmax.f32 %v6877_v38, 0.0 }
 0x312   :  { %v6940_v52 = vmax.f32 %v6876_v39, 0.0  ;;  %v10608_v0 = vadd.f32 %v6592_v51, %v13864_v60 }
 0x313   :  { %v6879_v10 = vadd.f32 %v10607_v18, %v13941_v33 }
 0x314   :  { %v6878_v53 = vadd.f32 %v10608_v0, %v13941_v33  ;;  %v10381_v29 = vpop.f32.mrb[28].mxu0  ;;  %10477 = vmatprep.mubr.msk.f32.mxu1 %vm6991_vm1, %v6940_v52 }
 0x315   :  { %v10609_v34 = vadd.f32 %v10381_v29, %v13866_v1  ;;  %v6602_v46 = vpop.f32.mrb[29].mxu0  ;;  %10478 = vmatmul.mubr.msk.f32.gmra.mrb[88].mxu1 %vm6991_vm1, %v6941_v4  ;;  %v6943_v37 = vmax.f32 %v6879_v10, 0.0 }
 0x316   :  { %v6942_v28 = vmax.f32 %v6878_v53, 0.0  ;;  %v10610_v7 = vadd.f32 %v6602_v46, %v13868_v43 }
 0x317   :  { %v6881_v57 = vadd.f32 %v10609_v34, %v13941_v33 }
 0x318   :  { %v6880_v60 = vadd.f32 %v10610_v7, %v13941_v33  ;;  %v10384_v63 = vpop.f32.mrb[30].mxu0  ;;  %10480 = vmatprep.mubr.msk.f32.mxu1 %vm6991_vm1, %v6942_v28 }
 0x319   :  { %v10611_v62 = vadd.f32 %v10384_v63, %v13870_v42  ;;  %v6612_v17 = vpop.f32.mrb[31].mxu0  ;;  %10481 = vmatmul.mubr.msk.f32.gmra.mrb[90].mxu1 %vm6991_vm1, %v6943_v37  ;;  %v6945_v54 = vmax.f32 %v6881_v57, 0.0 }
 0x31a   :  { %v6944_v1 = vmax.f32 %v6880_v60, 0.0  ;;  %v10612_v15 = vadd.f32 %v6612_v17, %v13872_v9 }
 0x31b   :  { %v6883_v50 = vadd.f32 %v10611_v62, %v13941_v33 }
 0x31c   :  { %v6882_v43 = vadd.f32 %v10612_v15, %v13941_v33  ;;  %v10387_v35 = vpop.f32.mrb[32].mxu0  ;;  %10483 = vmatprep.mubr.msk.f32.mxu1 %vm6991_vm1, %v6944_v1 }
 0x31d   :  { %v10613_v25 = vadd.f32 %v10387_v35, %v13874_v47  ;;  %v6622_v36 = vpop.f32.mrb[33].mxu0  ;;  %10484 = vmatmul.mubr.msk.f32.gmra.mrb[92].mxu1 %vm6991_vm1, %v6945_v54  ;;  %v6947_v20 = vmax.f32 %v6883_v50, 0.0 }
 0x31e   :  { %v6946_v42 = vmax.f32 %v6882_v43, 0.0  ;;  %v10614_v14 = vadd.f32 %v6622_v36, %v13876_v12 }
 0x31f   :  { %v6885_v45 = vadd.f32 %v10613_v25, %v13941_v33 }
 0x320   :  { %v6884_v9 = vadd.f32 %v10614_v14, %v13941_v33  ;;  %v10390_v55 = vpop.f32.mrb[34].mxu0  ;;  %10486 = vmatprep.mubr.msk.f32.mxu1 %vm6991_vm1, %v6946_v42 }
 0x321   :  { %v10615_v27 = vadd.f32 %v10390_v55, %v13878_v59  ;;  %v6632_v2 = vpop.f32.mrb[35].mxu0  ;;  %10487 = vmatmul.mubr.msk.f32.gmra.mrb[94].mxu1 %vm6991_vm1, %v6947_v20  ;;  %v6949_v8 = vmax.f32 %v6885_v45, 0.0 }
 0x322   :  { %v6948_v47 = vmax.f32 %v6884_v9, 0.0  ;;  %v10616_v16 = vadd.f32 %v6632_v2, %v13880_v61 }
 0x323   :  { %v6887_v31 = vadd.f32 %v10615_v27, %v13941_v33 }
 0x324   :  { %v6886_v12 = vadd.f32 %v10616_v16, %v13941_v33  ;;  %v10393_v6 = vpop.f32.mrb[36].mxu0  ;;  %10489 = vmatprep.mubr.msk.f32.mxu1 %vm6991_vm1, %v6948_v47  ;;  %v15097_v16 = vld [vmem:[#allocation2_spill] sm:$0xff] }
 0x325   :  { %v10617_v41 = vadd.f32 %v10393_v6, %v13882_v3  ;;  %v6642_v24 = vpop.f32.mrb[37].mxu0  ;;  %10490 = vmatmul.mubr.msk.f32.gmra.mrb[96].mxu1 %vm6991_vm1, %v6949_v8  ;;  %v6951_v56 = vmax.f32 %v6887_v31, 0.0 }
 0x326   :  { %v6950_v59 = vmax.f32 %v6886_v12, 0.0  ;;  %v10618_v40 = vadd.f32 %v6642_v24, %v13884_v26  ;;  %v15098_v12 = vld [vmem:[#allocation3_spill] sm:$0xff] }
 0x327   :  { %v6889_v38 = vadd.f32 %v10617_v41, %v13941_v33 }
 0x328   :  { %v6888_v61 = vadd.f32 %v10618_v40, %v13941_v33  ;;  %v10396_v39 = vpop.f32.mrb[38].mxu0  ;;  %10492 = vmatprep.mubr.msk.f32.mxu1 %vm6991_vm1, %v6950_v59  ;;  %v15099_v40 = vld [vmem:[#allocation9_spill] sm:$0xff] }
 0x329   :  { %v10619_v44 = vadd.f32 %v10396_v39, %v13886_v5  ;;  %v6652_v18 = vpop.f32.mrb[39].mxu0  ;;  %10493 = vmatmul.mubr.msk.f32.gmra.mrb[98].mxu1 %vm6991_vm1, %v6951_v56  ;;  %v6953_v52 = vmax.f32 %v6889_v38, 0.0  ;;  %v15100_v39 = vld [vmem:[#allocation4_spill] sm:$0xff] }
 0x32a   :  { %v6952_v3 = vmax.f32 %v6888_v61, 0.0  ;;  %v10620_v51 = vadd.f32 %v6652_v18, %v13888_v11 }
 0x32b   :  { %v6891_v0 = vadd.f32 %v10619_v44, %v13941_v33 }
 0x32c   :  { %v6890_v26 = vadd.f32 %v10620_v51, %v13941_v33  ;;  %v10399_v4 = vpop.f32.mrb[40].mxu0  ;;  %10495 = vmatprep.mubr.msk.f32.mxu1 %vm6991_vm1, %v6952_v3 }
 0x32d   :  { %v10621_v10 = vadd.f32 %v10399_v4, %v13890_v13  ;;  %v6662_v53 = vpop.f32.mrb[41].mxu0  ;;  %10496 = vmatmul.mubr.msk.f32.gmra.mrb[100].mxu1 %vm6991_vm1, %v6953_v52  ;;  %v6955_v34 = vmax.f32 %v6891_v0, 0.0  ;;  %v15101_v0 = vld [vmem:[#allocation10_spill] sm:$0xff] }
 0x32e   :  { %v6954_v5 = vmax.f32 %v6890_v26, 0.0  ;;  %v10622_v29 = vadd.f32 %v6662_v53, %v13892_v49  ;;  %v15102_v53 = vld [vmem:[#allocation5_spill] sm:$0xff] }
 0x32f   :  { %v6893_v46 = vadd.f32 %v10621_v10, %v13941_v33 }
 0x330   :  { %v6892_v11 = vadd.f32 %v10622_v29, %v13941_v33  ;;  %v10402_v28 = vpop.f32.mrb[42].mxu0  ;;  %10498 = vmatprep.mubr.msk.f32.mxu1 %vm6991_vm1, %v6954_v5 }
 0x331   :  { %v10623_v7 = vadd.f32 %v10402_v28, %v13894_v19  ;;  %v6672_v37 = vpop.f32.mrb[43].mxu0  ;;  %10499 = vmatmul.mubr.msk.f32.gmra.mrb[102].mxu1 %vm6991_vm1, %v6955_v34  ;;  %v6957_v60 = vmax.f32 %v6893_v46, 0.0  ;;  %v15103_v28 = vld [vmem:[#allocation6_spill] sm:$0xff] }
 0x332   :  { %v6956_v13 = vmax.f32 %v6892_v11, 0.0  ;;  %v10624_v57 = vadd.f32 %v6672_v37, %v13896_v21 }
 0x333   :  { %v6895_v63 = vadd.f32 %v10623_v7, %v13941_v33 }
 0x334   :  { %v6894_v49 = vadd.f32 %v10624_v57, %v13941_v33  ;;  %v10405_v62 = vpop.f32.mrb[44].mxu0  ;;  %10501 = vmatprep.mubr.msk.f32.mxu1 %vm6991_vm1, %v6956_v13  ;;  %v15104_v57 = vld [vmem:[#allocation7_spill] sm:$0xff] }
 0x335   :  { %v10625_v17 = vadd.f32 %v10405_v62, %v13898_v30  ;;  %v6682_v1 = vpop.f32.mrb[45].mxu0  ;;  %10502 = vmatmul.mubr.msk.f32.gmra.mrb[104].mxu1 %vm6991_vm1, %v6957_v60  ;;  %v6959_v54 = vmax.f32 %v6895_v63, 0.0 }
 0x336   :  { %v6958_v19 = vmax.f32 %v6894_v49, 0.0  ;;  %v10626_v15 = vadd.f32 %v6682_v1, %v13900_v22  ;;  %v15105_v1 = vld [vmem:[#allocation8_spill] sm:$0xff] }
 0x337   :  { %v6897_v50 = vadd.f32 %v10625_v17, %v13941_v33 }
 0x338   :  { %v6896_v21 = vadd.f32 %v10626_v15, %v13941_v33  ;;  %v10408_v43 = vpop.f32.mrb[46].mxu0  ;;  %10504 = vmatprep.mubr.msk.f32.mxu1 %vm6991_vm1, %v6958_v19 }
 0x339   :  { %v10627_v35 = vadd.f32 %v10408_v43, %v13902_v32  ;;  %v6692_v25 = vpop.f32.mrb[47].mxu0  ;;  %10505 = vmatmul.mubr.msk.f32.gmra.mrb[106].mxu1 %vm6991_vm1, %v6959_v54  ;;  %v6961_v42 = vmax.f32 %v6897_v50, 0.0  ;;  %v15106_v50 = vld [vmem:[#allocation15_spill] sm:$0xff] }
 0x33a   :  { %v6960_v30 = vmax.f32 %v6896_v21, 0.0  ;;  %v10628_v36 = vadd.f32 %v6692_v25, %v13904_v48 }
 0x33b   :  { %v6899_v14 = vadd.f32 %v10627_v35, %v13941_v33 }
 0x33c   :  { %v6898_v22 = vadd.f32 %v10628_v36, %v13941_v33  ;;  %v10411_v20 = vpop.f32.mrb[48].mxu0  ;;  %10507 = vmatprep.mubr.msk.f32.mxu1 %vm6991_vm1, %v6960_v30  ;;  %v15107_v36 = vld [vmem:[#allocation17_spill] sm:$0xff] }
 0x33d   :  { %v10629_v45 = vadd.f32 %v10411_v20, %v13906_v23  ;;  %v6702_v9 = vpop.f32.mrb[49].mxu0  ;;  %10508 = vmatmul.mubr.msk.f32.gmra.mrb[108].mxu1 %vm6991_vm1, %v6961_v42  ;;  %v6963_v27 = vmax.f32 %v6899_v14, 0.0  ;;  %v15108_v20 = vld [vmem:[#allocation11_spill] sm:$0xff] }
 0x33e   :  { %v6962_v32 = vmax.f32 %v6898_v22, 0.0  ;;  %v10630_v55 = vadd.f32 %v6702_v9, %v13908_v58 }
 0x33f   :  { %v6901_v2 = vadd.f32 %v10629_v45, %v13941_v33 }
 0x340   :  { %v6900_v48 = vadd.f32 %v10630_v55, %v13941_v33  ;;  %v10414_v47 = vpop.f32.mrb[50].mxu0  ;;  %10510 = vmatprep.mubr.msk.f32.mxu1 %vm6991_vm1, %v6962_v32 }
 0x341   :  { %v10631_v8 = vadd.f32 %v10414_v47, %v15097_v16  ;;  %v6712_v31 = vpop.f32.mrb[51].mxu0  ;;  %10511 = vmatmul.mubr.msk.f32.gmra.mrb[110].mxu1 %vm6991_vm1, %v6963_v27  ;;  %v6965_v41 = vmax.f32 %v6901_v2, 0.0  ;;  %v15109_v2 = vld [vmem:[#allocation19_spill] sm:$0xff] }
 0x342   :  { %v6964_v23 = vmax.f32 %v6900_v48, 0.0  ;;  %v10632_v6 = vadd.f32 %v6712_v31, %v15098_v12 }
 0x343   :  { %v6903_v24 = vadd.f32 %v10631_v8, %v13941_v33  ;;  %v15110_v8 = vld [vmem:[#allocation12_spill] sm:$0xff] }
 0x344   :  { %v6902_v58 = vadd.f32 %v10632_v6, %v13941_v33  ;;  %v10417_v59 = vpop.f32.mrb[52].mxu0  ;;  %10513 = vmatprep.mubr.msk.f32.mxu1 %vm6991_vm1, %v6964_v23 }
 0x345   :  { %v10633_v56 = vadd.f32 %v10417_v59, %v15099_v40  ;;  %v6722_v38 = vpop.f32.mrb[53].mxu0  ;;  %10514 = vmatmul.mubr.msk.f32.gmra.mrb[112].mxu1 %vm6991_vm1, %v6965_v41  ;;  %v6967_v18 = vmax.f32 %v6903_v24, 0.0 }
 0x346   :  { %v6966_v61 = vmax.f32 %v6902_v58, 0.0  ;;  %v10634_v44 = vadd.f32 %v6722_v38, %v15100_v39  ;;  %v14138_v58 = vld [vmem:[%s14656_s5] ss:$0 sm:$0xff] }
 0x347   :  { %v6905_v3 = vadd.f32 %v10633_v56, %v13941_v33  ;;  %v7633_v39 = vld [vmem:[%s14657_s1] sm:$0xff] }
 0x348   :  { %v6904_v51 = vadd.f32 %v10634_v44, %v13941_v33  ;;  %v10420_v52 = vpop.f32.mrb[54].mxu0  ;;  %10516 = vmatprep.mubr.msk.f32.mxu1 %vm6991_vm1, %v6966_v61 }
 0x349   :  { %v10635_v26 = vadd.f32 %v10420_v52, %v15101_v0  ;;  %v6732_v4 = vpop.f32.mrb[55].mxu0  ;;  %10517 = vmatmul.mubr.msk.f32.gmra.mrb[114].mxu1 %vm6991_vm1, %v6967_v18  ;;  %v6969_v29 = vmax.f32 %v6905_v3, 0.0 }
 0x34a   :  { %v6968_v10 = vmax.f32 %v6904_v51, 0.0  ;;  %v10636_v5 = vadd.f32 %v6732_v4, %v15102_v53  ;;  %v7635_v53 = vld [vmem:[%s14657_s1 + $0x10] sm:$0xff] }
 0x34b   :  { %v6907_v34 = vadd.f32 %v10635_v26, %v13941_v33  ;;  %v7636_v26 = vld [vmem:[%s14657_s1 + $0x18] sm:$0xff] }
 0x34c   :  { %v6906_v46 = vadd.f32 %v10636_v5, %v13941_v33  ;;  %v10423_v11 = vpop.f32.mrb[56].mxu0  ;;  %10519 = vmatprep.mubr.msk.f32.mxu1 %vm6991_vm1, %v6968_v10 }
 0x34d   :  { %v10637_v7 = vadd.f32 %v10423_v11, %v15103_v28  ;;  %v6742_v37 = vpop.f32.mrb[57].mxu0  ;;  %10520 = vmatmul.mubr.msk.f32.gmra.mrb[116].mxu1 %vm6991_vm1, %v6969_v29  ;;  %v6971_v63 = vmax.f32 %v6907_v34, 0.0 }
 0x34e   :  { %v6970_v13 = vmax.f32 %v6906_v46, 0.0  ;;  %v10638_v60 = vadd.f32 %v6742_v37, %v15104_v57  ;;  %v7637_v57 = vld [vmem:[%s14657_s1 + $0x20] sm:$0xff] }
 0x34f   :  { %v6909_v49 = vadd.f32 %v10637_v7, %v13941_v33  ;;  %v7638_v7 = vld [vmem:[%s14657_s1 + $0x28] sm:$0xff] }
 0x350   :  { %v6908_v62 = vadd.f32 %v10638_v60, %v13941_v33  ;;  %v10426_v17 = vpop.f32.mrb[58].mxu0  ;;  %10522 = vmatprep.mubr.msk.f32.mxu1 %vm6991_vm1, %v6970_v13 }
 0x351   :  { %v10639_v19 = vadd.f32 %v10426_v17, %v15105_v1  ;;  %v6752_v15 = vpop.f32.mrb[59].mxu0  ;;  %10523 = vmatmul.mubr.msk.f32.gmra.mrb[118].mxu1 %vm6991_vm1, %v6971_v63  ;;  %v6973_v43 = vmax.f32 %v6909_v49, 0.0 }
 0x352   :  { %v6972_v54 = vmax.f32 %v6908_v62, 0.0  ;;  %v10640_v21 = vadd.f32 %v6752_v15, %v15106_v50  ;;  %v7639_v50 = vld [vmem:[%s14657_s1 + $0x30] sm:$0xff] }
 0x353   :  { %v6911_v35 = vadd.f32 %v10639_v19, %v13941_v33  ;;  %v7640_v19 = vld [vmem:[%s14657_s1 + $0x38] sm:$0xff] }
 0x354   :  { %v6910_v25 = vadd.f32 %v10640_v21, %v13941_v33  ;;  %v10429_v30 = vpop.f32.mrb[60].mxu0  ;;  %10525 = vmatprep.mubr.msk.f32.mxu1 %vm6991_vm1, %v6972_v54 }
 0x355   :  { %v10641_v42 = vadd.f32 %v10429_v30, %v15107_v36  ;;  %v6762_v14 = vpop.f32.mrb[61].mxu0  ;;  %10526 = vmatmul.mubr.msk.f32.gmra.mrb[120].mxu1 %vm6991_vm1, %v6973_v43  ;;  %v6975_v9 = vmax.f32 %v6911_v35, 0.0 }
 0x356   :  { %v6974_v22 = vmax.f32 %v6910_v25, 0.0  ;;  %v10642_v45 = vadd.f32 %v6762_v14, %v15108_v20  ;;  %v7641_v20 = vld [vmem:[%s14657_s1 + $0x40] sm:$0xff] }
 0x357   :  { %v6913_v32 = vadd.f32 %v10641_v42, %v13941_v33  ;;  %v7642_v42 = vld [vmem:[%s14657_s1 + $0x48] sm:$0xff] }
 0x358   :  { %v6912_v55 = vadd.f32 %v10642_v45, %v13941_v33  ;;  %v10432_v27 = vpop.f32.mrb[62].mxu0  ;;  %10528 = vmatprep.mubr.msk.f32.mxu1 %vm6991_vm1, %v6974_v22 }
 0x359   :  { %v10643_v48 = vadd.f32 %v10432_v27, %v15109_v2  ;;  %v6772_v47 = vpop.f32.mrb[63].mxu0  ;;  %10529 = vmatmul.mubr.msk.f32.gmra.mrb[122].mxu1 %vm6991_vm1, %v6975_v9  ;;  %v6977_v23 = vmax.f32 %v6913_v32, 0.0 }
 0x35a   :  { %v6976_v16 = vmax.f32 %v6912_v55, 0.0  ;;  %v10644_v31 = vadd.f32 %v6772_v47, %v15110_v8  ;;  %v7643_v8 = vld [vmem:[%s14657_s1 + $0x50] sm:$0xff] }
 0x35b   :  { %v6915_v12 = vadd.f32 %v10643_v48, %v13941_v33  ;;  %v7644_v48 = vld [vmem:[%s14657_s1 + $0x58] sm:$0xff] }
 0x35c   :  { %v6914_v6 = vadd.f32 %v10644_v31, %v13941_v33  ;;  %10531 = vmatprep.mubr.msk.f32.mxu1 %vm6991_vm1, %v6976_v16  ;;  %v7634_v33 = vld [vmem:[%s14657_s1 + $0x8] sm:$0xff] }
 0x35d   :  { %10532 = vmatmul.mubr.msk.f32.gmra.mrb[124].mxu1 %vm6991_vm1, %v6977_v23  ;;  %v6979_v24 = vmax.f32 %v6915_v12, 0.0 }
 0x35e   :  { %v6978_v41 = vmax.f32 %v6914_v6, 0.0 }
 0x360   :  { %10534 = vmatprep.mubr.msk.f32.mxu1 %vm6991_vm1, %v6978_v41 }
 0x361   :  { %10535 = vmatmul.mubr.msk.f32.gmra.mrb[126].mxu1 %vm6991_vm1, %v6979_v24 }
 0x3b8   :  { %v10443_v59 = vpop.f32.mrb[64].mxu1 }
 0x3b9   :  { %v7256_v40 = vadd.f32 %v10443_v59, %v14138_v58  ;;  %v7250_v56 = vpop.f32.mrb[65].mxu1  ;;  %v7646_v59 = vld [vmem:[%s14657_s1 + $0x68] sm:$0xff] }
 0x3ba   :  { %v7251_v38 = vadd.f32 %v14138_v58, %v7250_v56 }
 0x3bb   :  { %v7570_v61 = vmax.f32 %v7256_v40, 0.0 }
 0x3bc   :  { %v7569_v44 = vmax.f32 %v7251_v38, 0.0  ;;  %v10446_v18 = vpop.f32.mrb[66].mxu1 }
 0x3bd   :  { %v7698_v3 = vadd.f32 %v7634_v33, %v7570_v61  ;;  %v7266_v51 = vadd.f32 %v10446_v18, %v14138_v58  ;;  %v7260_v52 = vpop.f32.mrb[67].mxu1  ;;  %v7645_v33 = vld [vmem:[%s14657_s1 + $0x60] sm:$0xff] }
 0x3be   :  { %v7697_v0 = vadd.f32 %v7633_v39, %v7569_v44  ;;  %v7261_v4 = vadd.f32 %v14138_v58, %v7260_v52 }
 0x3bf   :  { %7762 = vst.msk [vmem:[%s14658_s6 + $0x8] sm:$0xff] %vm284_vm0, %v7698_v3  ;;  %v7572_v10 = vmax.f32 %v7266_v51, 0.0  ;;  %v7648_v51 = vld [vmem:[%s14657_s1 + $0x78] sm:$0xff] }
 0x3c0   :  { %7761 = vst.msk [vmem:[%s14658_s6] sm:$0xff] %vm284_vm0, %v7697_v0  ;;  %v7571_v5 = vmax.f32 %v7261_v4, 0.0  ;;  %v10449_v29 = vpop.f32.mrb[68].mxu1 }
 0x3c1   :  { %v7700_v34 = vadd.f32 %v7636_v26, %v7572_v10  ;;  %v7276_v46 = vadd.f32 %v10449_v29, %v14138_v58  ;;  %v7270_v11 = vpop.f32.mrb[69].mxu1  ;;  %v7647_v26 = vld [vmem:[%s14657_s1 + $0x70] sm:$0xff] }
 0x3c2   :  { %v7699_v28 = vadd.f32 %v7635_v53, %v7571_v5  ;;  %v7271_v37 = vadd.f32 %v14138_v58, %v7270_v11 }
 0x3c3   :  { %7764 = vst.msk [vmem:[%s14658_s6 + $0x18] sm:$0xff] %vm284_vm0, %v7700_v34  ;;  %v7574_v13 = vmax.f32 %v7276_v46, 0.0  ;;  %v7650_v46 = vld [vmem:[%s14657_s1 + $0x88] sm:$0xff] }
 0x3c4   :  { %7763 = vst.msk [vmem:[%s14658_s6 + $0x10] sm:$0xff] %vm284_vm0, %v7699_v28  ;;  %v7573_v60 = vmax.f32 %v7271_v37, 0.0  ;;  %v10452_v63 = vpop.f32.mrb[70].mxu1 }
 0x3c5   :  { %v7702_v49 = vadd.f32 %v7638_v7, %v7574_v13  ;;  %v7286_v62 = vadd.f32 %v10452_v63, %v14138_v58  ;;  %v7280_v17 = vpop.f32.mrb[71].mxu1  ;;  %v7649_v7 = vld [vmem:[%s14657_s1 + $0x80] sm:$0xff] }
 0x3c6   :  { %v7701_v1 = vadd.f32 %v7637_v57, %v7573_v60  ;;  %v7281_v15 = vadd.f32 %v14138_v58, %v7280_v17 }
 0x3c7   :  { %7766 = vst.msk [vmem:[%s14658_s6 + $0x28] sm:$0xff] %vm284_vm0, %v7702_v49  ;;  %v7576_v54 = vmax.f32 %v7286_v62, 0.0  ;;  %v7652_v62 = vld [vmem:[%s14657_s1 + $0x98] sm:$0xff] }
 0x3c8   :  { %7765 = vst.msk [vmem:[%s14658_s6 + $0x20] sm:$0xff] %vm284_vm0, %v7701_v1  ;;  %v7575_v21 = vmax.f32 %v7281_v15, 0.0  ;;  %v10455_v43 = vpop.f32.mrb[72].mxu1 }
 0x3c9   :  { %v7704_v35 = vadd.f32 %v7640_v19, %v7576_v54  ;;  %v7296_v25 = vadd.f32 %v10455_v43, %v14138_v58  ;;  %v7290_v30 = vpop.f32.mrb[73].mxu1  ;;  %v7651_v19 = vld [vmem:[%s14657_s1 + $0x90] sm:$0xff] }
 0x3ca   :  { %v7703_v36 = vadd.f32 %v7639_v50, %v7575_v21  ;;  %v7291_v14 = vadd.f32 %v14138_v58, %v7290_v30 }
 0x3cb   :  { %7768 = vst.msk [vmem:[%s14658_s6 + $0x38] sm:$0xff] %vm284_vm0, %v7704_v35  ;;  %v7578_v22 = vmax.f32 %v7296_v25, 0.0  ;;  %v7654_v25 = vld [vmem:[%s14657_s1 + $0xa8] sm:$0xff] }
 0x3cc   :  { %7767 = vst.msk [vmem:[%s14658_s6 + $0x30] sm:$0xff] %vm284_vm0, %v7703_v36  ;;  %v7577_v45 = vmax.f32 %v7291_v14, 0.0  ;;  %v10458_v9 = vpop.f32.mrb[74].mxu1 }
 0x3cd   :  { %v7706_v32 = vadd.f32 %v7642_v42, %v7578_v22  ;;  %v7306_v55 = vadd.f32 %v10458_v9, %v14138_v58  ;;  %v7300_v27 = vpop.f32.mrb[75].mxu1  ;;  %v7653_v42 = vld [vmem:[%s14657_s1 + $0xa0] sm:$0xff] }
 0x3ce   :  { %v7705_v2 = vadd.f32 %v7641_v20, %v7577_v45  ;;  %v7301_v47 = vadd.f32 %v14138_v58, %v7300_v27 }
 0x3cf   :  { %7770 = vst.msk [vmem:[%s14658_s6 + $0x48] sm:$0xff] %vm284_vm0, %v7706_v32  ;;  %v7580_v16 = vmax.f32 %v7306_v55, 0.0  ;;  %v7656_v55 = vld [vmem:[%s14657_s1 + $0xb8] sm:$0xff] }
 0x3d0   :  { %7769 = vst.msk [vmem:[%s14658_s6 + $0x40] sm:$0xff] %vm284_vm0, %v7705_v2  ;;  %v7579_v31 = vmax.f32 %v7301_v47, 0.0  ;;  %v10461_v23 = vpop.f32.mrb[76].mxu1 }
 0x3d1   :  { %v7708_v12 = vadd.f32 %v7644_v48, %v7580_v16  ;;  %v7316_v6 = vadd.f32 %v10461_v23, %v14138_v58  ;;  %v7310_v41 = vpop.f32.mrb[77].mxu1  ;;  %v7655_v48 = vld [vmem:[%s14657_s1 + $0xb0] sm:$0xff] }
 0x3d2   :  { %v7707_v24 = vadd.f32 %v7643_v8, %v7579_v31  ;;  %v7311_v40 = vadd.f32 %v14138_v58, %v7310_v41 }
 0x3d3   :  { %7772 = vst.msk [vmem:[%s14658_s6 + $0x58] sm:$0xff] %vm284_vm0, %v7708_v12  ;;  %v7582_v56 = vmax.f32 %v7316_v6, 0.0  ;;  %v7658_v6 = vld [vmem:[%s14657_s1 + $0xc8] sm:$0xff] }
 0x3d4   :  { %7771 = vst.msk [vmem:[%s14658_s6 + $0x50] sm:$0xff] %vm284_vm0, %v7707_v24  ;;  %v7581_v38 = vmax.f32 %v7311_v40, 0.0  ;;  %v10464_v61 = vpop.f32.mrb[78].mxu1 }
 0x3d5   :  { %v7710_v39 = vadd.f32 %v7646_v59, %v7582_v56  ;;  %v7326_v44 = vadd.f32 %v10464_v61, %v14138_v58  ;;  %v7320_v18 = vpop.f32.mrb[79].mxu1  ;;  %v7657_v59 = vld [vmem:[%s14657_s1 + $0xc0] sm:$0xff] }
 0x3d6   :  { %v7709_v3 = vadd.f32 %v7645_v33, %v7581_v38  ;;  %v7321_v52 = vadd.f32 %v14138_v58, %v7320_v18 }
 0x3d7   :  { %7774 = vst.msk [vmem:[%s14658_s6 + $0x68] sm:$0xff] %vm284_vm0, %v7710_v39  ;;  %v7584_v0 = vmax.f32 %v7326_v44, 0.0  ;;  %v7660_v44 = vld [vmem:[%s14657_s1 + $0xd8] sm:$0xff] }
 0x3d8   :  { %7773 = vst.msk [vmem:[%s14658_s6 + $0x60] sm:$0xff] %vm284_vm0, %v7709_v3  ;;  %v7583_v4 = vmax.f32 %v7321_v52, 0.0  ;;  %v10467_v10 = vpop.f32.mrb[80].mxu1 }
 0x3d9   :  { %v7712_v53 = vadd.f32 %v7648_v51, %v7584_v0  ;;  %v7336_v5 = vadd.f32 %v10467_v10, %v14138_v58  ;;  %v7330_v29 = vpop.f32.mrb[81].mxu1  ;;  %v7659_v51 = vld [vmem:[%s14657_s1 + $0xd0] sm:$0xff] }
 0x3da   :  { %v7711_v34 = vadd.f32 %v7647_v26, %v7583_v4  ;;  %v7331_v11 = vadd.f32 %v14138_v58, %v7330_v29 }
 0x3db   :  { %7776 = vst.msk [vmem:[%s14658_s6 + $0x78] sm:$0xff] %vm284_vm0, %v7712_v53  ;;  %v7586_v28 = vmax.f32 %v7336_v5, 0.0  ;;  %v7662_v5 = vld [vmem:[%s14657_s1 + $0xe8] sm:$0xff] }
 0x3dc   :  { %7775 = vst.msk [vmem:[%s14658_s6 + $0x70] sm:$0xff] %vm284_vm0, %v7711_v34  ;;  %v7585_v37 = vmax.f32 %v7331_v11, 0.0  ;;  %v10470_v13 = vpop.f32.mrb[82].mxu1 }
 0x3dd   :  { %v7714_v57 = vadd.f32 %v7650_v46, %v7586_v28  ;;  %v7346_v60 = vadd.f32 %v10470_v13, %v14138_v58  ;;  %v7340_v63 = vpop.f32.mrb[83].mxu1  ;;  %v7661_v46 = vld [vmem:[%s14657_s1 + $0xe0] sm:$0xff] }
 0x3de   :  { %v7713_v49 = vadd.f32 %v7649_v7, %v7585_v37  ;;  %v7341_v17 = vadd.f32 %v14138_v58, %v7340_v63 }
 0x3df   :  { %7778 = vst.msk [vmem:[%s14658_s6 + $0x88] sm:$0xff] %vm284_vm0, %v7714_v57  ;;  %v7588_v1 = vmax.f32 %v7346_v60, 0.0  ;;  %v7664_v60 = vld [vmem:[%s14657_s1 + $0xf8] sm:$0xff] }
 0x3e0   :  { %7777 = vst.msk [vmem:[%s14658_s6 + $0x80] sm:$0xff] %vm284_vm0, %v7713_v49  ;;  %v7587_v15 = vmax.f32 %v7341_v17, 0.0  ;;  %v10473_v54 = vpop.f32.mrb[84].mxu1 }
 0x3e1   :  { %v7716_v50 = vadd.f32 %v7652_v62, %v7588_v1  ;;  %v7356_v21 = vadd.f32 %v10473_v54, %v14138_v58  ;;  %v7350_v43 = vpop.f32.mrb[85].mxu1  ;;  %v7663_v62 = vld [vmem:[%s14657_s1 + $0xf0] sm:$0xff] }
 0x3e2   :  { %v7715_v35 = vadd.f32 %v7651_v19, %v7587_v15  ;;  %v7351_v30 = vadd.f32 %v14138_v58, %v7350_v43 }
 0x3e3   :  { %7780 = vst.msk [vmem:[%s14658_s6 + $0x98] sm:$0xff] %vm284_vm0, %v7716_v50  ;;  %v7590_v36 = vmax.f32 %v7356_v21, 0.0  ;;  %v7666_v21 = vld [vmem:[%s14657_s1 + $0x108] sm:$0xff] }
 0x3e4   :  { %7779 = vst.msk [vmem:[%s14658_s6 + $0x90] sm:$0xff] %vm284_vm0, %v7715_v35  ;;  %v7589_v14 = vmax.f32 %v7351_v30, 0.0  ;;  %v10476_v22 = vpop.f32.mrb[86].mxu1 }
 0x3e5   :  { %v7718_v20 = vadd.f32 %v7654_v25, %v7590_v36  ;;  %v7366_v45 = vadd.f32 %v10476_v22, %v14138_v58  ;;  %v7360_v9 = vpop.f32.mrb[87].mxu1  ;;  %v7665_v25 = vld [vmem:[%s14657_s1 + $0x100] sm:$0xff] }
 0x3e6   :  { %v7717_v32 = vadd.f32 %v7653_v42, %v7589_v14  ;;  %v7361_v27 = vadd.f32 %v14138_v58, %v7360_v9 }
 0x3e7   :  { %7782 = vst.msk [vmem:[%s14658_s6 + $0xa8] sm:$0xff] %vm284_vm0, %v7718_v20  ;;  %v7592_v2 = vmax.f32 %v7366_v45, 0.0  ;;  %v7668_v45 = vld [vmem:[%s14657_s1 + $0x118] sm:$0xff] }
 0x3e8   :  { %7781 = vst.msk [vmem:[%s14658_s6 + $0xa0] sm:$0xff] %vm284_vm0, %v7717_v32  ;;  %v7591_v47 = vmax.f32 %v7361_v27, 0.0  ;;  %v10479_v16 = vpop.f32.mrb[88].mxu1 }
 0x3e9   :  { %v7720_v8 = vadd.f32 %v7656_v55, %v7592_v2  ;;  %v7376_v31 = vadd.f32 %v10479_v16, %v14138_v58  ;;  %v7370_v23 = vpop.f32.mrb[89].mxu1  ;;  %v7667_v55 = vld [vmem:[%s14657_s1 + $0x110] sm:$0xff] }
 0x3ea   :  { %v7719_v12 = vadd.f32 %v7655_v48, %v7591_v47  ;;  %v7371_v41 = vadd.f32 %v14138_v58, %v7370_v23 }
 0x3eb   :  { %7784 = vst.msk [vmem:[%s14658_s6 + $0xb8] sm:$0xff] %vm284_vm0, %v7720_v8  ;;  %v7594_v24 = vmax.f32 %v7376_v31, 0.0  ;;  %v7670_v31 = vld [vmem:[%s14657_s1 + $0x128] sm:$0xff] }
 0x3ec   :  { %7783 = vst.msk [vmem:[%s14658_s6 + $0xb0] sm:$0xff] %vm284_vm0, %v7719_v12  ;;  %v7593_v40 = vmax.f32 %v7371_v41, 0.0  ;;  %v10482_v56 = vpop.f32.mrb[90].mxu1 }
 0x3ed   :  { %v7722_v33 = vadd.f32 %v7658_v6, %v7594_v24  ;;  %v7386_v38 = vadd.f32 %v10482_v56, %v14138_v58  ;;  %v7380_v61 = vpop.f32.mrb[91].mxu1  ;;  %v7669_v6 = vld [vmem:[%s14657_s1 + $0x120] sm:$0xff] }
 0x3ee   :  { %v7721_v39 = vadd.f32 %v7657_v59, %v7593_v40  ;;  %v7381_v18 = vadd.f32 %v14138_v58, %v7380_v61 }
 0x3ef   :  { %7786 = vst.msk [vmem:[%s14658_s6 + $0xc8] sm:$0xff] %vm284_vm0, %v7722_v33  ;;  %v7596_v3 = vmax.f32 %v7386_v38, 0.0  ;;  %v7672_v38 = vld [vmem:[%s14657_s1 + $0x138] sm:$0xff] }
 0x3f0   :  { %7785 = vst.msk [vmem:[%s14658_s6 + $0xc0] sm:$0xff] %vm284_vm0, %v7721_v39  ;;  %v7595_v52 = vmax.f32 %v7381_v18, 0.0  ;;  %v10485_v0 = vpop.f32.mrb[92].mxu1 }
 0x3f1   :  { %v7724_v26 = vadd.f32 %v7660_v44, %v7596_v3  ;;  %v7396_v4 = vadd.f32 %v10485_v0, %v14138_v58  ;;  %v7390_v10 = vpop.f32.mrb[93].mxu1  ;;  %v7671_v44 = vld [vmem:[%s14657_s1 + $0x130] sm:$0xff] }
 0x3f2   :  { %v7723_v53 = vadd.f32 %v7659_v51, %v7595_v52  ;;  %v7391_v29 = vadd.f32 %v14138_v58, %v7390_v10 }
 0x3f3   :  { %7788 = vst.msk [vmem:[%s14658_s6 + $0xd8] sm:$0xff] %vm284_vm0, %v7724_v26  ;;  %v7598_v34 = vmax.f32 %v7396_v4, 0.0  ;;  %v7674_v4 = vld [vmem:[%s14657_s1 + $0x148] sm:$0xff] }
 0x3f4   :  { %7787 = vst.msk [vmem:[%s14658_s6 + $0xd0] sm:$0xff] %vm284_vm0, %v7723_v53  ;;  %v7597_v11 = vmax.f32 %v7391_v29, 0.0  ;;  %v10488_v28 = vpop.f32.mrb[94].mxu1 }
 0x3f5   :  { %v7726_v7 = vadd.f32 %v7662_v5, %v7598_v34  ;;  %v7406_v37 = vadd.f32 %v10488_v28, %v14138_v58  ;;  %v7400_v13 = vpop.f32.mrb[95].mxu1  ;;  %v7673_v5 = vld [vmem:[%s14657_s1 + $0x140] sm:$0xff] }
 0x3f6   :  { %v7725_v57 = vadd.f32 %v7661_v46, %v7597_v11  ;;  %v7401_v63 = vadd.f32 %v14138_v58, %v7400_v13 }
 0x3f7   :  { %7790 = vst.msk [vmem:[%s14658_s6 + $0xe8] sm:$0xff] %vm284_vm0, %v7726_v7  ;;  %v7600_v49 = vmax.f32 %v7406_v37, 0.0  ;;  %v7676_v37 = vld [vmem:[%s14657_s1 + $0x158] sm:$0xff] }
 0x3f8   :  { %7789 = vst.msk [vmem:[%s14658_s6 + $0xe0] sm:$0xff] %vm284_vm0, %v7725_v57  ;;  %v7599_v17 = vmax.f32 %v7401_v63, 0.0  ;;  %v10491_v1 = vpop.f32.mrb[96].mxu1 }
 0x3f9   :  { %v7728_v19 = vadd.f32 %v7664_v60, %v7600_v49  ;;  %v7416_v15 = vadd.f32 %v10491_v1, %v14138_v58  ;;  %v7410_v54 = vpop.f32.mrb[97].mxu1  ;;  %v7675_v60 = vld [vmem:[%s14657_s1 + $0x150] sm:$0xff] }
 0x3fa   :  { %v7727_v50 = vadd.f32 %v7663_v62, %v7599_v17  ;;  %v7411_v43 = vadd.f32 %v14138_v58, %v7410_v54 }
 0x3fb   :  { %7792 = vst.msk [vmem:[%s14658_s6 + $0xf8] sm:$0xff] %vm284_vm0, %v7728_v19  ;;  %v7602_v35 = vmax.f32 %v7416_v15, 0.0  ;;  %v7678_v15 = vld [vmem:[%s14657_s1 + $0x168] sm:$0xff] }
 0x3fc   :  { %7791 = vst.msk [vmem:[%s14658_s6 + $0xf0] sm:$0xff] %vm284_vm0, %v7727_v50  ;;  %v7601_v30 = vmax.f32 %v7411_v43, 0.0  ;;  %v10494_v36 = vpop.f32.mrb[98].mxu1 }
 0x3fd   :  { %v7730_v42 = vadd.f32 %v7666_v21, %v7602_v35  ;;  %v7426_v14 = vadd.f32 %v10494_v36, %v14138_v58  ;;  %v7420_v22 = vpop.f32.mrb[99].mxu1  ;;  %v7677_v21 = vld [vmem:[%s14657_s1 + $0x160] sm:$0xff] }
 0x3fe   :  { %v7729_v20 = vadd.f32 %v7665_v25, %v7601_v30  ;;  %v7421_v9 = vadd.f32 %v14138_v58, %v7420_v22 }
 0x3ff   :  { %7794 = vst.msk [vmem:[%s14658_s6 + $0x108] sm:$0xff] %vm284_vm0, %v7730_v42  ;;  %v7604_v32 = vmax.f32 %v7426_v14, 0.0  ;;  %v7680_v14 = vld [vmem:[%s14657_s1 + $0x178] sm:$0xff] }
 0x400   :  { %7793 = vst.msk [vmem:[%s14658_s6 + $0x100] sm:$0xff] %vm284_vm0, %v7729_v20  ;;  %v7603_v27 = vmax.f32 %v7421_v9, 0.0  ;;  %v10497_v2 = vpop.f32.mrb[100].mxu1 }
 0x401   :  { %v7732_v48 = vadd.f32 %v7668_v45, %v7604_v32  ;;  %v7436_v47 = vadd.f32 %v10497_v2, %v14138_v58  ;;  %v7430_v16 = vpop.f32.mrb[101].mxu1  ;;  %v7679_v45 = vld [vmem:[%s14657_s1 + $0x170] sm:$0xff] }
 0x402   :  { %v7731_v8 = vadd.f32 %v7667_v55, %v7603_v27  ;;  %v7431_v23 = vadd.f32 %v14138_v58, %v7430_v16 }
 0x403   :  { %7796 = vst.msk [vmem:[%s14658_s6 + $0x118] sm:$0xff] %vm284_vm0, %v7732_v48  ;;  %v7606_v12 = vmax.f32 %v7436_v47, 0.0  ;;  %v7682_v47 = vld [vmem:[%s14657_s1 + $0x188] sm:$0xff] }
 0x404   :  { %7795 = vst.msk [vmem:[%s14658_s6 + $0x110] sm:$0xff] %vm284_vm0, %v7731_v8  ;;  %v7605_v41 = vmax.f32 %v7431_v23, 0.0  ;;  %v10500_v24 = vpop.f32.mrb[102].mxu1 }
 0x405   :  { %v7734_v59 = vadd.f32 %v7670_v31, %v7606_v12  ;;  %v7446_v40 = vadd.f32 %v10500_v24, %v14138_v58  ;;  %v7440_v56 = vpop.f32.mrb[103].mxu1  ;;  %v7681_v31 = vld [vmem:[%s14657_s1 + $0x180] sm:$0xff] }
 0x406   :  { %v7733_v33 = vadd.f32 %v7669_v6, %v7605_v41  ;;  %v7441_v61 = vadd.f32 %v14138_v58, %v7440_v56 }
 0x407   :  { %7798 = vst.msk [vmem:[%s14658_s6 + $0x128] sm:$0xff] %vm284_vm0, %v7734_v59  ;;  %v7608_v39 = vmax.f32 %v7446_v40, 0.0  ;;  %v7684_v40 = vld [vmem:[%s14657_s1 + $0x198] sm:$0xff] }
 0x408   :  { %7797 = vst.msk [vmem:[%s14658_s6 + $0x120] sm:$0xff] %vm284_vm0, %v7733_v33  ;;  %v7607_v18 = vmax.f32 %v7441_v61, 0.0  ;;  %v10503_v3 = vpop.f32.mrb[104].mxu1 }
 0x409   :  { %v7736_v51 = vadd.f32 %v7672_v38, %v7608_v39  ;;  %v7456_v52 = vadd.f32 %v10503_v3, %v14138_v58  ;;  %v7450_v0 = vpop.f32.mrb[105].mxu1  ;;  %v7683_v38 = vld [vmem:[%s14657_s1 + $0x190] sm:$0xff] }
 0x40a   :  { %v7735_v26 = vadd.f32 %v7671_v44, %v7607_v18  ;;  %v7451_v10 = vadd.f32 %v14138_v58, %v7450_v0 }
 0x40b   :  { %7800 = vst.msk [vmem:[%s14658_s6 + $0x138] sm:$0xff] %vm284_vm0, %v7736_v51  ;;  %v7610_v53 = vmax.f32 %v7456_v52, 0.0  ;;  %v7686_v52 = vld [vmem:[%s14657_s1 + $0x1a8] sm:$0xff] }
 0x40c   :  { %7799 = vst.msk [vmem:[%s14658_s6 + $0x130] sm:$0xff] %vm284_vm0, %v7735_v26  ;;  %v7609_v29 = vmax.f32 %v7451_v10, 0.0  ;;  %v10506_v34 = vpop.f32.mrb[106].mxu1 }
 0x40d   :  { %v7738_v46 = vadd.f32 %v7674_v4, %v7610_v53  ;;  %v7466_v11 = vadd.f32 %v10506_v34, %v14138_v58  ;;  %v7460_v28 = vpop.f32.mrb[107].mxu1  ;;  %v7685_v4 = vld [vmem:[%s14657_s1 + $0x1a0] sm:$0xff] }
 0x40e   :  { %v7737_v7 = vadd.f32 %v7673_v5, %v7609_v29  ;;  %v7461_v13 = vadd.f32 %v14138_v58, %v7460_v28 }
 0x40f   :  { %7802 = vst.msk [vmem:[%s14658_s6 + $0x148] sm:$0xff] %vm284_vm0, %v7738_v46  ;;  %v7612_v57 = vmax.f32 %v7466_v11, 0.0  ;;  %v7688_v11 = vld [vmem:[%s14657_s1 + $0x1b8] sm:$0xff] }
 0x410   :  { %7801 = vst.msk [vmem:[%s14658_s6 + $0x140] sm:$0xff] %vm284_vm0, %v7737_v7  ;;  %v7611_v63 = vmax.f32 %v7461_v13, 0.0  ;;  %v10509_v49 = vpop.f32.mrb[108].mxu1 }
 0x411   :  { %v7740_v62 = vadd.f32 %v7676_v37, %v7612_v57  ;;  %v7476_v17 = vadd.f32 %v10509_v49, %v14138_v58  ;;  %v7470_v1 = vpop.f32.mrb[109].mxu1  ;;  %v7687_v37 = vld [vmem:[%s14657_s1 + $0x1b0] sm:$0xff] }
 0x412   :  { %v7739_v19 = vadd.f32 %v7675_v60, %v7611_v63  ;;  %v7471_v54 = vadd.f32 %v14138_v58, %v7470_v1 }
 0x413   :  { %7804 = vst.msk [vmem:[%s14658_s6 + $0x158] sm:$0xff] %vm284_vm0, %v7740_v62  ;;  %v7614_v50 = vmax.f32 %v7476_v17, 0.0  ;;  %v7690_v17 = vld [vmem:[%s14657_s1 + $0x1c8] sm:$0xff] }
 0x414   :  { %7803 = vst.msk [vmem:[%s14658_s6 + $0x150] sm:$0xff] %vm284_vm0, %v7739_v19  ;;  %v7613_v43 = vmax.f32 %v7471_v54, 0.0  ;;  %v10512_v35 = vpop.f32.mrb[110].mxu1 }
 0x415   :  { %v7742_v25 = vadd.f32 %v7678_v15, %v7614_v50  ;;  %v7486_v30 = vadd.f32 %v10512_v35, %v14138_v58  ;;  %v7480_v36 = vpop.f32.mrb[111].mxu1  ;;  %v7689_v15 = vld [vmem:[%s14657_s1 + $0x1c0] sm:$0xff] }
 0x416   :  { %v7741_v42 = vadd.f32 %v7677_v21, %v7613_v43  ;;  %v7481_v22 = vadd.f32 %v14138_v58, %v7480_v36 }
 0x417   :  { %7806 = vst.msk [vmem:[%s14658_s6 + $0x168] sm:$0xff] %vm284_vm0, %v7742_v25  ;;  %v7616_v20 = vmax.f32 %v7486_v30, 0.0  ;;  %v7692_v30 = vld [vmem:[%s14657_s1 + $0x1d8] sm:$0xff] }
 0x418   :  { %7805 = vst.msk [vmem:[%s14658_s6 + $0x160] sm:$0xff] %vm284_vm0, %v7741_v42  ;;  %v7615_v9 = vmax.f32 %v7481_v22, 0.0  ;;  %v10515_v32 = vpop.f32.mrb[112].mxu1 }
 0x419   :  { %v7744_v55 = vadd.f32 %v7680_v14, %v7616_v20  ;;  %v7496_v27 = vadd.f32 %v10515_v32, %v14138_v58  ;;  %v7490_v2 = vpop.f32.mrb[113].mxu1  ;;  %v7691_v14 = vld [vmem:[%s14657_s1 + $0x1d0] sm:$0xff] }
 0x41a   :  { %v7743_v48 = vadd.f32 %v7679_v45, %v7615_v9  ;;  %v7491_v16 = vadd.f32 %v14138_v58, %v7490_v2 }
 0x41b   :  { %7808 = vst.msk [vmem:[%s14658_s6 + $0x178] sm:$0xff] %vm284_vm0, %v7744_v55  ;;  %v7618_v8 = vmax.f32 %v7496_v27, 0.0  ;;  %v7694_v27 = vld [vmem:[%s14657_s1 + $0x1e8] sm:$0xff] }
 0x41c   :  { %7807 = vst.msk [vmem:[%s14658_s6 + $0x170] sm:$0xff] %vm284_vm0, %v7743_v48  ;;  %v7617_v23 = vmax.f32 %v7491_v16, 0.0  ;;  %v10518_v12 = vpop.f32.mrb[114].mxu1 }
 0x41d   :  { %v7746_v6 = vadd.f32 %v7682_v47, %v7618_v8  ;;  %v7506_v41 = vadd.f32 %v10518_v12, %v14138_v58  ;;  %v7500_v24 = vpop.f32.mrb[115].mxu1  ;;  %v7693_v47 = vld [vmem:[%s14657_s1 + $0x1e0] sm:$0xff] }
 0x41e   :  { %v7745_v59 = vadd.f32 %v7681_v31, %v7617_v23  ;;  %v7501_v56 = vadd.f32 %v14138_v58, %v7500_v24 }
 0x41f   :  { %7810 = vst.msk [vmem:[%s14658_s6 + $0x188] sm:$0xff] %vm284_vm0, %v7746_v6  ;;  %v7620_v33 = vmax.f32 %v7506_v41, 0.0  ;;  %v7696_v41 = vld [vmem:[%s14657_s1 + $0x1f8] sm:$0xff] }
 0x420   :  { %7809 = vst.msk [vmem:[%s14658_s6 + $0x180] sm:$0xff] %vm284_vm0, %v7745_v59  ;;  %v7619_v61 = vmax.f32 %v7501_v56, 0.0  ;;  %v10521_v39 = vpop.f32.mrb[116].mxu1 }
 0x421   :  { %v7748_v44 = vadd.f32 %v7684_v40, %v7620_v33  ;;  %v7516_v18 = vadd.f32 %v10521_v39, %v14138_v58  ;;  %v7510_v3 = vpop.f32.mrb[117].mxu1  ;;  %v7695_v40 = vld [vmem:[%s14657_s1 + $0x1f0] sm:$0xff] }
 0x422   :  { %v7747_v51 = vadd.f32 %v7683_v38, %v7619_v61  ;;  %v7511_v0 = vadd.f32 %v14138_v58, %v7510_v3 }
 0x423   :  { %7812 = vst.msk [vmem:[%s14658_s6 + $0x198] sm:$0xff] %vm284_vm0, %v7748_v44  ;;  %v7622_v26 = vmax.f32 %v7516_v18, 0.0 }
 0x424   :  { %7811 = vst.msk [vmem:[%s14658_s6 + $0x190] sm:$0xff] %vm284_vm0, %v7747_v51  ;;  %v7621_v10 = vmax.f32 %v7511_v0, 0.0  ;;  %v10524_v53 = vpop.f32.mrb[118].mxu1 }
 0x425   :  { %v7750_v5 = vadd.f32 %v7686_v52, %v7622_v26  ;;  %v7526_v29 = vadd.f32 %v10524_v53, %v14138_v58  ;;  %v7520_v34 = vpop.f32.mrb[119].mxu1 }
 0x426   :  { %v7749_v46 = vadd.f32 %v7685_v4, %v7621_v10  ;;  %v7521_v28 = vadd.f32 %v14138_v58, %v7520_v34 }
 0x427   :  { %7814 = vst.msk [vmem:[%s14658_s6 + $0x1a8] sm:$0xff] %vm284_vm0, %v7750_v5  ;;  %v7624_v7 = vmax.f32 %v7526_v29, 0.0 }
 0x428   :  { %7813 = vst.msk [vmem:[%s14658_s6 + $0x1a0] sm:$0xff] %vm284_vm0, %v7749_v46  ;;  %v7623_v13 = vmax.f32 %v7521_v28, 0.0  ;;  %v10527_v57 = vpop.f32.mrb[120].mxu1 }
 0x429   :  { %v7752_v60 = vadd.f32 %v7688_v11, %v7624_v7  ;;  %v7536_v63 = vadd.f32 %v10527_v57, %v14138_v58  ;;  %v7530_v49 = vpop.f32.mrb[121].mxu1 }
 0x42a   :  { %v7751_v62 = vadd.f32 %v7687_v37, %v7623_v13  ;;  %v7531_v1 = vadd.f32 %v14138_v58, %v7530_v49 }
 0x42b   :  { %7816 = vst.msk [vmem:[%s14658_s6 + $0x1b8] sm:$0xff] %vm284_vm0, %v7752_v60  ;;  %v7626_v19 = vmax.f32 %v7536_v63, 0.0 }
 0x42c   :  { %7815 = vst.msk [vmem:[%s14658_s6 + $0x1b0] sm:$0xff] %vm284_vm0, %v7751_v62  ;;  %v7625_v54 = vmax.f32 %v7531_v1, 0.0  ;;  %v10530_v50 = vpop.f32.mrb[122].mxu1 }
 0x42d   :  { %v7754_v21 = vadd.f32 %v7690_v17, %v7626_v19  ;;  %v7546_v43 = vadd.f32 %v10530_v50, %v14138_v58  ;;  %v7540_v35 = vpop.f32.mrb[123].mxu1 }
 0x42e   :  { %v7753_v25 = vadd.f32 %v7689_v15, %v7625_v54  ;;  %v7541_v36 = vadd.f32 %v14138_v58, %v7540_v35 }
 0x42f   :  { %7818 = vst.msk [vmem:[%s14658_s6 + $0x1c8] sm:$0xff] %vm284_vm0, %v7754_v21  ;;  %v7628_v42 = vmax.f32 %v7546_v43, 0.0 }
 0x430   :  { %7817 = vst.msk [vmem:[%s14658_s6 + $0x1c0] sm:$0xff] %vm284_vm0, %v7753_v25  ;;  %v7627_v22 = vmax.f32 %v7541_v36, 0.0  ;;  %v10533_v20 = vpop.f32.mrb[124].mxu1 }
 0x431   :  { %v7756_v45 = vadd.f32 %v7692_v30, %v7628_v42  ;;  %v7556_v9 = vadd.f32 %v10533_v20, %v14138_v58  ;;  %v7550_v32 = vpop.f32.mrb[125].mxu1 }
 0x432   :  { %v7755_v55 = vadd.f32 %v7691_v14, %v7627_v22  ;;  %v7551_v2 = vadd.f32 %v14138_v58, %v7550_v32 }
 0x433   :  { %7820 = vst.msk [vmem:[%s14658_s6 + $0x1d8] sm:$0xff] %vm284_vm0, %v7756_v45  ;;  %v7630_v48 = vmax.f32 %v7556_v9, 0.0 }
 0x434   :  { %7819 = vst.msk [vmem:[%s14658_s6 + $0x1d0] sm:$0xff] %vm284_vm0, %v7755_v55  ;;  %v7629_v16 = vmax.f32 %v7551_v2, 0.0  ;;  %v10536_v8 = vpop.f32.mrb[126].mxu1 }
 0x435   :  { %v7758_v31 = vadd.f32 %v7694_v27, %v7630_v48  ;;  %v7566_v23 = vadd.f32 %v10536_v8, %v14138_v58  ;;  %v7560_v12 = vpop.f32.mrb[127].mxu1 }
 0x436   :  { %v7757_v6 = vadd.f32 %v7693_v47, %v7629_v16  ;;  %v7561_v24 = vadd.f32 %v14138_v58, %v7560_v12 }
 0x437   :  { %7822 = vst.msk [vmem:[%s14658_s6 + $0x1e8] sm:$0xff] %vm284_vm0, %v7758_v31  ;;  %v7632_v59 = vmax.f32 %v7566_v23, 0.0 }
 0x438   :  { %7821 = vst.msk [vmem:[%s14658_s6 + $0x1e0] sm:$0xff] %vm284_vm0, %v7757_v6  ;;  %v7631_v56 = vmax.f32 %v7561_v24, 0.0 }
 0x439   :  { %v7760_v33 = vadd.f32 %v7696_v41, %v7632_v59 }
 0x43a   :  { %v7759_v38 = vadd.f32 %v7695_v40, %v7631_v56 }
 0x43b   :  { %7824 = vst.msk [vmem:[%s14658_s6 + $0x1f8] sm:$0xff] %vm284_vm0, %v7760_v33 }
 0x43c   :  { %7823 = vst.msk [vmem:[%s14658_s6 + $0x1f0] sm:$0xff] %vm284_vm0, %v7759_v38 }

</bundles_post_ra>
